<compile_context>
chip_gen: v7x
topology: tpu7x:2x2x1
jax: 0.10.0
libtpu: 0.0.40
codegen_flags: <defaults>
</compile_context>

<pallas_src>
import jax
import jax.numpy as jnp
from jax import lax
from jax.experimental import pallas as pl
from jax.experimental.pallas import tpu as pltpu

# ------------------------- config (small, self-consistent) -------------------------
BS = 2
MAX_ENTITY_NUM = 7          # N entities; +1 "end" slot -> N+1 = 8
ENTITY_EMB_DIM = 64         # cfg.entity_embedding_dim
KEY_DIM = 32                # cfg.key_dim  (== LSTM hidden = 32 in reference)
FUNC_DIM = 64               # cfg.func_dim
INPUT_DIM = 64              # cfg.input_dim
HIDDEN_DIM = 32             # cfg.hidden_dim (hard-coded 32 in reference state init)
SEQ = 4                     # teacher-forcing sequence length (= selected_units_num.max())
NEG_INF = -1e9


def _ln(x, g, b, eps=1e-5):
    m = jnp.mean(x, axis=-1, keepdims=True)
    v = jnp.mean(jnp.square(x - m), axis=-1, keepdims=True)
    return (x - m) * lax.rsqrt(v + eps) * g + b


def _selected_units_kernel(
    ee_ref, ae0_ref, ent_ref, sel_ref, sun_ref,
    wm128_ref, wm64_ref, wm32_ref, v128_ref, v64_ref, v32_ref,
    logits_ref, ae_out_ref,
    ee_pad_ref,
):
    TILE, N, E = ee_ref.shape
    NP1 = N + 1
    S = sel_ref.shape[1]
    K = wm32_ref.shape[1]          # 32
    H = wm128_ref.shape[1] // 4    # 32
    F = wm64_ref.shape[1]          # 64 (== INPUT_DIM in this config)
    IN = ae0_ref.shape[1]          # 64
    bf16 = jnp.bfloat16

    # -------- static slices of the packed parameter slabs (bf16 MXU operands) --------
    w_qi = wm128_ref[0:F, :]                       # fused wq2 @ wih        [F, 4H]
    whh = wm128_ref[F:F + H, :]                    #                        [H, 4H]
    wq1 = wm64_ref[0:IN, :]                        #                        [IN, F]
    w_eq = wm64_ref[IN:IN + F, :]                  # fused we2 @ wq1        [F, F]
    we1 = wm64_ref[IN + F:IN + F + K, :]           #                        [K, F]
    we2 = wm64_ref[IN + F + K:IN + F + K + F, :]   #                        [F, IN]
    wk = wm32_ref[...]                             #                        [E, K]

    # f32 bias / LN-affine rows, kept (1, X): sublane broadcast in the add is free
    b_qi = v128_ref[0:1, :]
    g_i, b_i = v128_ref[1:2, :], v128_ref[2:3, :]
    g_h, b_h = v128_ref[3:4, :], v128_ref[4:5, :]
    bq1, b_eq = v64_ref[0:1, :], v64_ref[1:2, :]
    be1, be2 = v64_ref[2:3, :], v64_ref[3:4, :]
    bk = v32_ref[0:1, :]
    g_c, b_c = v32_ref[1:2, :], v32_ref[2:3, :]
    end_emb = v32_ref[3:4, :]

    ent = ent_ref[...]          # [TILE, 1] int32
    sun = sun_ref[...]          # [TILE, 1] int32
    sel = sel_ref[...]          # [TILE, S] int32
    ae0 = ae0_ref[...]          # [TILE, IN] f32

    # -------- _get_key_mask: pad row added in VMEM (no wrapper-side HBM concat) --------
    ee_pad_ref[:, 0:N, :] = ee_ref[...]
    ee_pad_ref[:, N:NP1, :] = jnp.zeros((TILE, 1, E), jnp.float32)
    ee_pad = ee_pad_ref[...]                                     # [TILE, NP1, E]

    key = jnp.dot(ee_pad.reshape(TILE * NP1, E).astype(bf16), wk,
                  preferred_element_type=jnp.float32) + bk
    key = key.reshape(TILE, NP1, K)
    pos3 = lax.broadcasted_iota(jnp.int32, (TILE, NP1, 1), 1)
    key = jnp.where(pos3 == (NP1 - 1), 0.0, key)                 # appended row is zero (not key_fc(0))
    key = jnp.where(pos3 == ent[:, :, None], end_emb[None, :, :], key)
    key_embeddings = key                                         # entity_reduce_type='selected_units_num'

    pos2 = lax.broadcasted_iota(jnp.int32, (TILE, NP1), 1)
    mask = pos2 < ent                                            # step-0 logits mask

    # fused query_fc1 bases (embed_fc2 folded in; both fc layers have activation=None)
    base0 = jnp.dot(ae0.astype(bf16), wq1, preferred_element_type=jnp.float32) + bq1
    base = base0 + b_eq                                          # steps >= 1

    h = jnp.zeros((TILE, H), jnp.float32)
    c = jnp.zeros((TILE, H), jnp.float32)
    one_hot = jnp.zeros((TILE, NP1), jnp.float32)
    end_flag = jnp.zeros((TILE, 1), jnp.bool_)
    e1 = None

    for i in range(S):                                           # static, unrolled
        if i > 0:
            if i == 1:
                mask = jnp.logical_or(mask, pos2 == ent)         # re-enable end slot
            mask = jnp.logical_and(mask, pos2 != sel[:, i - 1:i])
            # fused: q1 = relu(ae @ wq1 + bq1) with ae = ae0 + embed_fc2(e1)
            q1 = jnp.maximum(
                base + jnp.dot(e1.astype(bf16), w_eq, preferred_element_type=jnp.float32), 0.0)
        else:
            q1 = jnp.maximum(base0, 0.0)

        # layer-norm LSTM cell; query_fc2 folded into weight_ih
        igates = _ln(jnp.dot(q1.astype(bf16), w_qi, preferred_element_type=jnp.float32) + b_qi,
                     g_i, b_i)
        hgates = _ln(jnp.dot(h.astype(bf16), whh, preferred_element_type=jnp.float32),
                     g_h, b_h)
        gates = igates + hgates
        in_g = jax.nn.sigmoid(gates[:, 0:H])
        f_g = jax.nn.sigmoid(gates[:, H:2 * H])
        g_g = jnp.tanh(gates[:, 2 * H:3 * H])
        o_g = jax.nn.sigmoid(gates[:, 3 * H:4 * H])
        c = _ln(f_g * c + in_g * g_g, g_c, b_c)
        h = o_g * jnp.tanh(c)

        # step logits = <lstm_output, key_j>, masked_fill(~mask, -1e9);
        # stored straight into the lane-dense flat output block (off the serial chain)
        lg = jnp.sum(h[:, None, :] * key, axis=-1)               # [TILE, NP1]
        logits_ref[:, i * NP1:(i + 1) * NP1] = jnp.where(mask, lg, NEG_INF)

        # autoregressive-embedding update ('selected_units_num' reduce type)
        sel_i = sel[:, i:i + 1]
        end_flag = jnp.logical_or(end_flag, sel_i == ent)
        step_oh = jnp.logical_and(pos2 == sel_i, jnp.logical_not(end_flag))
        one_hot = jnp.maximum(one_hot, step_oh.astype(jnp.float32))
        sue = jnp.sum(key_embeddings * one_hot[:, :, None], axis=1)      # [TILE, K]
        denom = jnp.sum(one_hot, axis=1, keepdims=True)                  # running count (as reference)
        safe_denom = jnp.where(denom > 0.0, denom, 1.0)                  # guard 0/0 -> no NaN
        sue = jnp.where(sun != 0, sue / safe_denom, sue)
        e1 = jnp.maximum(
            jnp.dot(sue.astype(bf16), we1, preferred_element_type=jnp.float32) + be1, 0.0)

    # final autoregressive embedding: ae0 + embed_fc2(embed_fc1(sue_last))
    ae_out_ref[...] = ae0 + jnp.dot(e1.astype(bf16), we2,
                                    preferred_element_type=jnp.float32) + be2


# --------------------------------- parameters ---------------------------------
def init_params(key):
    ks = jax.random.split(key, 8)

    def lin(k, fan_in, fan_out):
        bound = 1.0 / (fan_in ** 0.5)
        k1, k2 = jax.random.split(k)
        w = jax.random.uniform(k1, (fan_in, fan_out), jnp.float32, -bound, bound)
        b = jax.random.uniform(k2, (1, fan_out), jnp.float32, -bound, bound)
        return w, b

    p = {}
    p['wk'], p['bk'] = lin(ks[0], ENTITY_EMB_DIM, KEY_DIM)       # key_fc
    p['wq1'], p['bq1'] = lin(ks[1], INPUT_DIM, FUNC_DIM)         # query_fc1
    p['wq2'], p['bq2'] = lin(ks[2], FUNC_DIM, KEY_DIM)           # query_fc2
    p['we1'], p['be1'] = lin(ks[3], KEY_DIM, FUNC_DIM)           # embed_fc1
    p['we2'], p['be2'] = lin(ks[4], FUNC_DIM, INPUT_DIM)         # embed_fc2
    # LN-LSTM weights stored pre-transposed as [in, 4H] / [H, 4H]
    p['wih'] = jax.random.normal(ks[5], (KEY_DIM, 4 * HIDDEN_DIM), jnp.float32) * 0.1
    p['whh'] = jax.random.normal(ks[6], (HIDDEN_DIM, 4 * HIDDEN_DIM), jnp.float32) * 0.1
    p['g_i'] = jnp.ones((1, 4 * HIDDEN_DIM), jnp.float32)
    p['b_i'] = jnp.zeros((1, 4 * HIDDEN_DIM), jnp.float32)
    p['g_h'] = jnp.ones((1, 4 * HIDDEN_DIM), jnp.float32)
    p['b_h'] = jnp.zeros((1, 4 * HIDDEN_DIM), jnp.float32)
    p['g_c'] = jnp.ones((1, HIDDEN_DIM), jnp.float32)
    p['b_c'] = jnp.zeros((1, HIDDEN_DIM), jnp.float32)
    stdv = 1.0 / (KEY_DIM ** 0.5)
    p['end'] = jax.random.uniform(ks[7], (1, KEY_DIM), jnp.float32, -stdv, stdv)
    return p


def pack_params(p):
    """Host-side, once-per-model precompute:
      * fold the activation-free linears on the recurrence critical path
        (query_fc2 into weight_ih, embed_fc2 into query_fc1),
      * cast MXU operands to bf16,
      * pack 19 small tensors into 6 contiguous slabs grouped by dtype/lane width.
    """
    assert FUNC_DIM == INPUT_DIM, "wm64 packing groups the width-64 matrices together"
    w_qi = jnp.dot(p['wq2'], p['wih'])          # [F, 4H]
    b_qi = jnp.dot(p['bq2'], p['wih'])          # [1, 4H]
    w_eq = jnp.dot(p['we2'], p['wq1'])          # [F, F]
    b_eq = jnp.dot(p['be2'], p['wq1'])          # [1, F]

    wm128 = jnp.concatenate([w_qi, p['whh']], axis=0).astype(jnp.bfloat16)               # [96, 128]
    wm64 = jnp.concatenate([p['wq1'], w_eq, p['we1'], p['we2']], axis=0).astype(jnp.bfloat16)  # [224, 64]
    wm32 = p['wk'].astype(jnp.bfloat16)                                                  # [64, 32]

    def rows(vs, width):
        buf = jnp.zeros((8, width), jnp.float32)
        for r, v in enumerate(vs):
            buf = buf.at[r].set(v.reshape(width))
        return buf

    v128 = rows([b_qi, p['g_i'], p['b_i'], p['g_h'], p['b_h']], 4 * HIDDEN_DIM)  # [8, 128]
    v64 = rows([p['bq1'], b_eq, p['be1'], p['be2']], FUNC_DIM)                   # [8, 64]
    v32 = rows([p['bk'], p['g_c'], p['b_c'], p['end']], KEY_DIM)                 # [8, 32]
    return dict(wm128=wm128, wm64=wm64, wm32=wm32, v128=v128, v64=v64, v32=v32)


# ----------------------------------- wrapper -----------------------------------
def selected_units_head_forward(packed, embedding, entity_embedding, entity_num,
                                selected_units_num, selected_units):
    bs, N, E = entity_embedding.shape
    NP1 = N + 1
    IN = embedding.shape[1]
    S = selected_units.shape[1]   # static stand-in for selected_units_num.max()

    ent = entity_num.reshape(bs, 1).astype(jnp.int32)
    sel = selected_units.astype(jnp.int32)
    sun = selected_units_num.reshape(bs, 1).astype(jnp.int32)

    # Grid: one batch tile per grid point.  v5e/v6e (single TC): keep one grid
    # point when the batch fits (extra grid steps cost ~0.35us each).  v7x /
    # production batches: use >=2 parallel tiles (TILE multiple of 8, ideally
    # >=128 so batch fills the MXU M axis); weights stay resident (constant map).
    n_tiles = 1
    assert bs % n_tiles == 0
    TILE = bs // n_tiles
    grid = (n_tiles,)

    in_specs = [
        pl.BlockSpec((TILE, N, E), lambda b: (b, 0, 0)),    # raw entity embeddings (padded in-kernel)
        pl.BlockSpec((TILE, IN), lambda b: (b, 0)),         # autoregressive embedding
        pl.BlockSpec((TILE, 1), lambda b: (b, 0)),          # entity_num
        pl.BlockSpec((TILE, S), lambda b: (b, 0)),          # selected_units
        pl.BlockSpec((TILE, 1), lambda b: (b, 0)),          # selected_units_num
        # packed, grid-invariant parameter slabs
        pl.BlockSpec(packed['wm128'].shape, lambda b: (0, 0)),
        pl.BlockSpec(packed['wm64'].shape, lambda b: (0, 0)),
        pl.BlockSpec(packed['wm32'].shape, lambda b: (0, 0)),
        pl.BlockSpec(packed['v128'].shape, lambda b: (0, 0)),
        pl.BlockSpec(packed['v64'].shape, lambda b: (0, 0)),
        pl.BlockSpec(packed['v32'].shape, lambda b: (0, 0)),
    ]
    out_shape = (
        jax.ShapeDtypeStruct((bs, S * NP1), jnp.float32),   # lane-dense flat logits
        jax.ShapeDtypeStruct((bs, IN), jnp.float32),        # updated autoregressive embedding
    )
    out_specs = (
        pl.BlockSpec((TILE, S * NP1), lambda b: (b, 0)),
        pl.BlockSpec((TILE, IN), lambda b: (b, 0)),
    )
    scratch_shapes = [pltpu.VMEM((TILE, NP1, E), jnp.float32)]   # in-kernel padded entity embeddings

    logits_flat, ae = pl.pallas_call(
        _selected_units_kernel,
        out_shape=out_shape,
        grid=grid,
        in_specs=in_specs,
        out_specs=out_specs,
        scratch_shapes=scratch_shapes,
        compiler_params=pltpu.CompilerParams(dimension_semantics=("parallel",)),
    )(entity_embedding, embedding, ent, sel, sun,
      packed['wm128'], packed['wm64'], packed['wm32'],
      packed['v128'], packed['v64'], packed['v32'])

    logits = logits_flat.reshape(bs, S, NP1)

    # glue: in the teacher-forcing path, results is None and extra_units is all-zeros
    results = None
    extra_units = jnp.zeros((bs, NP1), jnp.float32)
    return logits, results, ae, selected_units_num, extra_units


if __name__ == "__main__":
    key = jax.random.PRNGKey(0)
    kp, k1, k2 = jax.random.split(key, 3)
    params = init_params(kp)
    packed = pack_params(params)          # host-side, once-per-model precompute

    embedding = jax.random.normal(k1, (BS, INPUT_DIM), jnp.float32)
    entity_embedding = jax.random.normal(k2, (BS, MAX_ENTITY_NUM, ENTITY_EMB_DIM), jnp.float32)
    entity_num = jnp.array([6, 5], jnp.int32)                 # valid entities per batch
    selected_units_num = jnp.array([4, 3], jnp.int32)         # max == SEQ
    selected_units = jnp.array([[1, 3, 5, 6],                 # batch 0 ends with end-token (6)
                                [0, 2, 5, 0]], jnp.int32)     # batch 1 ends with end-token (5)

    logits, results, ae, sun, extra = selected_units_head_forward(
        packed, embedding, entity_embedding, entity_num, selected_units_num, selected_units)
    jax.block_until_ready((logits, ae, extra))

    assert logits.shape == (BS, SEQ, MAX_ENTITY_NUM + 1)
    assert ae.shape == (BS, INPUT_DIM)
    assert extra.shape == (BS, MAX_ENTITY_NUM + 1)
    assert bool(jnp.all(jnp.isfinite(ae)))
    assert bool(jnp.all(jnp.isfinite(logits)))
    print("KERNEL_OK")
</pallas_src>

<mosaic_0001>
module attributes {stable_mosaic.version = 11 : i64} {
  func.func @_selected_units_kernel(%arg0: i32, %arg1: memref<2x7x64xf32, #tpu.memory_space<vmem>>, %arg2: memref<2x64xf32, #tpu.memory_space<vmem>>, %arg3: memref<2x1xi32, #tpu.memory_space<vmem>>, %arg4: memref<2x4xi32, #tpu.memory_space<vmem>>, %arg5: memref<2x1xi32, #tpu.memory_space<vmem>>, %arg6: memref<96x128xbf16, #tpu.memory_space<vmem>>, %arg7: memref<224x64xbf16, #tpu.memory_space<vmem>>, %arg8: memref<64x32xbf16, #tpu.memory_space<vmem>>, %arg9: memref<8x128xf32, #tpu.memory_space<vmem>>, %arg10: memref<8x64xf32, #tpu.memory_space<vmem>>, %arg11: memref<8x32xf32, #tpu.memory_space<vmem>>, %arg12: memref<2x32xf32, #tpu.memory_space<vmem>>, %arg13: memref<2x64xf32, #tpu.memory_space<vmem>>, %arg14: memref<2x8x64xf32, #tpu.memory_space<vmem>>) attributes {dimension_semantics = [#tpu.dimension_semantics<parallel>], iteration_bounds = array<i64: 1>, scalar_prefetch = 0 : i64, scratch_operands = 1 : i64, tpu.core_type = #tpu.core_type<tc>, window_params = [{transform_indices = @transform_0, window_bounds = array<i64: 2, 7, 64>}, {transform_indices = @transform_1, window_bounds = array<i64: 2, 64>}, {transform_indices = @transform_2, window_bounds = array<i64: 2, 1>}, {transform_indices = @transform_3, window_bounds = array<i64: 2, 4>}, {transform_indices = @transform_4, window_bounds = array<i64: 2, 1>}, {pipeline_mode = #tpu.pipeline_mode<synchronous>, transform_indices = @transform_5, window_bounds = array<i64: 96, 128>}, {pipeline_mode = #tpu.pipeline_mode<synchronous>, transform_indices = @transform_6, window_bounds = array<i64: 224, 64>}, {pipeline_mode = #tpu.pipeline_mode<synchronous>, transform_indices = @transform_7, window_bounds = array<i64: 64, 32>}, {pipeline_mode = #tpu.pipeline_mode<synchronous>, transform_indices = @transform_8, window_bounds = array<i64: 8, 128>}, {pipeline_mode = #tpu.pipeline_mode<synchronous>, transform_indices = @transform_9, window_bounds = array<i64: 8, 64>}, {pipeline_mode = #tpu.pipeline_mode<synchronous>, transform_indices = @transform_10, window_bounds = array<i64: 8, 32>}, {transform_indices = @transform_11, window_bounds = array<i64: 2, 32>}, {transform_indices = @transform_12, window_bounds = array<i64: 2, 64>}]} {
    %c0 = arith.constant 0 : index
    %c0_0 = arith.constant 0 : index
    %0 = vector.load %arg6[%c0, %c0_0] : memref<96x128xbf16, #tpu.memory_space<vmem>>, vector<64x128xbf16>
    %c64 = arith.constant 64 : index
    %c0_1 = arith.constant 0 : index
    %1 = vector.load %arg6[%c64, %c0_1] : memref<96x128xbf16, #tpu.memory_space<vmem>>, vector<32x128xbf16>
    %c0_2 = arith.constant 0 : index
    %c0_3 = arith.constant 0 : index
    %2 = vector.load %arg7[%c0_2, %c0_3] : memref<224x64xbf16, #tpu.memory_space<vmem>>, vector<64x64xbf16>
    %c64_4 = arith.constant 64 : index
    %c0_5 = arith.constant 0 : index
    %3 = vector.load %arg7[%c64_4, %c0_5] : memref<224x64xbf16, #tpu.memory_space<vmem>>, vector<64x64xbf16>
    %c128 = arith.constant 128 : index
    %c0_6 = arith.constant 0 : index
    %4 = vector.load %arg7[%c128, %c0_6] : memref<224x64xbf16, #tpu.memory_space<vmem>>, vector<32x64xbf16>
    %c160 = arith.constant 160 : index
    %c0_7 = arith.constant 0 : index
    %5 = vector.load %arg7[%c160, %c0_7] : memref<224x64xbf16, #tpu.memory_space<vmem>>, vector<64x64xbf16>
    %c0_8 = arith.constant 0 : index
    %c0_9 = arith.constant 0 : index
    %6 = vector.load %arg8[%c0_8, %c0_9] : memref<64x32xbf16, #tpu.memory_space<vmem>>, vector<64x32xbf16>
    %c0_10 = arith.constant 0 : index
    %c0_11 = arith.constant 0 : index
    %7 = vector.load %arg9[%c0_10, %c0_11] : memref<8x128xf32, #tpu.memory_space<vmem>>, vector<1x128xf32>
    %c1 = arith.constant 1 : index
    %c0_12 = arith.constant 0 : index
    %8 = vector.load %arg9[%c1, %c0_12] : memref<8x128xf32, #tpu.memory_space<vmem>>, vector<1x128xf32>
    %c2 = arith.constant 2 : index
    %c0_13 = arith.constant 0 : index
    %9 = vector.load %arg9[%c2, %c0_13] : memref<8x128xf32, #tpu.memory_space<vmem>>, vector<1x128xf32>
    %c3 = arith.constant 3 : index
    %c0_14 = arith.constant 0 : index
    %10 = vector.load %arg9[%c3, %c0_14] : memref<8x128xf32, #tpu.memory_space<vmem>>, vector<1x128xf32>
    %c4 = arith.constant 4 : index
    %c0_15 = arith.constant 0 : index
    %11 = vector.load %arg9[%c4, %c0_15] : memref<8x128xf32, #tpu.memory_space<vmem>>, vector<1x128xf32>
    %c0_16 = arith.constant 0 : index
    %c0_17 = arith.constant 0 : index
    %12 = vector.load %arg10[%c0_16, %c0_17] : memref<8x64xf32, #tpu.memory_space<vmem>>, vector<1x64xf32>
    %c1_18 = arith.constant 1 : index
    %c0_19 = arith.constant 0 : index
    %13 = vector.load %arg10[%c1_18, %c0_19] : memref<8x64xf32, #tpu.memory_space<vmem>>, vector<1x64xf32>
    %c2_20 = arith.constant 2 : index
    %c0_21 = arith.constant 0 : index
    %14 = vector.load %arg10[%c2_20, %c0_21] : memref<8x64xf32, #tpu.memory_space<vmem>>, vector<1x64xf32>
    %c3_22 = arith.constant 3 : index
    %c0_23 = arith.constant 0 : index
    %15 = vector.load %arg10[%c3_22, %c0_23] : memref<8x64xf32, #tpu.memory_space<vmem>>, vector<1x64xf32>
    %c0_24 = arith.constant 0 : index
    %c0_25 = arith.constant 0 : index
    %16 = vector.load %arg11[%c0_24, %c0_25] : memref<8x32xf32, #tpu.memory_space<vmem>>, vector<1x32xf32>
    %c1_26 = arith.constant 1 : index
    %c0_27 = arith.constant 0 : index
    %17 = vector.load %arg11[%c1_26, %c0_27] : memref<8x32xf32, #tpu.memory_space<vmem>>, vector<1x32xf32>
    %c2_28 = arith.constant 2 : index
    %c0_29 = arith.constant 0 : index
    %18 = vector.load %arg11[%c2_28, %c0_29] : memref<8x32xf32, #tpu.memory_space<vmem>>, vector<1x32xf32>
    %c3_30 = arith.constant 3 : index
    %c0_31 = arith.constant 0 : index
    %19 = vector.load %arg11[%c3_30, %c0_31] : memref<8x32xf32, #tpu.memory_space<vmem>>, vector<1x32xf32>
    %c0_32 = arith.constant 0 : index
    %c0_33 = arith.constant 0 : index
    %20 = vector.load %arg3[%c0_32, %c0_33] : memref<2x1xi32, #tpu.memory_space<vmem>>, vector<2x1xi32>
    %c0_34 = arith.constant 0 : index
    %c0_35 = arith.constant 0 : index
    %21 = vector.load %arg5[%c0_34, %c0_35] : memref<2x1xi32, #tpu.memory_space<vmem>>, vector<2x1xi32>
    %c0_36 = arith.constant 0 : index
    %c0_37 = arith.constant 0 : index
    %22 = vector.load %arg4[%c0_36, %c0_37] : memref<2x4xi32, #tpu.memory_space<vmem>>, vector<2x4xi32>
    %c0_38 = arith.constant 0 : index
    %c0_39 = arith.constant 0 : index
    %23 = vector.load %arg2[%c0_38, %c0_39] : memref<2x64xf32, #tpu.memory_space<vmem>>, vector<2x64xf32>
    %c0_40 = arith.constant 0 : index
    %c0_41 = arith.constant 0 : index
    %c0_42 = arith.constant 0 : index
    %24 = vector.load %arg1[%c0_40, %c0_41, %c0_42] : memref<2x7x64xf32, #tpu.memory_space<vmem>>, vector<2x7x64xf32>
    %c0_43 = arith.constant 0 : index
    %c0_44 = arith.constant 0 : index
    %c0_45 = arith.constant 0 : index
    %25 = vector.load %arg14[%c0_43, %c0_44, %c0_45] : memref<2x8x64xf32, #tpu.memory_space<vmem>>, vector<2x7x64xf32>
    tpu.vector_store %arg14[%c0_43, %c0_44, %c0_45], %24 {strides = array<i32>} : memref<2x8x64xf32, #tpu.memory_space<vmem>>, vector<2x7x64xf32>,
    %cst = arith.constant 0.000000e+00 : f32
    %26 = vector.broadcast %cst : f32 to vector<2x1x64xf32>
    %c0_46 = arith.constant 0 : index
    %c7 = arith.constant 7 : index
    %c0_47 = arith.constant 0 : index
    %27 = vector.load %arg14[%c0_46, %c7, %c0_47] : memref<2x8x64xf32, #tpu.memory_space<vmem>>, vector<2x1x64xf32>
    tpu.vector_store %arg14[%c0_46, %c7, %c0_47], %26 {strides = array<i32>} : memref<2x8x64xf32, #tpu.memory_space<vmem>>, vector<2x1x64xf32>,
    %c0_48 = arith.constant 0 : index
    %c0_49 = arith.constant 0 : index
    %c0_50 = arith.constant 0 : index
    %28 = vector.load %arg14[%c0_48, %c0_49, %c0_50] : memref<2x8x64xf32, #tpu.memory_space<vmem>>, vector<2x8x64xf32>
    %29 = vector.shape_cast %28 : vector<2x8x64xf32> to vector<16x64xf32>
    %30 = arith.truncf %29 : vector<16x64xf32> to vector<16x64xbf16>
    %cst_51 = arith.constant dense<0.000000e+00> : vector<16x32xf32>
    %31 = tpu.matmul %30, %6, %cst_51 {dimension_numbers = #tpu.dot_dimension_numbers<[1], [0], [0], [1], [0, 0, 1, 1], [], []>} : vector<16x64xbf16>, vector<64x32xbf16>, vector<16x32xf32> -> vector<16x32xf32>
    %32 = vector.broadcast %16 : vector<1x32xf32> to vector<16x32xf32>
    %33 = arith.addf %31, %32 : vector<16x32xf32>
    %34 = vector.shape_cast %33 : vector<16x32xf32> to vector<2x8x32xf32>
    %35 = tpu.iota {dimensions = array<i32: 1>} : vector<2x8x1xi32>
    %c7_i32 = arith.constant 7 : i32
    %36 = vector.broadcast %c7_i32 : i32 to vector<2x8x1xi32>
    %37 = arith.cmpi eq, %35, %36 : vector<2x8x1xi32>
    %cst_52 = arith.constant 0.000000e+00 : f32
    %38 = vector.shape_cast %37 : vector<2x8x1xi1> to vector<2x8x1xi1>
    %39 = vector.broadcast %38 : vector<2x8x1xi1> to vector<2x8x32xi1>
    %40 = vector.broadcast %cst_52 : f32 to vector<2x8x32xf32>
    %41 = arith.select %39, %40, %34 : vector<2x8x32xi1>, vector<2x8x32xf32>
    %42 = vector.shape_cast %20 : vector<2x1xi32> to vector<2x1x1xi32>
    %43 = vector.broadcast %42 : vector<2x1x1xi32> to vector<2x8x1xi32>
    %44 = arith.cmpi eq, %35, %43 : vector<2x8x1xi32>
    %45 = vector.shape_cast %19 : vector<1x32xf32> to vector<1x1x32xf32>
    %46 = vector.shape_cast %44 : vector<2x8x1xi1> to vector<2x8x1xi1>
    %47 = vector.broadcast %46 : vector<2x8x1xi1> to vector<2x8x32xi1>
    %48 = vector.shape_cast %45 : vector<1x1x32xf32> to vector<1x1x32xf32>
    %49 = vector.broadcast %48 : vector<1x1x32xf32> to vector<2x8x32xf32>
    %50 = arith.select %47, %49, %41 : vector<2x8x32xi1>, vector<2x8x32xf32>
    %51 = tpu.iota {dimensions = array<i32: 1>} : vector<2x8xi32>
    %52 = vector.broadcast %20 : vector<2x1xi32> to vector<2x8xi32>
    %53 = arith.cmpi slt, %51, %52 : vector<2x8xi32>
    %54 = arith.truncf %23 : vector<2x64xf32> to vector<2x64xbf16>
    %cst_53 = arith.constant dense<0.000000e+00> : vector<2x64xf32>
    %55 = tpu.matmul %54, %2, %cst_53 {dimension_numbers = #tpu.dot_dimension_numbers<[1], [0], [0], [1], [0, 0, 1, 1], [], []>} : vector<2x64xbf16>, vector<64x64xbf16>, vector<2x64xf32> -> vector<2x64xf32>
    %56 = vector.broadcast %12 : vector<1x64xf32> to vector<2x64xf32>
    %57 = arith.addf %55, %56 : vector<2x64xf32>
    %58 = vector.broadcast %13 : vector<1x64xf32> to vector<2x64xf32>
    %59 = arith.addf %57, %58 : vector<2x64xf32>
    %cst_54 = arith.constant 0.000000e+00 : f32
    %60 = vector.broadcast %cst_54 : f32 to vector<2x32xf32>
    %cst_55 = arith.constant 0.000000e+00 : f32
    %61 = vector.broadcast %cst_55 : f32 to vector<2x32xf32>
    %cst_56 = arith.constant 0.000000e+00 : f32
    %62 = vector.broadcast %cst_56 : f32 to vector<2x8xf32>
    %false = arith.constant false
    %63 = vector.broadcast %false : i1 to vector<2x1xi1>
    %cst_57 = arith.constant 0.000000e+00 : f32
    %64 = vector.broadcast %cst_57 : f32 to vector<2x64xf32>
    %65 = arith.maximumf %57, %64 : vector<2x64xf32>
    %66 = arith.truncf %65 : vector<2x64xf32> to vector<2x64xbf16>
    %cst_58 = arith.constant dense<0.000000e+00> : vector<2x128xf32>
    %67 = tpu.matmul %66, %0, %cst_58 {dimension_numbers = #tpu.dot_dimension_numbers<[1], [0], [0], [1], [0, 0, 1, 1], [], []>} : vector<2x64xbf16>, vector<64x128xbf16>, vector<2x128xf32> -> vector<2x128xf32>
    %68 = vector.broadcast %7 : vector<1x128xf32> to vector<2x128xf32>
    %69 = arith.addf %67, %68 : vector<2x128xf32>
    %cst_59 = arith.constant dense<0.000000e+00> : vector<2xf32>
    %70 = vector.multi_reduction <add>, %69, %cst_59 [1] : vector<2x128xf32> to vector<2xf32>
    %71 = vector.shape_cast %70 : vector<2xf32> to vector<2x1xf32>
    %cst_60 = arith.constant 1.280000e+02 : f32
    %72 = vector.broadcast %cst_60 : f32 to vector<2x1xf32>
    %73 = arith.divf %71, %72 : vector<2x1xf32>
    %74 = vector.broadcast %73 : vector<2x1xf32> to vector<2x128xf32>
    %75 = arith.subf %69, %74 : vector<2x128xf32>
    %76 = arith.mulf %75, %75 : vector<2x128xf32>
    %cst_61 = arith.constant dense<0.000000e+00> : vector<2xf32>
    %77 = vector.multi_reduction <add>, %76, %cst_61 [1] : vector<2x128xf32> to vector<2xf32>
    %78 = vector.shape_cast %77 : vector<2xf32> to vector<2x1xf32>
    %cst_62 = arith.constant 1.280000e+02 : f32
    %79 = vector.broadcast %cst_62 : f32 to vector<2x1xf32>
    %80 = arith.divf %78, %79 : vector<2x1xf32>
    %81 = vector.broadcast %73 : vector<2x1xf32> to vector<2x128xf32>
    %82 = arith.subf %69, %81 : vector<2x128xf32>
    %cst_63 = arith.constant 9.99999974E-6 : f32
    %83 = vector.broadcast %cst_63 : f32 to vector<2x1xf32>
    %84 = arith.addf %80, %83 : vector<2x1xf32>
    %85 = math.rsqrt %84 : vector<2x1xf32>
    %86 = vector.broadcast %85 : vector<2x1xf32> to vector<2x128xf32>
    %87 = arith.mulf %82, %86 : vector<2x128xf32>
    %88 = vector.broadcast %8 : vector<1x128xf32> to vector<2x128xf32>
    %89 = arith.mulf %87, %88 : vector<2x128xf32>
    %90 = vector.broadcast %9 : vector<1x128xf32> to vector<2x128xf32>
    %91 = arith.addf %89, %90 : vector<2x128xf32>
    %92 = arith.truncf %60 : vector<2x32xf32> to vector<2x32xbf16>
    %cst_64 = arith.constant dense<0.000000e+00> : vector<2x128xf32>
    %93 = tpu.matmul %92, %1, %cst_64 {dimension_numbers = #tpu.dot_dimension_numbers<[1], [0], [0], [1], [0, 0, 1, 1], [], []>} : vector<2x32xbf16>, vector<32x128xbf16>, vector<2x128xf32> -> vector<2x128xf32>
    %cst_65 = arith.constant dense<0.000000e+00> : vector<2xf32>
    %94 = vector.multi_reduction <add>, %93, %cst_65 [1] : vector<2x128xf32> to vector<2xf32>
    %95 = vector.shape_cast %94 : vector<2xf32> to vector<2x1xf32>
    %cst_66 = arith.constant 1.280000e+02 : f32
    %96 = vector.broadcast %cst_66 : f32 to vector<2x1xf32>
    %97 = arith.divf %95, %96 : vector<2x1xf32>
    %98 = vector.broadcast %97 : vector<2x1xf32> to vector<2x128xf32>
    %99 = arith.subf %93, %98 : vector<2x128xf32>
    %100 = arith.mulf %99, %99 : vector<2x128xf32>
    %cst_67 = arith.constant dense<0.000000e+00> : vector<2xf32>
    %101 = vector.multi_reduction <add>, %100, %cst_67 [1] : vector<2x128xf32> to vector<2xf32>
    %102 = vector.shape_cast %101 : vector<2xf32> to vector<2x1xf32>
    %cst_68 = arith.constant 1.280000e+02 : f32
    %103 = vector.broadcast %cst_68 : f32 to vector<2x1xf32>
    %104 = arith.divf %102, %103 : vector<2x1xf32>
    %105 = vector.broadcast %97 : vector<2x1xf32> to vector<2x128xf32>
    %106 = arith.subf %93, %105 : vector<2x128xf32>
    %cst_69 = arith.constant 9.99999974E-6 : f32
    %107 = vector.broadcast %cst_69 : f32 to vector<2x1xf32>
    %108 = arith.addf %104, %107 : vector<2x1xf32>
    %109 = math.rsqrt %108 : vector<2x1xf32>
    %110 = vector.broadcast %109 : vector<2x1xf32> to vector<2x128xf32>
    %111 = arith.mulf %106, %110 : vector<2x128xf32>
    %112 = vector.broadcast %10 : vector<1x128xf32> to vector<2x128xf32>
    %113 = arith.mulf %111, %112 : vector<2x128xf32>
    %114 = vector.broadcast %11 : vector<1x128xf32> to vector<2x128xf32>
    %115 = arith.addf %113, %114 : vector<2x128xf32>
    %116 = arith.addf %91, %115 : vector<2x128xf32>
    %117 = vector.extract_strided_slice %116 {offsets = [0, 0], sizes = [2, 32], strides = [1, 1]} : vector<2x128xf32> to vector<2x32xf32>
    %118 = arith.negf %117 : vector<2x32xf32>
    %119 = math.exp %118 : vector<2x32xf32>
    %cst_70 = arith.constant 1.000000e+00 : f32
    %120 = vector.broadcast %cst_70 : f32 to vector<2x32xf32>
    %121 = arith.addf %120, %119 : vector<2x32xf32>
    %122 = arith.divf %120, %121 : vector<2x32xf32>
    %123 = vector.extract_strided_slice %116 {offsets = [0, 32], sizes = [2, 32], strides = [1, 1]} : vector<2x128xf32> to vector<2x32xf32>
    %124 = arith.negf %123 : vector<2x32xf32>
    %125 = math.exp %124 : vector<2x32xf32>
    %cst_71 = arith.constant 1.000000e+00 : f32
    %126 = vector.broadcast %cst_71 : f32 to vector<2x32xf32>
    %127 = arith.addf %126, %125 : vector<2x32xf32>
    %128 = arith.divf %126, %127 : vector<2x32xf32>
    %129 = vector.extract_strided_slice %116 {offsets = [0, 64], sizes = [2, 32], strides = [1, 1]} : vector<2x128xf32> to vector<2x32xf32>
    %130 = math.tanh %129 : vector<2x32xf32>
    %131 = vector.extract_strided_slice %116 {offsets = [0, 96], sizes = [2, 32], strides = [1, 1]} : vector<2x128xf32> to vector<2x32xf32>
    %132 = arith.negf %131 : vector<2x32xf32>
    %133 = math.exp %132 : vector<2x32xf32>
    %cst_72 = arith.constant 1.000000e+00 : f32
    %134 = vector.broadcast %cst_72 : f32 to vector<2x32xf32>
    %135 = arith.addf %134, %133 : vector<2x32xf32>
    %136 = arith.divf %134, %135 : vector<2x32xf32>
    %137 = arith.mulf %128, %61 : vector<2x32xf32>
    %138 = arith.mulf %122, %130 : vector<2x32xf32>
    %139 = arith.addf %137, %138 : vector<2x32xf32>
    %cst_73 = arith.constant dense<0.000000e+00> : vector<2xf32>
    %140 = vector.multi_reduction <add>, %139, %cst_73 [1] : vector<2x32xf32> to vector<2xf32>
    %141 = vector.shape_cast %140 : vector<2xf32> to vector<2x1xf32>
    %cst_74 = arith.constant 3.200000e+01 : f32
    %142 = vector.broadcast %cst_74 : f32 to vector<2x1xf32>
    %143 = arith.divf %141, %142 : vector<2x1xf32>
    %144 = vector.broadcast %143 : vector<2x1xf32> to vector<2x32xf32>
    %145 = arith.subf %139, %144 : vector<2x32xf32>
    %146 = arith.mulf %145, %145 : vector<2x32xf32>
    %cst_75 = arith.constant dense<0.000000e+00> : vector<2xf32>
    %147 = vector.multi_reduction <add>, %146, %cst_75 [1] : vector<2x32xf32> to vector<2xf32>
    %148 = vector.shape_cast %147 : vector<2xf32> to vector<2x1xf32>
    %cst_76 = arith.constant 3.200000e+01 : f32
    %149 = vector.broadcast %cst_76 : f32 to vector<2x1xf32>
    %150 = arith.divf %148, %149 : vector<2x1xf32>
    %151 = vector.broadcast %143 : vector<2x1xf32> to vector<2x32xf32>
    %152 = arith.subf %139, %151 : vector<2x32xf32>
    %cst_77 = arith.constant 9.99999974E-6 : f32
    %153 = vector.broadcast %cst_77 : f32 to vector<2x1xf32>
    %154 = arith.addf %150, %153 : vector<2x1xf32>
    %155 = math.rsqrt %154 : vector<2x1xf32>
    %156 = vector.broadcast %155 : vector<2x1xf32> to vector<2x32xf32>
    %157 = arith.mulf %152, %156 : vector<2x32xf32>
    %158 = vector.broadcast %17 : vector<1x32xf32> to vector<2x32xf32>
    %159 = arith.mulf %157, %158 : vector<2x32xf32>
    %160 = vector.broadcast %18 : vector<1x32xf32> to vector<2x32xf32>
    %161 = arith.addf %159, %160 : vector<2x32xf32>
    %162 = math.tanh %161 : vector<2x32xf32>
    %163 = arith.mulf %136, %162 : vector<2x32xf32>
    %164 = vector.shape_cast %163 : vector<2x32xf32> to vector<2x1x32xf32>
    %165 = vector.broadcast %164 : vector<2x1x32xf32> to vector<2x8x32xf32>
    %166 = arith.mulf %165, %50 : vector<2x8x32xf32>
    %cst_78 = arith.constant dense<0.000000e+00> : vector<2x8xf32>
    %167 = vector.multi_reduction <add>, %166, %cst_78 [2] : vector<2x8x32xf32> to vector<2x8xf32>
    %cst_79 = arith.constant -1.000000e+09 : f32
    %168 = vector.broadcast %cst_79 : f32 to vector<2x8xf32>
    %169 = arith.select %53, %167, %168 : vector<2x8xi1>, vector<2x8xf32>
    %c0_80 = arith.constant 0 : index
    %c0_81 = arith.constant 0 : index
    %170 = vector.load %arg12[%c0_80, %c0_81] : memref<2x32xf32, #tpu.memory_space<vmem>>, vector<2x8xf32>
    tpu.vector_store %arg12[%c0_80, %c0_81], %169 {strides = array<i32>} : memref<2x32xf32, #tpu.memory_space<vmem>>, vector<2x8xf32>,
    %171 = vector.extract_strided_slice %22 {offsets = [0, 0], sizes = [2, 1], strides = [1, 1]} : vector<2x4xi32> to vector<2x1xi32>
    %172 = arith.cmpi eq, %171, %20 : vector<2x1xi32>
    %173 = arith.ori %63, %172 : vector<2x1xi1>
    %174 = vector.broadcast %171 : vector<2x1xi32> to vector<2x8xi32>
    %175 = arith.cmpi eq, %51, %174 : vector<2x8xi32>
    %cst_82 = arith.constant dense<true> : vector<2x1xi1>
    %176 = arith.xori %173, %cst_82 : vector<2x1xi1>
    %177 = vector.broadcast %176 : vector<2x1xi1> to vector<2x8xi1>
    %178 = arith.andi %175, %177 : vector<2x8xi1>
    %179 = arith.extui %178 : vector<2x8xi1> to vector<2x8xi32>
    %180 = arith.sitofp %179 : vector<2x8xi32> to vector<2x8xf32>
    %181 = arith.maximumf %62, %180 : vector<2x8xf32>
    %182 = vector.shape_cast %181 : vector<2x8xf32> to vector<2x8x1xf32>
    %183 = vector.broadcast %182 : vector<2x8x1xf32> to vector<2x8x32xf32>
    %184 = arith.mulf %50, %183 : vector<2x8x32xf32>
    %cst_83 = arith.constant dense<0.000000e+00> : vector<2x32xf32>
    %185 = vector.multi_reduction <add>, %184, %cst_83 [1] : vector<2x8x32xf32> to vector<2x32xf32>
    %cst_84 = arith.constant dense<0.000000e+00> : vector<2xf32>
    %186 = vector.multi_reduction <add>, %181, %cst_84 [1] : vector<2x8xf32> to vector<2xf32>
    %187 = vector.shape_cast %186 : vector<2xf32> to vector<2x1xf32>
    %cst_85 = arith.constant 0.000000e+00 : f32
    %188 = vector.broadcast %cst_85 : f32 to vector<2x1xf32>
    %189 = arith.cmpf ogt, %187, %188 : vector<2x1xf32>
    %cst_86 = arith.constant 1.000000e+00 : f32
    %190 = vector.broadcast %cst_86 : f32 to vector<2x1xf32>
    %191 = arith.select %189, %187, %190 : vector<2x1xi1>, vector<2x1xf32>
    %c0_i32 = arith.constant 0 : i32
    %192 = vector.broadcast %c0_i32 : i32 to vector<2x1xi32>
    %193 = arith.cmpi ne, %21, %192 : vector<2x1xi32>
    %194 = vector.broadcast %191 : vector<2x1xf32> to vector<2x32xf32>
    %195 = arith.divf %185, %194 : vector<2x32xf32>
    %196 = vector.shape_cast %193 : vector<2x1xi1> to vector<2x1xi1>
    %197 = vector.broadcast %196 : vector<2x1xi1> to vector<2x32xi1>
    %198 = arith.select %197, %195, %185 : vector<2x32xi1>, vector<2x32xf32>
    %199 = arith.truncf %198 : vector<2x32xf32> to vector<2x32xbf16>
    %cst_87 = arith.constant dense<0.000000e+00> : vector<2x64xf32>
    %200 = tpu.matmul %199, %4, %cst_87 {dimension_numbers = #tpu.dot_dimension_numbers<[1], [0], [0], [1], [0, 0, 1, 1], [], []>} : vector<2x32xbf16>, vector<32x64xbf16>, vector<2x64xf32> -> vector<2x64xf32>
    %201 = vector.broadcast %14 : vector<1x64xf32> to vector<2x64xf32>
    %202 = arith.addf %200, %201 : vector<2x64xf32>
    %cst_88 = arith.constant 0.000000e+00 : f32
    %203 = vector.broadcast %cst_88 : f32 to vector<2x64xf32>
    %204 = arith.maximumf %202, %203 : vector<2x64xf32>
    %205 = vector.broadcast %20 : vector<2x1xi32> to vector<2x8xi32>
    %206 = arith.cmpi eq, %51, %205 : vector<2x8xi32>
    %207 = arith.ori %53, %206 : vector<2x8xi1>
    %208 = vector.extract_strided_slice %22 {offsets = [0, 0], sizes = [2, 1], strides = [1, 1]} : vector<2x4xi32> to vector<2x1xi32>
    %209 = vector.broadcast %208 : vector<2x1xi32> to vector<2x8xi32>
    %210 = arith.cmpi ne, %51, %209 : vector<2x8xi32>
    %211 = arith.andi %207, %210 : vector<2x8xi1>
    %212 = arith.truncf %204 : vector<2x64xf32> to vector<2x64xbf16>
    %cst_89 = arith.constant dense<0.000000e+00> : vector<2x64xf32>
    %213 = tpu.matmul %212, %3, %cst_89 {dimension_numbers = #tpu.dot_dimension_numbers<[1], [0], [0], [1], [0, 0, 1, 1], [], []>} : vector<2x64xbf16>, vector<64x64xbf16>, vector<2x64xf32> -> vector<2x64xf32>
    %214 = arith.addf %59, %213 : vector<2x64xf32>
    %cst_90 = arith.constant 0.000000e+00 : f32
    %215 = vector.broadcast %cst_90 : f32 to vector<2x64xf32>
    %216 = arith.maximumf %214, %215 : vector<2x64xf32>
    %217 = arith.truncf %216 : vector<2x64xf32> to vector<2x64xbf16>
    %cst_91 = arith.constant dense<0.000000e+00> : vector<2x128xf32>
    %218 = tpu.matmul %217, %0, %cst_91 {dimension_numbers = #tpu.dot_dimension_numbers<[1], [0], [0], [1], [0, 0, 1, 1], [], []>} : vector<2x64xbf16>, vector<64x128xbf16>, vector<2x128xf32> -> vector<2x128xf32>
    %219 = vector.broadcast %7 : vector<1x128xf32> to vector<2x128xf32>
    %220 = arith.addf %218, %219 : vector<2x128xf32>
    %cst_92 = arith.constant dense<0.000000e+00> : vector<2xf32>
    %221 = vector.multi_reduction <add>, %220, %cst_92 [1] : vector<2x128xf32> to vector<2xf32>
    %222 = vector.shape_cast %221 : vector<2xf32> to vector<2x1xf32>
    %cst_93 = arith.constant 1.280000e+02 : f32
    %223 = vector.broadcast %cst_93 : f32 to vector<2x1xf32>
    %224 = arith.divf %222, %223 : vector<2x1xf32>
    %225 = vector.broadcast %224 : vector<2x1xf32> to vector<2x128xf32>
    %226 = arith.subf %220, %225 : vector<2x128xf32>
    %227 = arith.mulf %226, %226 : vector<2x128xf32>
    %cst_94 = arith.constant dense<0.000000e+00> : vector<2xf32>
    %228 = vector.multi_reduction <add>, %227, %cst_94 [1] : vector<2x128xf32> to vector<2xf32>
    %229 = vector.shape_cast %228 : vector<2xf32> to vector<2x1xf32>
    %cst_95 = arith.constant 1.280000e+02 : f32
    %230 = vector.broadcast %cst_95 : f32 to vector<2x1xf32>
    %231 = arith.divf %229, %230 : vector<2x1xf32>
    %232 = vector.broadcast %224 : vector<2x1xf32> to vector<2x128xf32>
    %233 = arith.subf %220, %232 : vector<2x128xf32>
    %cst_96 = arith.constant 9.99999974E-6 : f32
    %234 = vector.broadcast %cst_96 : f32 to vector<2x1xf32>
    %235 = arith.addf %231, %234 : vector<2x1xf32>
    %236 = math.rsqrt %235 : vector<2x1xf32>
    %237 = vector.broadcast %236 : vector<2x1xf32> to vector<2x128xf32>
    %238 = arith.mulf %233, %237 : vector<2x128xf32>
    %239 = vector.broadcast %8 : vector<1x128xf32> to vector<2x128xf32>
    %240 = arith.mulf %238, %239 : vector<2x128xf32>
    %241 = vector.broadcast %9 : vector<1x128xf32> to vector<2x128xf32>
    %242 = arith.addf %240, %241 : vector<2x128xf32>
    %243 = arith.truncf %163 : vector<2x32xf32> to vector<2x32xbf16>
    %cst_97 = arith.constant dense<0.000000e+00> : vector<2x128xf32>
    %244 = tpu.matmul %243, %1, %cst_97 {dimension_numbers = #tpu.dot_dimension_numbers<[1], [0], [0], [1], [0, 0, 1, 1], [], []>} : vector<2x32xbf16>, vector<32x128xbf16>, vector<2x128xf32> -> vector<2x128xf32>
    %cst_98 = arith.constant dense<0.000000e+00> : vector<2xf32>
    %245 = vector.multi_reduction <add>, %244, %cst_98 [1] : vector<2x128xf32> to vector<2xf32>
    %246 = vector.shape_cast %245 : vector<2xf32> to vector<2x1xf32>
    %cst_99 = arith.constant 1.280000e+02 : f32
    %247 = vector.broadcast %cst_99 : f32 to vector<2x1xf32>
    %248 = arith.divf %246, %247 : vector<2x1xf32>
    %249 = vector.broadcast %248 : vector<2x1xf32> to vector<2x128xf32>
    %250 = arith.subf %244, %249 : vector<2x128xf32>
    %251 = arith.mulf %250, %250 : vector<2x128xf32>
    %cst_100 = arith.constant dense<0.000000e+00> : vector<2xf32>
    %252 = vector.multi_reduction <add>, %251, %cst_100 [1] : vector<2x128xf32> to vector<2xf32>
    %253 = vector.shape_cast %252 : vector<2xf32> to vector<2x1xf32>
    %cst_101 = arith.constant 1.280000e+02 : f32
    %254 = vector.broadcast %cst_101 : f32 to vector<2x1xf32>
    %255 = arith.divf %253, %254 : vector<2x1xf32>
    %256 = vector.broadcast %248 : vector<2x1xf32> to vector<2x128xf32>
    %257 = arith.subf %244, %256 : vector<2x128xf32>
    %cst_102 = arith.constant 9.99999974E-6 : f32
    %258 = vector.broadcast %cst_102 : f32 to vector<2x1xf32>
    %259 = arith.addf %255, %258 : vector<2x1xf32>
    %260 = math.rsqrt %259 : vector<2x1xf32>
    %261 = vector.broadcast %260 : vector<2x1xf32> to vector<2x128xf32>
    %262 = arith.mulf %257, %261 : vector<2x128xf32>
    %263 = vector.broadcast %10 : vector<1x128xf32> to vector<2x128xf32>
    %264 = arith.mulf %262, %263 : vector<2x128xf32>
    %265 = vector.broadcast %11 : vector<1x128xf32> to vector<2x128xf32>
    %266 = arith.addf %264, %265 : vector<2x128xf32>
    %267 = arith.addf %242, %266 : vector<2x128xf32>
    %268 = vector.extract_strided_slice %267 {offsets = [0, 0], sizes = [2, 32], strides = [1, 1]} : vector<2x128xf32> to vector<2x32xf32>
    %269 = arith.negf %268 : vector<2x32xf32>
    %270 = math.exp %269 : vector<2x32xf32>
    %cst_103 = arith.constant 1.000000e+00 : f32
    %271 = vector.broadcast %cst_103 : f32 to vector<2x32xf32>
    %272 = arith.addf %271, %270 : vector<2x32xf32>
    %273 = arith.divf %271, %272 : vector<2x32xf32>
    %274 = vector.extract_strided_slice %267 {offsets = [0, 32], sizes = [2, 32], strides = [1, 1]} : vector<2x128xf32> to vector<2x32xf32>
    %275 = arith.negf %274 : vector<2x32xf32>
    %276 = math.exp %275 : vector<2x32xf32>
    %cst_104 = arith.constant 1.000000e+00 : f32
    %277 = vector.broadcast %cst_104 : f32 to vector<2x32xf32>
    %278 = arith.addf %277, %276 : vector<2x32xf32>
    %279 = arith.divf %277, %278 : vector<2x32xf32>
    %280 = vector.extract_strided_slice %267 {offsets = [0, 64], sizes = [2, 32], strides = [1, 1]} : vector<2x128xf32> to vector<2x32xf32>
    %281 = math.tanh %280 : vector<2x32xf32>
    %282 = vector.extract_strided_slice %267 {offsets = [0, 96], sizes = [2, 32], strides = [1, 1]} : vector<2x128xf32> to vector<2x32xf32>
    %283 = arith.negf %282 : vector<2x32xf32>
    %284 = math.exp %283 : vector<2x32xf32>
    %cst_105 = arith.constant 1.000000e+00 : f32
    %285 = vector.broadcast %cst_105 : f32 to vector<2x32xf32>
    %286 = arith.addf %285, %284 : vector<2x32xf32>
    %287 = arith.divf %285, %286 : vector<2x32xf32>
    %288 = arith.mulf %279, %161 : vector<2x32xf32>
    %289 = arith.mulf %273, %281 : vector<2x32xf32>
    %290 = arith.addf %288, %289 : vector<2x32xf32>
    %cst_106 = arith.constant dense<0.000000e+00> : vector<2xf32>
    %291 = vector.multi_reduction <add>, %290, %cst_106 [1] : vector<2x32xf32> to vector<2xf32>
    %292 = vector.shape_cast %291 : vector<2xf32> to vector<2x1xf32>
    %cst_107 = arith.constant 3.200000e+01 : f32
    %293 = vector.broadcast %cst_107 : f32 to vector<2x1xf32>
    %294 = arith.divf %292, %293 : vector<2x1xf32>
    %295 = vector.broadcast %294 : vector<2x1xf32> to vector<2x32xf32>
    %296 = arith.subf %290, %295 : vector<2x32xf32>
    %297 = arith.mulf %296, %296 : vector<2x32xf32>
    %cst_108 = arith.constant dense<0.000000e+00> : vector<2xf32>
    %298 = vector.multi_reduction <add>, %297, %cst_108 [1] : vector<2x32xf32> to vector<2xf32>
    %299 = vector.shape_cast %298 : vector<2xf32> to vector<2x1xf32>
    %cst_109 = arith.constant 3.200000e+01 : f32
    %300 = vector.broadcast %cst_109 : f32 to vector<2x1xf32>
    %301 = arith.divf %299, %300 : vector<2x1xf32>
    %302 = vector.broadcast %294 : vector<2x1xf32> to vector<2x32xf32>
    %303 = arith.subf %290, %302 : vector<2x32xf32>
    %cst_110 = arith.constant 9.99999974E-6 : f32
    %304 = vector.broadcast %cst_110 : f32 to vector<2x1xf32>
    %305 = arith.addf %301, %304 : vector<2x1xf32>
    %306 = math.rsqrt %305 : vector<2x1xf32>
    %307 = vector.broadcast %306 : vector<2x1xf32> to vector<2x32xf32>
    %308 = arith.mulf %303, %307 : vector<2x32xf32>
    %309 = vector.broadcast %17 : vector<1x32xf32> to vector<2x32xf32>
    %310 = arith.mulf %308, %309 : vector<2x32xf32>
    %311 = vector.broadcast %18 : vector<1x32xf32> to vector<2x32xf32>
    %312 = arith.addf %310, %311 : vector<2x32xf32>
    %313 = math.tanh %312 : vector<2x32xf32>
    %314 = arith.mulf %287, %313 : vector<2x32xf32>
    %315 = vector.shape_cast %314 : vector<2x32xf32> to vector<2x1x32xf32>
    %316 = vector.broadcast %315 : vector<2x1x32xf32> to vector<2x8x32xf32>
    %317 = arith.mulf %316, %50 : vector<2x8x32xf32>
    %cst_111 = arith.constant dense<0.000000e+00> : vector<2x8xf32>
    %318 = vector.multi_reduction <add>, %317, %cst_111 [2] : vector<2x8x32xf32> to vector<2x8xf32>
    %cst_112 = arith.constant -1.000000e+09 : f32
    %319 = vector.broadcast %cst_112 : f32 to vector<2x8xf32>
    %320 = arith.select %211, %318, %319 : vector<2x8xi1>, vector<2x8xf32>
    %c0_113 = arith.constant 0 : index
    %c8 = arith.constant 8 : index
    %321 = vector.load %arg12[%c0_113, %c8] : memref<2x32xf32, #tpu.memory_space<vmem>>, vector<2x8xf32>
    tpu.vector_store %arg12[%c0_113, %c8], %320 {strides = array<i32>} : memref<2x32xf32, #tpu.memory_space<vmem>>, vector<2x8xf32>,
    %322 = vector.extract_strided_slice %22 {offsets = [0, 1], sizes = [2, 1], strides = [1, 1]} : vector<2x4xi32> to vector<2x1xi32>
    %323 = arith.cmpi eq, %322, %20 : vector<2x1xi32>
    %324 = arith.ori %173, %323 : vector<2x1xi1>
    %325 = vector.broadcast %322 : vector<2x1xi32> to vector<2x8xi32>
    %326 = arith.cmpi eq, %51, %325 : vector<2x8xi32>
    %cst_114 = arith.constant dense<true> : vector<2x1xi1>
    %327 = arith.xori %324, %cst_114 : vector<2x1xi1>
    %328 = vector.broadcast %327 : vector<2x1xi1> to vector<2x8xi1>
    %329 = arith.andi %326, %328 : vector<2x8xi1>
    %330 = arith.extui %329 : vector<2x8xi1> to vector<2x8xi32>
    %331 = arith.sitofp %330 : vector<2x8xi32> to vector<2x8xf32>
    %332 = arith.maximumf %181, %331 : vector<2x8xf32>
    %333 = vector.shape_cast %332 : vector<2x8xf32> to vector<2x8x1xf32>
    %334 = vector.broadcast %333 : vector<2x8x1xf32> to vector<2x8x32xf32>
    %335 = arith.mulf %50, %334 : vector<2x8x32xf32>
    %cst_115 = arith.constant dense<0.000000e+00> : vector<2x32xf32>
    %336 = vector.multi_reduction <add>, %335, %cst_115 [1] : vector<2x8x32xf32> to vector<2x32xf32>
    %cst_116 = arith.constant dense<0.000000e+00> : vector<2xf32>
    %337 = vector.multi_reduction <add>, %332, %cst_116 [1] : vector<2x8xf32> to vector<2xf32>
    %338 = vector.shape_cast %337 : vector<2xf32> to vector<2x1xf32>
    %cst_117 = arith.constant 0.000000e+00 : f32
    %339 = vector.broadcast %cst_117 : f32 to vector<2x1xf32>
    %340 = arith.cmpf ogt, %338, %339 : vector<2x1xf32>
    %cst_118 = arith.constant 1.000000e+00 : f32
    %341 = vector.broadcast %cst_118 : f32 to vector<2x1xf32>
    %342 = arith.select %340, %338, %341 : vector<2x1xi1>, vector<2x1xf32>
    %c0_i32_119 = arith.constant 0 : i32
    %343 = vector.broadcast %c0_i32_119 : i32 to vector<2x1xi32>
    %344 = arith.cmpi ne, %21, %343 : vector<2x1xi32>
    %345 = vector.broadcast %342 : vector<2x1xf32> to vector<2x32xf32>
    %346 = arith.divf %336, %345 : vector<2x32xf32>
    %347 = vector.shape_cast %344 : vector<2x1xi1> to vector<2x1xi1>
    %348 = vector.broadcast %347 : vector<2x1xi1> to vector<2x32xi1>
    %349 = arith.select %348, %346, %336 : vector<2x32xi1>, vector<2x32xf32>
    %350 = arith.truncf %349 : vector<2x32xf32> to vector<2x32xbf16>
    %cst_120 = arith.constant dense<0.000000e+00> : vector<2x64xf32>
    %351 = tpu.matmul %350, %4, %cst_120 {dimension_numbers = #tpu.dot_dimension_numbers<[1], [0], [0], [1], [0, 0, 1, 1], [], []>} : vector<2x32xbf16>, vector<32x64xbf16>, vector<2x64xf32> -> vector<2x64xf32>
    %352 = vector.broadcast %14 : vector<1x64xf32> to vector<2x64xf32>
    %353 = arith.addf %351, %352 : vector<2x64xf32>
    %cst_121 = arith.constant 0.000000e+00 : f32
    %354 = vector.broadcast %cst_121 : f32 to vector<2x64xf32>
    %355 = arith.maximumf %353, %354 : vector<2x64xf32>
    %356 = vector.extract_strided_slice %22 {offsets = [0, 1], sizes = [2, 1], strides = [1, 1]} : vector<2x4xi32> to vector<2x1xi32>
    %357 = vector.broadcast %356 : vector<2x1xi32> to vector<2x8xi32>
    %358 = arith.cmpi ne, %51, %357 : vector<2x8xi32>
    %359 = arith.andi %211, %358 : vector<2x8xi1>
    %360 = arith.truncf %355 : vector<2x64xf32> to vector<2x64xbf16>
    %cst_122 = arith.constant dense<0.000000e+00> : vector<2x64xf32>
    %361 = tpu.matmul %360, %3, %cst_122 {dimension_numbers = #tpu.dot_dimension_numbers<[1], [0], [0], [1], [0, 0, 1, 1], [], []>} : vector<2x64xbf16>, vector<64x64xbf16>, vector<2x64xf32> -> vector<2x64xf32>
    %362 = arith.addf %59, %361 : vector<2x64xf32>
    %cst_123 = arith.constant 0.000000e+00 : f32
    %363 = vector.broadcast %cst_123 : f32 to vector<2x64xf32>
    %364 = arith.maximumf %362, %363 : vector<2x64xf32>
    %365 = arith.truncf %364 : vector<2x64xf32> to vector<2x64xbf16>
    %cst_124 = arith.constant dense<0.000000e+00> : vector<2x128xf32>
    %366 = tpu.matmul %365, %0, %cst_124 {dimension_numbers = #tpu.dot_dimension_numbers<[1], [0], [0], [1], [0, 0, 1, 1], [], []>} : vector<2x64xbf16>, vector<64x128xbf16>, vector<2x128xf32> -> vector<2x128xf32>
    %367 = vector.broadcast %7 : vector<1x128xf32> to vector<2x128xf32>
    %368 = arith.addf %366, %367 : vector<2x128xf32>
    %cst_125 = arith.constant dense<0.000000e+00> : vector<2xf32>
    %369 = vector.multi_reduction <add>, %368, %cst_125 [1] : vector<2x128xf32> to vector<2xf32>
    %370 = vector.shape_cast %369 : vector<2xf32> to vector<2x1xf32>
    %cst_126 = arith.constant 1.280000e+02 : f32
    %371 = vector.broadcast %cst_126 : f32 to vector<2x1xf32>
    %372 = arith.divf %370, %371 : vector<2x1xf32>
    %373 = vector.broadcast %372 : vector<2x1xf32> to vector<2x128xf32>
    %374 = arith.subf %368, %373 : vector<2x128xf32>
    %375 = arith.mulf %374, %374 : vector<2x128xf32>
    %cst_127 = arith.constant dense<0.000000e+00> : vector<2xf32>
    %376 = vector.multi_reduction <add>, %375, %cst_127 [1] : vector<2x128xf32> to vector<2xf32>
    %377 = vector.shape_cast %376 : vector<2xf32> to vector<2x1xf32>
    %cst_128 = arith.constant 1.280000e+02 : f32
    %378 = vector.broadcast %cst_128 : f32 to vector<2x1xf32>
    %379 = arith.divf %377, %378 : vector<2x1xf32>
    %380 = vector.broadcast %372 : vector<2x1xf32> to vector<2x128xf32>
    %381 = arith.subf %368, %380 : vector<2x128xf32>
    %cst_129 = arith.constant 9.99999974E-6 : f32
    %382 = vector.broadcast %cst_129 : f32 to vector<2x1xf32>
    %383 = arith.addf %379, %382 : vector<2x1xf32>
    %384 = math.rsqrt %383 : vector<2x1xf32>
    %385 = vector.broadcast %384 : vector<2x1xf32> to vector<2x128xf32>
    %386 = arith.mulf %381, %385 : vector<2x128xf32>
    %387 = vector.broadcast %8 : vector<1x128xf32> to vector<2x128xf32>
    %388 = arith.mulf %386, %387 : vector<2x128xf32>
    %389 = vector.broadcast %9 : vector<1x128xf32> to vector<2x128xf32>
    %390 = arith.addf %388, %389 : vector<2x128xf32>
    %391 = arith.truncf %314 : vector<2x32xf32> to vector<2x32xbf16>
    %cst_130 = arith.constant dense<0.000000e+00> : vector<2x128xf32>
    %392 = tpu.matmul %391, %1, %cst_130 {dimension_numbers = #tpu.dot_dimension_numbers<[1], [0], [0], [1], [0, 0, 1, 1], [], []>} : vector<2x32xbf16>, vector<32x128xbf16>, vector<2x128xf32> -> vector<2x128xf32>
    %cst_131 = arith.constant dense<0.000000e+00> : vector<2xf32>
    %393 = vector.multi_reduction <add>, %392, %cst_131 [1] : vector<2x128xf32> to vector<2xf32>
    %394 = vector.shape_cast %393 : vector<2xf32> to vector<2x1xf32>
    %cst_132 = arith.constant 1.280000e+02 : f32
    %395 = vector.broadcast %cst_132 : f32 to vector<2x1xf32>
    %396 = arith.divf %394, %395 : vector<2x1xf32>
    %397 = vector.broadcast %396 : vector<2x1xf32> to vector<2x128xf32>
    %398 = arith.subf %392, %397 : vector<2x128xf32>
    %399 = arith.mulf %398, %398 : vector<2x128xf32>
    %cst_133 = arith.constant dense<0.000000e+00> : vector<2xf32>
    %400 = vector.multi_reduction <add>, %399, %cst_133 [1] : vector<2x128xf32> to vector<2xf32>
    %401 = vector.shape_cast %400 : vector<2xf32> to vector<2x1xf32>
    %cst_134 = arith.constant 1.280000e+02 : f32
    %402 = vector.broadcast %cst_134 : f32 to vector<2x1xf32>
    %403 = arith.divf %401, %402 : vector<2x1xf32>
    %404 = vector.broadcast %396 : vector<2x1xf32> to vector<2x128xf32>
    %405 = arith.subf %392, %404 : vector<2x128xf32>
    %cst_135 = arith.constant 9.99999974E-6 : f32
    %406 = vector.broadcast %cst_135 : f32 to vector<2x1xf32>
    %407 = arith.addf %403, %406 : vector<2x1xf32>
    %408 = math.rsqrt %407 : vector<2x1xf32>
    %409 = vector.broadcast %408 : vector<2x1xf32> to vector<2x128xf32>
    %410 = arith.mulf %405, %409 : vector<2x128xf32>
    %411 = vector.broadcast %10 : vector<1x128xf32> to vector<2x128xf32>
    %412 = arith.mulf %410, %411 : vector<2x128xf32>
    %413 = vector.broadcast %11 : vector<1x128xf32> to vector<2x128xf32>
    %414 = arith.addf %412, %413 : vector<2x128xf32>
    %415 = arith.addf %390, %414 : vector<2x128xf32>
    %416 = vector.extract_strided_slice %415 {offsets = [0, 0], sizes = [2, 32], strides = [1, 1]} : vector<2x128xf32> to vector<2x32xf32>
    %417 = arith.negf %416 : vector<2x32xf32>
    %418 = math.exp %417 : vector<2x32xf32>
    %cst_136 = arith.constant 1.000000e+00 : f32
    %419 = vector.broadcast %cst_136 : f32 to vector<2x32xf32>
    %420 = arith.addf %419, %418 : vector<2x32xf32>
    %421 = arith.divf %419, %420 : vector<2x32xf32>
    %422 = vector.extract_strided_slice %415 {offsets = [0, 32], sizes = [2, 32], strides = [1, 1]} : vector<2x128xf32> to vector<2x32xf32>
    %423 = arith.negf %422 : vector<2x32xf32>
    %424 = math.exp %423 : vector<2x32xf32>
    %cst_137 = arith.constant 1.000000e+00 : f32
    %425 = vector.broadcast %cst_137 : f32 to vector<2x32xf32>
    %426 = arith.addf %425, %424 : vector<2x32xf32>
    %427 = arith.divf %425, %426 : vector<2x32xf32>
    %428 = vector.extract_strided_slice %415 {offsets = [0, 64], sizes = [2, 32], strides = [1, 1]} : vector<2x128xf32> to vector<2x32xf32>
    %429 = math.tanh %428 : vector<2x32xf32>
    %430 = vector.extract_strided_slice %415 {offsets = [0, 96], sizes = [2, 32], strides = [1, 1]} : vector<2x128xf32> to vector<2x32xf32>
    %431 = arith.negf %430 : vector<2x32xf32>
    %432 = math.exp %431 : vector<2x32xf32>
    %cst_138 = arith.constant 1.000000e+00 : f32
    %433 = vector.broadcast %cst_138 : f32 to vector<2x32xf32>
    %434 = arith.addf %433, %432 : vector<2x32xf32>
    %435 = arith.divf %433, %434 : vector<2x32xf32>
    %436 = arith.mulf %427, %312 : vector<2x32xf32>
    %437 = arith.mulf %421, %429 : vector<2x32xf32>
    %438 = arith.addf %436, %437 : vector<2x32xf32>
    %cst_139 = arith.constant dense<0.000000e+00> : vector<2xf32>
    %439 = vector.multi_reduction <add>, %438, %cst_139 [1] : vector<2x32xf32> to vector<2xf32>
    %440 = vector.shape_cast %439 : vector<2xf32> to vector<2x1xf32>
    %cst_140 = arith.constant 3.200000e+01 : f32
    %441 = vector.broadcast %cst_140 : f32 to vector<2x1xf32>
    %442 = arith.divf %440, %441 : vector<2x1xf32>
    %443 = vector.broadcast %442 : vector<2x1xf32> to vector<2x32xf32>
    %444 = arith.subf %438, %443 : vector<2x32xf32>
    %445 = arith.mulf %444, %444 : vector<2x32xf32>
    %cst_141 = arith.constant dense<0.000000e+00> : vector<2xf32>
    %446 = vector.multi_reduction <add>, %445, %cst_141 [1] : vector<2x32xf32> to vector<2xf32>
    %447 = vector.shape_cast %446 : vector<2xf32> to vector<2x1xf32>
    %cst_142 = arith.constant 3.200000e+01 : f32
    %448 = vector.broadcast %cst_142 : f32 to vector<2x1xf32>
    %449 = arith.divf %447, %448 : vector<2x1xf32>
    %450 = vector.broadcast %442 : vector<2x1xf32> to vector<2x32xf32>
    %451 = arith.subf %438, %450 : vector<2x32xf32>
    %cst_143 = arith.constant 9.99999974E-6 : f32
    %452 = vector.broadcast %cst_143 : f32 to vector<2x1xf32>
    %453 = arith.addf %449, %452 : vector<2x1xf32>
    %454 = math.rsqrt %453 : vector<2x1xf32>
    %455 = vector.broadcast %454 : vector<2x1xf32> to vector<2x32xf32>
    %456 = arith.mulf %451, %455 : vector<2x32xf32>
    %457 = vector.broadcast %17 : vector<1x32xf32> to vector<2x32xf32>
    %458 = arith.mulf %456, %457 : vector<2x32xf32>
    %459 = vector.broadcast %18 : vector<1x32xf32> to vector<2x32xf32>
    %460 = arith.addf %458, %459 : vector<2x32xf32>
    %461 = math.tanh %460 : vector<2x32xf32>
    %462 = arith.mulf %435, %461 : vector<2x32xf32>
    %463 = vector.shape_cast %462 : vector<2x32xf32> to vector<2x1x32xf32>
    %464 = vector.broadcast %463 : vector<2x1x32xf32> to vector<2x8x32xf32>
    %465 = arith.mulf %464, %50 : vector<2x8x32xf32>
    %cst_144 = arith.constant dense<0.000000e+00> : vector<2x8xf32>
    %466 = vector.multi_reduction <add>, %465, %cst_144 [2] : vector<2x8x32xf32> to vector<2x8xf32>
    %cst_145 = arith.constant -1.000000e+09 : f32
    %467 = vector.broadcast %cst_145 : f32 to vector<2x8xf32>
    %468 = arith.select %359, %466, %467 : vector<2x8xi1>, vector<2x8xf32>
    %c0_146 = arith.constant 0 : index
    %c16 = arith.constant 16 : index
    %469 = vector.load %arg12[%c0_146, %c16] : memref<2x32xf32, #tpu.memory_space<vmem>>, vector<2x8xf32>
    tpu.vector_store %arg12[%c0_146, %c16], %468 {strides = array<i32>} : memref<2x32xf32, #tpu.memory_space<vmem>>, vector<2x8xf32>,
    %470 = vector.extract_strided_slice %22 {offsets = [0, 2], sizes = [2, 1], strides = [1, 1]} : vector<2x4xi32> to vector<2x1xi32>
    %471 = arith.cmpi eq, %470, %20 : vector<2x1xi32>
    %472 = arith.ori %324, %471 : vector<2x1xi1>
    %473 = vector.broadcast %470 : vector<2x1xi32> to vector<2x8xi32>
    %474 = arith.cmpi eq, %51, %473 : vector<2x8xi32>
    %cst_147 = arith.constant dense<true> : vector<2x1xi1>
    %475 = arith.xori %472, %cst_147 : vector<2x1xi1>
    %476 = vector.broadcast %475 : vector<2x1xi1> to vector<2x8xi1>
    %477 = arith.andi %474, %476 : vector<2x8xi1>
    %478 = arith.extui %477 : vector<2x8xi1> to vector<2x8xi32>
    %479 = arith.sitofp %478 : vector<2x8xi32> to vector<2x8xf32>
    %480 = arith.maximumf %332, %479 : vector<2x8xf32>
    %481 = vector.shape_cast %480 : vector<2x8xf32> to vector<2x8x1xf32>
    %482 = vector.broadcast %481 : vector<2x8x1xf32> to vector<2x8x32xf32>
    %483 = arith.mulf %50, %482 : vector<2x8x32xf32>
    %cst_148 = arith.constant dense<0.000000e+00> : vector<2x32xf32>
    %484 = vector.multi_reduction <add>, %483, %cst_148 [1] : vector<2x8x32xf32> to vector<2x32xf32>
    %cst_149 = arith.constant dense<0.000000e+00> : vector<2xf32>
    %485 = vector.multi_reduction <add>, %480, %cst_149 [1] : vector<2x8xf32> to vector<2xf32>
    %486 = vector.shape_cast %485 : vector<2xf32> to vector<2x1xf32>
    %cst_150 = arith.constant 0.000000e+00 : f32
    %487 = vector.broadcast %cst_150 : f32 to vector<2x1xf32>
    %488 = arith.cmpf ogt, %486, %487 : vector<2x1xf32>
    %cst_151 = arith.constant 1.000000e+00 : f32
    %489 = vector.broadcast %cst_151 : f32 to vector<2x1xf32>
    %490 = arith.select %488, %486, %489 : vector<2x1xi1>, vector<2x1xf32>
    %c0_i32_152 = arith.constant 0 : i32
    %491 = vector.broadcast %c0_i32_152 : i32 to vector<2x1xi32>
    %492 = arith.cmpi ne, %21, %491 : vector<2x1xi32>
    %493 = vector.broadcast %490 : vector<2x1xf32> to vector<2x32xf32>
    %494 = arith.divf %484, %493 : vector<2x32xf32>
    %495 = vector.shape_cast %492 : vector<2x1xi1> to vector<2x1xi1>
    %496 = vector.broadcast %495 : vector<2x1xi1> to vector<2x32xi1>
    %497 = arith.select %496, %494, %484 : vector<2x32xi1>, vector<2x32xf32>
    %498 = arith.truncf %497 : vector<2x32xf32> to vector<2x32xbf16>
    %cst_153 = arith.constant dense<0.000000e+00> : vector<2x64xf32>
    %499 = tpu.matmul %498, %4, %cst_153 {dimension_numbers = #tpu.dot_dimension_numbers<[1], [0], [0], [1], [0, 0, 1, 1], [], []>} : vector<2x32xbf16>, vector<32x64xbf16>, vector<2x64xf32> -> vector<2x64xf32>
    %500 = vector.broadcast %14 : vector<1x64xf32> to vector<2x64xf32>
    %501 = arith.addf %499, %500 : vector<2x64xf32>
    %cst_154 = arith.constant 0.000000e+00 : f32
    %502 = vector.broadcast %cst_154 : f32 to vector<2x64xf32>
    %503 = arith.maximumf %501, %502 : vector<2x64xf32>
    %504 = vector.extract_strided_slice %22 {offsets = [0, 2], sizes = [2, 1], strides = [1, 1]} : vector<2x4xi32> to vector<2x1xi32>
    %505 = vector.broadcast %504 : vector<2x1xi32> to vector<2x8xi32>
    %506 = arith.cmpi ne, %51, %505 : vector<2x8xi32>
    %507 = arith.andi %359, %506 : vector<2x8xi1>
    %508 = arith.truncf %503 : vector<2x64xf32> to vector<2x64xbf16>
    %cst_155 = arith.constant dense<0.000000e+00> : vector<2x64xf32>
    %509 = tpu.matmul %508, %3, %cst_155 {dimension_numbers = #tpu.dot_dimension_numbers<[1], [0], [0], [1], [0, 0, 1, 1], [], []>} : vector<2x64xbf16>, vector<64x64xbf16>, vector<2x64xf32> -> vector<2x64xf32>
    %510 = arith.addf %59, %509 : vector<2x64xf32>
    %cst_156 = arith.constant 0.000000e+00 : f32
    %511 = vector.broadcast %cst_156 : f32 to vector<2x64xf32>
    %512 = arith.maximumf %510, %511 : vector<2x64xf32>
    %513 = arith.truncf %512 : vector<2x64xf32> to vector<2x64xbf16>
    %cst_157 = arith.constant dense<0.000000e+00> : vector<2x128xf32>
    %514 = tpu.matmul %513, %0, %cst_157 {dimension_numbers = #tpu.dot_dimension_numbers<[1], [0], [0], [1], [0, 0, 1, 1], [], []>} : vector<2x64xbf16>, vector<64x128xbf16>, vector<2x128xf32> -> vector<2x128xf32>
    %515 = vector.broadcast %7 : vector<1x128xf32> to vector<2x128xf32>
    %516 = arith.addf %514, %515 : vector<2x128xf32>
    %cst_158 = arith.constant dense<0.000000e+00> : vector<2xf32>
    %517 = vector.multi_reduction <add>, %516, %cst_158 [1] : vector<2x128xf32> to vector<2xf32>
    %518 = vector.shape_cast %517 : vector<2xf32> to vector<2x1xf32>
    %cst_159 = arith.constant 1.280000e+02 : f32
    %519 = vector.broadcast %cst_159 : f32 to vector<2x1xf32>
    %520 = arith.divf %518, %519 : vector<2x1xf32>
    %521 = vector.broadcast %520 : vector<2x1xf32> to vector<2x128xf32>
    %522 = arith.subf %516, %521 : vector<2x128xf32>
    %523 = arith.mulf %522, %522 : vector<2x128xf32>
    %cst_160 = arith.constant dense<0.000000e+00> : vector<2xf32>
    %524 = vector.multi_reduction <add>, %523, %cst_160 [1] : vector<2x128xf32> to vector<2xf32>
    %525 = vector.shape_cast %524 : vector<2xf32> to vector<2x1xf32>
    %cst_161 = arith.constant 1.280000e+02 : f32
    %526 = vector.broadcast %cst_161 : f32 to vector<2x1xf32>
    %527 = arith.divf %525, %526 : vector<2x1xf32>
    %528 = vector.broadcast %520 : vector<2x1xf32> to vector<2x128xf32>
    %529 = arith.subf %516, %528 : vector<2x128xf32>
    %cst_162 = arith.constant 9.99999974E-6 : f32
    %530 = vector.broadcast %cst_162 : f32 to vector<2x1xf32>
    %531 = arith.addf %527, %530 : vector<2x1xf32>
    %532 = math.rsqrt %531 : vector<2x1xf32>
    %533 = vector.broadcast %532 : vector<2x1xf32> to vector<2x128xf32>
    %534 = arith.mulf %529, %533 : vector<2x128xf32>
    %535 = vector.broadcast %8 : vector<1x128xf32> to vector<2x128xf32>
    %536 = arith.mulf %534, %535 : vector<2x128xf32>
    %537 = vector.broadcast %9 : vector<1x128xf32> to vector<2x128xf32>
    %538 = arith.addf %536, %537 : vector<2x128xf32>
    %539 = arith.truncf %462 : vector<2x32xf32> to vector<2x32xbf16>
    %cst_163 = arith.constant dense<0.000000e+00> : vector<2x128xf32>
    %540 = tpu.matmul %539, %1, %cst_163 {dimension_numbers = #tpu.dot_dimension_numbers<[1], [0], [0], [1], [0, 0, 1, 1], [], []>} : vector<2x32xbf16>, vector<32x128xbf16>, vector<2x128xf32> -> vector<2x128xf32>
    %cst_164 = arith.constant dense<0.000000e+00> : vector<2xf32>
    %541 = vector.multi_reduction <add>, %540, %cst_164 [1] : vector<2x128xf32> to vector<2xf32>
    %542 = vector.shape_cast %541 : vector<2xf32> to vector<2x1xf32>
    %cst_165 = arith.constant 1.280000e+02 : f32
    %543 = vector.broadcast %cst_165 : f32 to vector<2x1xf32>
    %544 = arith.divf %542, %543 : vector<2x1xf32>
    %545 = vector.broadcast %544 : vector<2x1xf32> to vector<2x128xf32>
    %546 = arith.subf %540, %545 : vector<2x128xf32>
    %547 = arith.mulf %546, %546 : vector<2x128xf32>
    %cst_166 = arith.constant dense<0.000000e+00> : vector<2xf32>
    %548 = vector.multi_reduction <add>, %547, %cst_166 [1] : vector<2x128xf32> to vector<2xf32>
    %549 = vector.shape_cast %548 : vector<2xf32> to vector<2x1xf32>
    %cst_167 = arith.constant 1.280000e+02 : f32
    %550 = vector.broadcast %cst_167 : f32 to vector<2x1xf32>
    %551 = arith.divf %549, %550 : vector<2x1xf32>
    %552 = vector.broadcast %544 : vector<2x1xf32> to vector<2x128xf32>
    %553 = arith.subf %540, %552 : vector<2x128xf32>
    %cst_168 = arith.constant 9.99999974E-6 : f32
    %554 = vector.broadcast %cst_168 : f32 to vector<2x1xf32>
    %555 = arith.addf %551, %554 : vector<2x1xf32>
    %556 = math.rsqrt %555 : vector<2x1xf32>
    %557 = vector.broadcast %556 : vector<2x1xf32> to vector<2x128xf32>
    %558 = arith.mulf %553, %557 : vector<2x128xf32>
    %559 = vector.broadcast %10 : vector<1x128xf32> to vector<2x128xf32>
    %560 = arith.mulf %558, %559 : vector<2x128xf32>
    %561 = vector.broadcast %11 : vector<1x128xf32> to vector<2x128xf32>
    %562 = arith.addf %560, %561 : vector<2x128xf32>
    %563 = arith.addf %538, %562 : vector<2x128xf32>
    %564 = vector.extract_strided_slice %563 {offsets = [0, 0], sizes = [2, 32], strides = [1, 1]} : vector<2x128xf32> to vector<2x32xf32>
    %565 = arith.negf %564 : vector<2x32xf32>
    %566 = math.exp %565 : vector<2x32xf32>
    %cst_169 = arith.constant 1.000000e+00 : f32
    %567 = vector.broadcast %cst_169 : f32 to vector<2x32xf32>
    %568 = arith.addf %567, %566 : vector<2x32xf32>
    %569 = arith.divf %567, %568 : vector<2x32xf32>
    %570 = vector.extract_strided_slice %563 {offsets = [0, 32], sizes = [2, 32], strides = [1, 1]} : vector<2x128xf32> to vector<2x32xf32>
    %571 = arith.negf %570 : vector<2x32xf32>
    %572 = math.exp %571 : vector<2x32xf32>
    %cst_170 = arith.constant 1.000000e+00 : f32
    %573 = vector.broadcast %cst_170 : f32 to vector<2x32xf32>
    %574 = arith.addf %573, %572 : vector<2x32xf32>
    %575 = arith.divf %573, %574 : vector<2x32xf32>
    %576 = vector.extract_strided_slice %563 {offsets = [0, 64], sizes = [2, 32], strides = [1, 1]} : vector<2x128xf32> to vector<2x32xf32>
    %577 = math.tanh %576 : vector<2x32xf32>
    %578 = vector.extract_strided_slice %563 {offsets = [0, 96], sizes = [2, 32], strides = [1, 1]} : vector<2x128xf32> to vector<2x32xf32>
    %579 = arith.negf %578 : vector<2x32xf32>
    %580 = math.exp %579 : vector<2x32xf32>
    %cst_171 = arith.constant 1.000000e+00 : f32
    %581 = vector.broadcast %cst_171 : f32 to vector<2x32xf32>
    %582 = arith.addf %581, %580 : vector<2x32xf32>
    %583 = arith.divf %581, %582 : vector<2x32xf32>
    %584 = arith.mulf %575, %460 : vector<2x32xf32>
    %585 = arith.mulf %569, %577 : vector<2x32xf32>
    %586 = arith.addf %584, %585 : vector<2x32xf32>
    %cst_172 = arith.constant dense<0.000000e+00> : vector<2xf32>
    %587 = vector.multi_reduction <add>, %586, %cst_172 [1] : vector<2x32xf32> to vector<2xf32>
    %588 = vector.shape_cast %587 : vector<2xf32> to vector<2x1xf32>
    %cst_173 = arith.constant 3.200000e+01 : f32
    %589 = vector.broadcast %cst_173 : f32 to vector<2x1xf32>
    %590 = arith.divf %588, %589 : vector<2x1xf32>
    %591 = vector.broadcast %590 : vector<2x1xf32> to vector<2x32xf32>
    %592 = arith.subf %586, %591 : vector<2x32xf32>
    %593 = arith.mulf %592, %592 : vector<2x32xf32>
    %cst_174 = arith.constant dense<0.000000e+00> : vector<2xf32>
    %594 = vector.multi_reduction <add>, %593, %cst_174 [1] : vector<2x32xf32> to vector<2xf32>
    %595 = vector.shape_cast %594 : vector<2xf32> to vector<2x1xf32>
    %cst_175 = arith.constant 3.200000e+01 : f32
    %596 = vector.broadcast %cst_175 : f32 to vector<2x1xf32>
    %597 = arith.divf %595, %596 : vector<2x1xf32>
    %598 = vector.broadcast %590 : vector<2x1xf32> to vector<2x32xf32>
    %599 = arith.subf %586, %598 : vector<2x32xf32>
    %cst_176 = arith.constant 9.99999974E-6 : f32
    %600 = vector.broadcast %cst_176 : f32 to vector<2x1xf32>
    %601 = arith.addf %597, %600 : vector<2x1xf32>
    %602 = math.rsqrt %601 : vector<2x1xf32>
    %603 = vector.broadcast %602 : vector<2x1xf32> to vector<2x32xf32>
    %604 = arith.mulf %599, %603 : vector<2x32xf32>
    %605 = vector.broadcast %17 : vector<1x32xf32> to vector<2x32xf32>
    %606 = arith.mulf %604, %605 : vector<2x32xf32>
    %607 = vector.broadcast %18 : vector<1x32xf32> to vector<2x32xf32>
    %608 = arith.addf %606, %607 : vector<2x32xf32>
    %609 = math.tanh %608 : vector<2x32xf32>
    %610 = arith.mulf %583, %609 : vector<2x32xf32>
    %611 = vector.shape_cast %610 : vector<2x32xf32> to vector<2x1x32xf32>
    %612 = vector.broadcast %611 : vector<2x1x32xf32> to vector<2x8x32xf32>
    %613 = arith.mulf %612, %50 : vector<2x8x32xf32>
    %cst_177 = arith.constant dense<0.000000e+00> : vector<2x8xf32>
    %614 = vector.multi_reduction <add>, %613, %cst_177 [2] : vector<2x8x32xf32> to vector<2x8xf32>
    %cst_178 = arith.constant -1.000000e+09 : f32
    %615 = vector.broadcast %cst_178 : f32 to vector<2x8xf32>
    %616 = arith.select %507, %614, %615 : vector<2x8xi1>, vector<2x8xf32>
    %c0_179 = arith.constant 0 : index
    %c24 = arith.constant 24 : index
    %617 = vector.load %arg12[%c0_179, %c24] : memref<2x32xf32, #tpu.memory_space<vmem>>, vector<2x8xf32>
    tpu.vector_store %arg12[%c0_179, %c24], %616 {strides = array<i32>} : memref<2x32xf32, #tpu.memory_space<vmem>>, vector<2x8xf32>,
    %618 = vector.extract_strided_slice %22 {offsets = [0, 3], sizes = [2, 1], strides = [1, 1]} : vector<2x4xi32> to vector<2x1xi32>
    %619 = arith.cmpi eq, %618, %20 : vector<2x1xi32>
    %620 = arith.ori %472, %619 : vector<2x1xi1>
    %621 = vector.broadcast %618 : vector<2x1xi32> to vector<2x8xi32>
    %622 = arith.cmpi eq, %51, %621 : vector<2x8xi32>
    %cst_180 = arith.constant dense<true> : vector<2x1xi1>
    %623 = arith.xori %620, %cst_180 : vector<2x1xi1>
    %624 = vector.broadcast %623 : vector<2x1xi1> to vector<2x8xi1>
    %625 = arith.andi %622, %624 : vector<2x8xi1>
    %626 = arith.extui %625 : vector<2x8xi1> to vector<2x8xi32>
    %627 = arith.sitofp %626 : vector<2x8xi32> to vector<2x8xf32>
    %628 = arith.maximumf %480, %627 : vector<2x8xf32>
    %629 = vector.shape_cast %628 : vector<2x8xf32> to vector<2x8x1xf32>
    %630 = vector.broadcast %629 : vector<2x8x1xf32> to vector<2x8x32xf32>
    %631 = arith.mulf %50, %630 : vector<2x8x32xf32>
    %cst_181 = arith.constant dense<0.000000e+00> : vector<2x32xf32>
    %632 = vector.multi_reduction <add>, %631, %cst_181 [1] : vector<2x8x32xf32> to vector<2x32xf32>
    %cst_182 = arith.constant dense<0.000000e+00> : vector<2xf32>
    %633 = vector.multi_reduction <add>, %628, %cst_182 [1] : vector<2x8xf32> to vector<2xf32>
    %634 = vector.shape_cast %633 : vector<2xf32> to vector<2x1xf32>
    %cst_183 = arith.constant 0.000000e+00 : f32
    %635 = vector.broadcast %cst_183 : f32 to vector<2x1xf32>
    %636 = arith.cmpf ogt, %634, %635 : vector<2x1xf32>
    %cst_184 = arith.constant 1.000000e+00 : f32
    %637 = vector.broadcast %cst_184 : f32 to vector<2x1xf32>
    %638 = arith.select %636, %634, %637 : vector<2x1xi1>, vector<2x1xf32>
    %c0_i32_185 = arith.constant 0 : i32
    %639 = vector.broadcast %c0_i32_185 : i32 to vector<2x1xi32>
    %640 = arith.cmpi ne, %21, %639 : vector<2x1xi32>
    %641 = vector.broadcast %638 : vector<2x1xf32> to vector<2x32xf32>
    %642 = arith.divf %632, %641 : vector<2x32xf32>
    %643 = vector.shape_cast %640 : vector<2x1xi1> to vector<2x1xi1>
    %644 = vector.broadcast %643 : vector<2x1xi1> to vector<2x32xi1>
    %645 = arith.select %644, %642, %632 : vector<2x32xi1>, vector<2x32xf32>
    %646 = arith.truncf %645 : vector<2x32xf32> to vector<2x32xbf16>
    %cst_186 = arith.constant dense<0.000000e+00> : vector<2x64xf32>
    %647 = tpu.matmul %646, %4, %cst_186 {dimension_numbers = #tpu.dot_dimension_numbers<[1], [0], [0], [1], [0, 0, 1, 1], [], []>} : vector<2x32xbf16>, vector<32x64xbf16>, vector<2x64xf32> -> vector<2x64xf32>
    %648 = vector.broadcast %14 : vector<1x64xf32> to vector<2x64xf32>
    %649 = arith.addf %647, %648 : vector<2x64xf32>
    %cst_187 = arith.constant 0.000000e+00 : f32
    %650 = vector.broadcast %cst_187 : f32 to vector<2x64xf32>
    %651 = arith.maximumf %649, %650 : vector<2x64xf32>
    %652 = arith.truncf %651 : vector<2x64xf32> to vector<2x64xbf16>
    %cst_188 = arith.constant dense<0.000000e+00> : vector<2x64xf32>
    %653 = tpu.matmul %652, %5, %cst_188 {dimension_numbers = #tpu.dot_dimension_numbers<[1], [0], [0], [1], [0, 0, 1, 1], [], []>} : vector<2x64xbf16>, vector<64x64xbf16>, vector<2x64xf32> -> vector<2x64xf32>
    %654 = arith.addf %23, %653 : vector<2x64xf32>
    %655 = vector.broadcast %15 : vector<1x64xf32> to vector<2x64xf32>
    %656 = arith.addf %654, %655 : vector<2x64xf32>
    %c0_189 = arith.constant 0 : index
    %c0_190 = arith.constant 0 : index
    %657 = vector.load %arg13[%c0_189, %c0_190] : memref<2x64xf32, #tpu.memory_space<vmem>>, vector<2x64xf32>
    tpu.vector_store %arg13[%c0_189, %c0_190], %656 {strides = array<i32>} : memref<2x64xf32, #tpu.memory_space<vmem>>, vector<2x64xf32>,
    return
  }
  func.func @transform_0(%arg0: i32) -> (i32, i32, i32) {
    %c0_i32 = arith.constant 0 : i32
    %c0_i32_0 = arith.constant 0 : i32
    %c0_i32_1 = arith.constant 0 : i32
    return %arg0, %c0_i32, %c0_i32_0 : i32, i32, i32
  }
  func.func @transform_1(%arg0: i32) -> (i32, i32) {
    %c0_i32 = arith.constant 0 : i32
    %c0_i32_0 = arith.constant 0 : i32
    return %arg0, %c0_i32 : i32, i32
  }
  func.func @transform_2(%arg0: i32) -> (i32, i32) {
    %c0_i32 = arith.constant 0 : i32
    %c0_i32_0 = arith.constant 0 : i32
    return %arg0, %c0_i32 : i32, i32
  }
  func.func @transform_3(%arg0: i32) -> (i32, i32) {
    %c0_i32 = arith.constant 0 : i32
    %c0_i32_0 = arith.constant 0 : i32
    return %arg0, %c0_i32 : i32, i32
  }
  func.func @transform_4(%arg0: i32) -> (i32, i32) {
    %c0_i32 = arith.constant 0 : i32
    %c0_i32_0 = arith.constant 0 : i32
    return %arg0, %c0_i32 : i32, i32
  }
  func.func @transform_5(%arg0: i32) -> (i32, i32) {
    %c0_i32 = arith.constant 0 : i32
    %c0_i32_0 = arith.constant 0 : i32
    %c0_i32_1 = arith.constant 0 : i32
    return %c0_i32, %c0_i32_0 : i32, i32
  }
  func.func @transform_6(%arg0: i32) -> (i32, i32) {
    %c0_i32 = arith.constant 0 : i32
    %c0_i32_0 = arith.constant 0 : i32
    %c0_i32_1 = arith.constant 0 : i32
    return %c0_i32, %c0_i32_0 : i32, i32
  }
  func.func @transform_7(%arg0: i32) -> (i32, i32) {
    %c0_i32 = arith.constant 0 : i32
    %c0_i32_0 = arith.constant 0 : i32
    %c0_i32_1 = arith.constant 0 : i32
    return %c0_i32, %c0_i32_0 : i32, i32
  }
  func.func @transform_8(%arg0: i32) -> (i32, i32) {
    %c0_i32 = arith.constant 0 : i32
    %c0_i32_0 = arith.constant 0 : i32
    %c0_i32_1 = arith.constant 0 : i32
    return %c0_i32, %c0_i32_0 : i32, i32
  }
  func.func @transform_9(%arg0: i32) -> (i32, i32) {
    %c0_i32 = arith.constant 0 : i32
    %c0_i32_0 = arith.constant 0 : i32
    %c0_i32_1 = arith.constant 0 : i32
    return %c0_i32, %c0_i32_0 : i32, i32
  }
  func.func @transform_10(%arg0: i32) -> (i32, i32) {
    %c0_i32 = arith.constant 0 : i32
    %c0_i32_0 = arith.constant 0 : i32
    %c0_i32_1 = arith.constant 0 : i32
    return %c0_i32, %c0_i32_0 : i32, i32
  }
  func.func @transform_11(%arg0: i32) -> (i32, i32) {
    %c0_i32 = arith.constant 0 : i32
    %c0_i32_0 = arith.constant 0 : i32
    return %arg0, %c0_i32 : i32, i32
  }
  func.func @transform_12(%arg0: i32) -> (i32, i32) {
    %c0_i32 = arith.constant 0 : i32
    %c0_i32_0 = arith.constant 0 : i32
    return %arg0, %c0_i32 : i32, i32
  }
}

</mosaic_0001>

<bundles_post_ra>
// kernel: tpu_custom_call.1
= control target key start
LH: loop header
LB: loop body
LE: loop exit
PB: predicated region body
PF: predicated region fallthrough
CT: control target
= control target key end

     0   :  { %18 = vsyncpa [#allocation4], 0  ;;  %v2636_v1 = vmov 0.0   ;;  %vm2637_vm0 = vmmov 0   ;;  %vm113_vm1 = vcmask 516096   ;;  %vm110_vm2 = vcmask 522240   ;;  %s3478_s0 = inlined_call_operand.vmem [shape: f32[2,7,64], index: 0, kind: input, shape index: {}]   ;;  %s3479_s1 = inlined_call_operand.vmem [shape: f32[2,64], index: 1, kind: input, shape index: {}]   ;;  %s3480_s2 = inlined_call_operand.vmem [shape: s32[2,1], index: 2, kind: input, shape index: {}]   ;;  %s3481_s3 = inlined_call_operand.vmem [shape: s32[2,4], index: 3, kind: input, shape index: {}]   ;;  %s3482_s4 = inlined_call_operand.vmem [shape: s32[2,1], index: 4, kind: input, shape index: {}]   ;;  %s3483_s5 = inlined_call_operand.vmem [shape: bf16[96,128], index: 5, kind: input, shape index: {}]   ;;  %s3484_s6 = inlined_call_operand.vmem [shape: bf16[224,64], index: 6, kind: input, shape index: {}]   ;;  %s3485_s7 = inlined_call_operand.vmem [shape: bf16[64,32], index: 7, kind: input, shape index: {}]   ;;  %s3486_s8 = inlined_call_operand.vmem [shape: f32[8,128], index: 8, kind: input, shape index: {}]   ;;  %s3487_s9 = inlined_call_operand.vmem [shape: f32[8,64], index: 9, kind: input, shape index: {}]   ;;  %s3488_s10 = inlined_call_operand.vmem [shape: f32[8,32], index: 10, kind: input, shape index: {}]   ;;  %s3489_s11 = inlined_call_operand.hbm [shape: f32[2,32], index: 11, kind: output, shape index: {0}]   ;;  %s3490_s12 = inlined_call_operand.hbm [shape: f32[2,64], index: 12, kind: output, shape index: {1}]  }
   0x1   :  { %v2475_v0 = vld [vmem:[%s3484_s6] sm:$0xff]   ;;  %2274 = vmatprep.subr.bf16.mxu1 %v2636_v1  ;;  %2262 = vmatprep.subr.bf16.mxu0 %v2636_v1  ;;  %v2476_v2 = vld [vmem:[%s3484_s6 + $0x8] sm:$0xff]   ;;  %v2477_v4 = vld [vmem:[%s3484_s6 + $0x10] sm:$0xff]   ;;  %114 = vst.msk [vmem:[#allocation2 + $0x7] sm:$0x1] %vm113_vm1, %v2636_v1  ;;  %vm147_vm3 = vcmask 523264  }
   0x2   :  { %2275 = vmatpush3.bf16.msra.mxu1 %v2475_v0  ;;  %2282 = vmatprep.mubr.msk.bf16.mxu1 %vm2637_vm0, %v2636_v1  ;;  %v2479_v3 = vld [vmem:[%s3485_s7] sm:$0xff]   ;;  %115 = vst.msk [vmem:[#allocation2 + $0xf] sm:$0x1] %vm113_vm1, %v2636_v1  ;;  %v2480_v5 = vld [vmem:[%s3485_s7 + $0x8] sm:$0xff]   ;;  %v2478_v8 = vld [vmem:[%s3484_s6 + $0x18] sm:$0xff]  }
   0x3   :  { %2276 = vmatprep.subr.bf16.mxu1 %v2636_v1  ;;  %2270 = vmatprep.mubr.msk.bf16.mxu0 %vm2637_vm0, %v2636_v1  ;;  %v108_v6 = vld [vmem:[%s3478_s0] sm:$0x7f]  ;;  %v109_v7 = vld [vmem:[%s3478_s0 + $0x8] sm:$0x7f]  ;;  %v2481_v10 = vld [vmem:[%s3485_s7 + $0x10] sm:$0xff]  }
   0x4   :  { %2263 = vmatpush3.bf16.msra.mxu0 %v2479_v3  ;;  %111 = vst.msk [vmem:[#allocation2] sm:$0x7f] %vm110_vm2, %v108_v6  ;;  %112 = vst.msk [vmem:[#allocation2 + $0x8] sm:$0x7f] %vm110_vm2, %v109_v7  ;;  %v107_v9 = vld [vmem:[%s3479_s1] sm:$0x3] }
   0x5   :  { %2264 = vmatprep.subr.bf16.mxu0 %v2636_v1  ;;  %v253_v11 = vpack.c.bf16 %v107_v9, %v107_v9  ;;  %v2482_v12 = vld [vmem:[%s3485_s7 + $0x18] sm:$0xff]   ;;  %v2775_v15 = vld [vmem:[%s3483_s5] sm:$0xff]  }
   0x6   :  { %2277 = vmatpush3.bf16.msra.mxu1 %v2476_v2 }
   0x7   :  { %2278 = vmatprep.subr.bf16.mxu1 %v2636_v1 }
   0x8   :  { %2265 = vmatpush3.bf16.msra.mxu0 %v2480_v5 }
   0x9   :  { %2266 = vmatprep.subr.bf16.mxu0 %v2636_v1 }
   0xa   :  { %2279 = vmatpush3.bf16.msra.mxu1 %v2477_v4 }
   0xb   :  { %2280 = vmatprep.subr.bf16.mxu1 %v2636_v1  ;;  %v116_v13 = vld [vmem:[#allocation2] sm:$0xff]  ;;  %v117_v14 = vld [vmem:[#allocation2 + $0x8] sm:$0xff] }
   0xc   :  { %2267 = vmatpush3.bf16.msra.mxu0 %v2481_v10  ;;  %v118_v16 = vpack.c.bf16 %v117_v14, %v116_v13 }
   0xd   :  { %2268 = vmatprep.subr.bf16.mxu0 %v2636_v1 }
   0xe   :  { %2281 = vmatpush3.bf16.msra.mxu1 %v2478_v8 }
   0xf   :  { %2298 = vmatprep.subr.bf16.mxu1 %v2636_v1 }
  0x10   :  { %2269 = vmatpush3.bf16.msra.mxu0 %v2482_v12 }
  0x11   :  { %2283 = vmatmul.mubr.msk.bf16.vlgmr.msra.gmra.mrb[0].mxu1 %vm147_vm3, %v253_v11  ;;  %2286 = vmatprep.subr.bf16.mxu0 %v2636_v1 }
  0x12   :  { %2302 = vmatprep.mubr.msk.bf16.mxu1 %vm2637_vm0, %v2636_v1 }
  0x13   :  { %19 = vsyncpa [#allocation6], 0  ;;  %2271 = vmatmul.mubr.msk.bf16.vlgmr.msra.gmra.mrb[0].mxu0 %vm147_vm3, %v118_v16  ;;  %v2785_v17 = vld [vmem:[%s3483_s5 + $0x8] sm:$0xff]   ;;  %v2795_v18 = vld [vmem:[%s3483_s5 + $0x10] sm:$0xff]   ;;  %v2638_v22 = vmov 0   ;;  %vm403_vm4 = vcmask 1041408   ;;  %v192_v45 = vlaneseq }
  0x14   :  { %2287 = vmatpush3.bf16.msra.mxu0 %v2775_v15  ;;  %2294 = vmatprep.mubr.msk.bf16.mxu0 %vm2637_vm0, %v2636_v1  ;;  %v2802_v19 = vld [vmem:[%s3483_s5 + $0x20] sm:$0xff]   ;;  %v2807_v20 = vld [vmem:[%s3483_s5 + $0x18] sm:$0xff]   ;;  %v2815_v21 = vld [vmem:[%s3483_s5 + $0x28] sm:$0xff]   ;;  %v2639_v40 = vmov 1966171168   ;;  %vm2640_vm8 = vmmov 1  }
  0x15   :  { %2288 = vmatprep.subr.bf16.mxu0 %v2636_v1  ;;  %2299 = vmatpush3.bf16.msra.mxu1 %v2802_v19  ;;  %v2133_v23 = vld [vmem:[%s3487_s9] ss:$0 sm:$0xff]  ;;  %v200_v41 = vunpack.c.l.s4 %v2639_v40  ;;  %v2846_v51 = vshrl.u32 %v192_v45, 7  ;;  %v2884_v14 = vand.u32 127, %v192_v45  ;;  %v2919_v45 = vld [vmem:[%s3486_s8 + $0x2] ss:$0 sm:$0xff] }
  0x16   :  { %2300 = vmatprep.subr.bf16.mxu1 %v2636_v1  ;;  %2468 = vset.pattern.permute.xlu0 %v2638_v22  ;;  %v2841_v39 = vld [vmem:[%s3486_s8] ss:$0 sm:$0xff]  ;;  %s2641_s13 = smov 64   ;;  %vm644_vm13 = vcmask 58368   ;;  %s2643_s26 = smov 96  }
  0x17   :  { %2469 = vset.pattern.permute.xlu1 %v2638_v22  ;;  %v201_v49 = vunpack.c.0.s8 %v200_v41  ;;  %v2854_v53 = vld [vmem:[%s3480_s2] sm:$0x3]  ;;  %v2859_v56 = vsub.s32 0, %v2846_v51  ;;  %vm194_vm15 = vcmp.eq.s32.totalorder %v2846_v51, 7  ;;  %s2645_s22 = smov 127   ;;  %s2647_s0 = smov 2  }
  0x18   :  { %2289 = vmatpush3.bf16.msra.mxu0 %v2785_v17  ;;  %v2867_v60 = vld [vmem:[%s3481_s3] sm:$0x3]  ;;  %s2648_s23 = smov 126   ;;  %s2650_s24 = smov 3  }
  0x19   :  { %2290 = vmatprep.subr.bf16.mxu0 %v2636_v1  ;;  %2301 = vmatpush3.bf16.msra.mxu1 %v2815_v21  ;;  %v2849_v52 = vsub.s32 %v201_v49, %v2846_v51  ;;  %vm646_vm7 = vcmp.eq.s32.totalorder %v2867_v60, %v2854_v53  ;;  %v2908_v41 = vld [vmem:[%s3486_s8 + $0x1] ss:$0 sm:$0xff] }
  0x1a   :  { %2306 = vmatprep.subr.bf16.mxu1 %v2636_v1  ;;  %vm651_vm9 = vmxor %vm646_vm7, %vm2640_vm8 }
  0x1b   :  { %v205_v54 = vrot.slane %v2854_v53, %v2849_v52  ;;  %v652_v11 = vsel %vm651_vm9, 1, %v2638_v22  ;;  %vm640_vm9 = vcmask 1041409  }
  0x1c   :  { %2291 = vmatpush3.bf16.msra.mxu0 %v2795_v18  ;;  %2303 = vmatmul.mubr.bf16.vlgmr.msra.gmra.mrb[4].mxu1 %v2638_v22 }
  0x1d   :  { %2292 = vmatprep.subr.bf16.mxu0 %v2636_v1  ;;  %2310 = vmatprep.mubr.msk.bf16.mxu1 %vm2637_vm0, %v2636_v1  ;;  %v206_v55 = vcombine.high %v205_v54, %v205_v54  ;;  %v213_v59 = vrot.slane %v205_v54, %v2849_v52 }
  0x1f   :  { %v220_v57 = vrot.slane %v206_v55, %v2849_v52  ;;  %v224_v61 = vrot.slane %v213_v59, %v2859_v56  ;;  %v105_v55 = vld [vmem:[%s3482_s4] sm:$0x3]  ;;  %v2941_v59 = vld [vmem:[%s3484_s6 + $0x48] sm:$0xff]   ;;  %s2642_s4 = smov 32  }
  0x20   :  { %2293 = vmatpush3.bf16.msra.mxu0 %v2807_v20  ;;  %vm696_vm14 = vcmp.ne.s32.totalorder %v105_v55, 0 }
  0x21   :  { %2314 = vmatprep.subr.bf16.mxu0 %v2636_v1  ;;  %v228_v58 = vrot.slane %v220_v57, %v2859_v56  ;;  %vm229_vm6 = vcmp.eq.s32.totalorder %v2846_v51, %v224_v61  ;;  %v705_v57 = vsel %vm696_vm14, 1, %v2638_v22 }
  0x22   :  { %v231_v63 = vsel %vm229_vm6, 1, %v2638_v22 }
  0x23   :  { %vm230_vm5 = vcmp.eq.s32.totalorder %v2846_v51, %v228_v58  ;;  %v2934_v58 = vld [vmem:[%s3484_s6 + $0x40] sm:$0xff]  }
  0x24   :  { %v232_v62 = vsel %vm230_vm5, 1, %v2638_v22  ;;  %2307 = vmatpush3.bf16.msra.mxu1 %v2934_v58  ;;  %vm440_vm5 = vcmask 261120  }
  0x25   :  { %2308 = vmatprep.subr.bf16.mxu1 %v2636_v1 }
  0x28   :  { %2309 = vmatpush3.bf16.msra.mxu1 %v2941_v59 }
  0x29   :  { %2326 = vmatprep.subr.bf16.mxu1 %v2636_v1 }
  0xe4   :  { %v319_v24 = vpop.f32.mrb[0].mxu1 }
  0xe5   :  { %v2828_v25 = vadd.f32 %v2133_v23, %v319_v24  ;;  %v2284_v26 = vpop.f32.mrb[1].mxu1 }
  0xe6   :  { %v322_v27 = vpop.f32.mrb[2].mxu1  ;;  %v2831_v31 = vpop.f32.mrb[0].mxu0 }
  0xe7   :  { %v330_v28 = vmax.f32 %v2828_v25, 0.0  ;;  %v2285_v29 = vpop.f32.mrb[3].mxu1  ;;  %v2272_v32 = vpop.f32.mrb[1].mxu0 }
  0xe8   :  { %v2834_v33 = vpop.f32.mrb[2].mxu0  ;;  %v2891_v29 = vsub.s32 1, %v2846_v51 }
  0xe9   :  { %v331_v30 = vpack.c.bf16 %v330_v28, %v330_v28  ;;  %v2273_v34 = vpop.f32.mrb[3].mxu0 }
  0xeb   :  { %2295 = vmatmul.mubr.msk.bf16.vlgmr.msra.gmra.mrb[4].mxu0 %vm147_vm3, %v331_v30 }
  0xec   :  { %2322 = vmatprep.mubr.msk.bf16.mxu0 %vm2637_vm0, %v2636_v1 }
  0xef   :  { %v478_v35 = vpop.f32.mrb[4].mxu1 }
  0xf0   :  { %v2304_v36 = vpop.f32.mrb[5].mxu1  ;;  %v484_v50 = vsel %vm403_vm4, %v478_v35, 0.0 }
  0xf1   :  { %v481_v37 = vpop.f32.mrb[6].mxu1 }
  0xf2   :  { %v2305_v38 = vpop.f32.mrb[7].mxu1 }
  0xf3   :  { %v2903_v38 = vld [vmem:[%s3486_s8 + $0x3] ss:$0 sm:$0xff] }
 0x1be   :  { %v397_v42 = vpop.f32.mrb[4].mxu0 }
 0x1bf   :  { %v398_v43 = vadd.f32 %v2841_v39, %v397_v42  ;;  %v2296_v44 = vpop.f32.mrb[5].mxu0 }
 0x1c0   :  { %v400_v46 = vpop.f32.mrb[6].mxu0  ;;  %v2914_v44 = vld [vmem:[%s3486_s8 + $0x4] ss:$0 sm:$0xff] }
 0x1c1   :  { %v2297_v47 = vpop.f32.mrb[7].mxu0  ;;  %v404_v48 = vsel %vm403_vm4, %v398_v43, 0.0 }
 0x1c2   :  { %405 = vadd.xlane.f32.xlu0 %v404_v48 }
 0x1c6   :  { %485 = vadd.xlane.f32.xlu0 %v484_v50 }
 0x1dc   :  { %648 = vperm.xlu0 %2468, %v2867_v60  }
 0x1e0   :  { %237 = vperm.xlu0 %2468, %v232_v62  }
 0x1e4   :  { %234 = vperm.xlu0 %2468, %v231_v63  }
 0x24f   :  { %v406_v0 = vpop.xlane.xlu0 %405 }
 0x250   :  { %v408_v2 = vmul.f32 0.0078125, %v406_v0 }
 0x252   :  { %v409_v5 = vsub.f32 %v398_v43, %v408_v2 }
 0x253   :  { %v486_v3 = vpop.xlane.xlu0 %485 }
 0x254   :  { %v487_v4 = vmul.f32 0.0078125, %v486_v3  ;;  %v410_v9 = vmul.f32 %v409_v5, %v409_v5 }
 0x256   :  { %v488_v6 = vsub.f32 %v478_v35, %v487_v4  ;;  %v411_v10 = vsel %vm403_vm4, %v410_v9, 0.0 }
 0x258   :  { %v489_v7 = vmul.f32 %v488_v6, %v488_v6 }
 0x25a   :  { %v490_v8 = vsel %vm403_vm4, %v489_v7, 0.0 }
 0x25b   :  { %491 = vadd.xlane.f32.xlu1 %v490_v8  ;;  %v2886_v26 = vpop.permute.xlu0 %648 }
 0x25c   :  { %vm650_vm10 = vcmp.eq.s32.totalorder %v2884_v14, %v2886_v26 }
 0x25f   :  { %412 = vadd.xlane.f32.xlu1 %v411_v10  ;;  %v238_v4 = vpop.permute.xlu0 %237  ;;  %v2132_v10 = vld [vmem:[%s3488_s10 + $0x3] ss:$0 sm:$0xff] }
 0x260   :  { %vm240_vm1 = vcmp.eq.s32.totalorder %v238_v4, 1 }
 0x270   :  { %654 = vperm.xlu1 %2469, %v652_v11  }
 0x2e8   :  { %v492_v12 = vpop.xlane.xlu1 %491 }
 0x2e9   :  { %v493_v13 = vmul.f32 0.0078125, %v492_v12 }
 0x2eb   :  { %v494_v16 = vadd.f32 1e-05, %v493_v13 }
 0x2ec   :  { %v413_v23 = vpop.xlane.xlu1 %412 }
 0x2ed   :  { %2499 = vrsqrt.f32 %v494_v16  ;;  %v414_v24 = vmul.f32 0.0078125, %v413_v23 }
 0x2ef   :  { %v415_v27 = vadd.f32 1e-05, %v414_v24 }
 0x2f0   :  { %v655_v28 = vpop.permute.xlu1 %654 }
 0x2f1   :  { %2501 = vrsqrt.f32 %v415_v27  ;;  %vm656_vm11 = vcmp.eq.s32.totalorder %v655_v28, 1 }
 0x2f2   :  { %vm657_vm12 = vmand %vm650_vm10, %vm656_vm11  ;;  %vm530_vm11 = vcmask 254976  }
 0x2f3   :  { %v2155_v30 = vsel %vm657_vm12, 1.0, %v2636_v1 }
 0x2f4   :  { %v2894_v32 = vmax.f32 %v2155_v30, 0.0 }
 0x2f6   :  { %v671_v34 = vrot.slane %v2894_v32, %v2891_v29  ;;  %v664_v37 = vrot.slane %v2894_v32, %v2859_v56  ;;  %v691_v54 = vsel %vm644_vm13, %v2894_v32, 0.0 }
 0x2f7   :  { %v2500_v35 = vpop.eup %2499 }
 0x2f8   :  { %v496_v36 = vmul.f32 %v2500_v35, %v488_v6  ;;  %673 = vbcast.lane.b32.xlu0 %v671_v34, 256  ;;  %v2126_v6 = vld [vmem:[%s3488_s10] ss:$0 sm:$0xff] }
 0x2f9   :  { %v189_v8 = vadd.f32 %v2126_v6, %v2834_v33  ;;  %v186_v9 = vadd.f32 %v2126_v6, %v2831_v31 }
 0x2fa   :  { %v501_v42 = vmul.f32 %v2903_v38, %v496_v36 }
 0x2fb   :  { %v2502_v40 = vpop.eup %2501  ;;  %v198_v11 = vsel %vm194_vm15, 0.0, %v189_v8  ;;  %v197_v16 = vsel %vm194_vm15, 0.0, %v186_v9  ;;  %v2993_v8 = vld [vmem:[%s3484_s6 + $0x28] sm:$0xff]  }
 0x2fc   :  { %v417_v43 = vmul.f32 %v2502_v40, %v409_v5  ;;  %666 = vbcast.lane.b32.xlu0 %v664_v37, 256  ;;  %v506_v47 = vadd.f32 %v2914_v44, %v501_v42  ;;  %v235_v5 = vpop.permute.xlu0 %234  ;;  %v2958_v12 = vsel %vm240_vm1, %v2132_v10, %v198_v11 }
 0x2fd   :  { %vm239_vm2 = vcmp.eq.s32.totalorder %v235_v5, 1 }
 0x2fe   :  { %v422_v46 = vmul.f32 %v2908_v41, %v417_v43  ;;  %v2961_v24 = vsel %vm239_vm2, %v2132_v10, %v197_v16  ;;  %v3010_v16 = vld [vmem:[%s3484_s6 + $0x38] sm:$0xff]  }
 0x300   :  { %v427_v48 = vadd.f32 %v2919_v45, %v422_v46 }
 0x302   :  { %v507_v49 = vadd.f32 %v506_v47, %v427_v48 }
 0x304   :  { %2503 = vtanh.f32 %v507_v49  ;;  %v2152_v61 = vmul.f32 -1.442695, %v507_v49 }
 0x306   :  { %2505 = vpow2.f32 %v2152_v61 }
 0x30e   :  { %v2504_v50 = vpop.eup %2503 }
 0x30f   :  { %517 = vrot.lane.b32.xlu1 %v2504_v50, %s2641_s13 }
 0x310   :  { %v2506_v62 = vpop.eup %2505 }
 0x311   :  { %v511_v63 = vadd.f32 1.0, %v2506_v62 }
 0x313   :  { %2507 = vrcp.f32 %v511_v63 }
 0x31d   :  { %v2945_v0 = vpop.eup %2507 }
 0x31e   :  { %v515_v9 = vmul.f32 0.0, %v2945_v0 }
 0x333   :  { %692 = vadd.xlane.f32.xlu1 %v691_v54 }
 0x344   :  { %707 = vperm.xlu1 %2469, %v705_v57  }
 0x36a   :  { %v674_v7 = vpop.permute.xlu0 %673 }
 0x36b   :  { %v676_v23 = vmul.f32 %v674_v7, %v2958_v12  ;;  %v2987_v7 = vld [vmem:[%s3484_s6 + $0x20] sm:$0xff]  }
 0x36c   :  { %2315 = vmatpush3.bf16.msra.mxu0 %v2987_v7 }
 0x36d   :  { %v684_v31 = vsel %vm440_vm5, %v676_v23, 0.0  ;;  %2316 = vmatprep.subr.bf16.mxu0 %v2636_v1 }
 0x36e   :  { %v667_v13 = vpop.permute.xlu0 %666  ;;  %v685_v28 = vrot.slane %v684_v31, 4 }
 0x36f   :  { %v675_v33 = vmul.f32 %v667_v13, %v2961_v24  ;;  %v3003_v13 = vld [vmem:[%s3484_s6 + $0x30] sm:$0xff]  }
 0x370   :  { %v686_v34 = vadd.f32 %v685_v28, %v684_v31  ;;  %2317 = vmatpush3.bf16.msra.mxu0 %v2993_v8  ;;  %v3018_v31 = vld [vmem:[%s3487_s9 + $0x2] ss:$0 sm:$0xff] }
 0x371   :  { %v677_v27 = vsel %vm440_vm5, %v675_v33, 0.0  ;;  %2318 = vmatprep.subr.bf16.mxu0 %v2636_v1 }
 0x372   :  { %v678_v30 = vrot.slane %v677_v27, 4  ;;  %v687_v37 = vrot.slane %v686_v34, 2 }
 0x374   :  { %v679_v35 = vadd.f32 %v678_v30, %v677_v27  ;;  %v688_v46 = vadd.f32 %v687_v37, %v686_v34  ;;  %2319 = vmatpush3.bf16.msra.mxu0 %v3003_v13 }
 0x375   :  { %2320 = vmatprep.subr.bf16.mxu0 %v2636_v1 }
 0x376   :  { %v680_v43 = vrot.slane %v679_v35, 2  ;;  %v689_v48 = vrot.slane %v688_v46, 1 }
 0x378   :  { %v681_v47 = vadd.f32 %v680_v43, %v679_v35  ;;  %v690_v54 = vadd.f32 %v689_v48, %v688_v46  ;;  %2321 = vmatpush3.bf16.msra.mxu0 %v3010_v16 }
 0x379   :  { %2354 = vmatprep.subr.bf16.mxu0 %v2636_v1 }
 0x37a   :  { %v682_v49 = vrot.slane %v681_v47, 1 }
 0x37c   :  { %v683_v57 = vadd.f32 %v682_v49, %v681_v47  ;;  %v2153_v47 = vld [vmem:[%s3488_s10 + $0x1] ss:$0 sm:$0xff] }
 0x37e   :  { %v717_v4 = vsel %vm640_vm9, %v690_v54, %v683_v57 }
 0x381   :  { %v518_v2 = vpop.permute.xlu1 %517 }
 0x382   :  { %v520_v3 = vmul.f32 %v2945_v0, %v518_v2 }
 0x384   :  { %522 = vrot.lane.b32.xlu0 %v520_v3, %s2642_s4 }
 0x3c0   :  { %v693_v36 = vpop.xlane.xlu1 %692 }
 0x3c1   :  { %vm694_vm6 = vcmp.gt.f32.partialorder %v693_v36, 0.0 }
 0x3c2   :  { %v695_v40 = vsel %vm694_vm6, %v693_v36, 1.0 }
 0x3c3   :  { %v698_v42 = vrot.slane %v695_v40, 1  ;;  %2509 = vrcp.f32 %v695_v40 }
 0x3c4   :  { %v2966_v62 = vpop.permute.xlu1 %707 }
 0x3c5   :  { %2511 = vrcp.f32 %v698_v42  ;;  %vm709_vm10 = vcmp.eq.s32.totalorder %v2966_v62, 1  ;;  %v2497_v62 = vld [vmem:[%s3484_s6 + $0x60] sm:$0xff]  }
 0x3cd   :  { %v2510_v50 = vpop.eup %2509 }
 0x3ce   :  { %v702_v63 = vmul.f32 %v2510_v50, %v683_v57  ;;  %v2139_v50 = vld [vmem:[%s3487_s9 + $0x1] ss:$0 sm:$0xff] }
 0x3cf   :  { %v2512_v55 = vpop.eup %2511 }
 0x3d0   :  { %v704_v61 = vmul.f32 %v2512_v55, %v690_v54  ;;  %v2154_v54 = vld [vmem:[%s3488_s10 + $0x2] ss:$0 sm:$0xff]  ;;  %v3045_v55 = vadd.f32 %v2139_v50, %v2828_v25  ;;  %s2644_s10 = smov 1  }
 0x3d2   :  { %v712_v2 = vrot.slane %v704_v61, 7 }
 0x3d4   :  { %v713_v3 = vsel %vm640_vm9, %v712_v2, %v702_v63 }
 0x3d5   :  { %v719_v5 = vsel %vm709_vm10, %v713_v3, %v717_v4 }
 0x3d6   :  { %v720_v6 = vpack.c.bf16 %v719_v5, %v719_v5 }
 0x3d8   :  { %2311 = vmatmul.mubr.msk.bf16.vlgmr.msra.gmra.mrb[8].mxu1 %vm440_vm5, %v720_v6 }
 0x3d9   :  { %2327 = vmatpush3.bf16.msra.mxu1 %v2775_v15  ;;  %2334 = vmatprep.mubr.msk.bf16.mxu1 %vm2637_vm0, %v2636_v1 }
 0x3da   :  { %2328 = vmatprep.subr.bf16.mxu1 %v2636_v1 }
 0x3dd   :  { %2329 = vmatpush3.bf16.msra.mxu1 %v2785_v17 }
 0x3de   :  { %2330 = vmatprep.subr.bf16.mxu1 %v2636_v1 }
 0x3e1   :  { %2331 = vmatpush3.bf16.msra.mxu1 %v2795_v18 }
 0x3e2   :  { %2332 = vmatprep.subr.bf16.mxu1 %v2636_v1 }
 0x3e5   :  { %2333 = vmatpush3.bf16.msra.mxu1 %v2807_v20 }
 0x3e6   :  { %2338 = vmatprep.subr.bf16.mxu1 %v2636_v1 }
 0x3f6   :  { %v523_v10 = vpop.permute.xlu0 %522 }
 0x3f7   :  { %v525_v11 = vadd.f32 %v523_v10, %v515_v9 }
 0x3f9   :  { %527 = vrot.lane.b32.xlu0 %v525_v11, %s2643_s26 }
 0x46b   :  { %v528_v23 = vpop.permute.xlu0 %527 }
 0x46c   :  { %v531_v33 = vsel %vm530_vm11, %v528_v23, 0.0 }
 0x46d   :  { %532 = vadd.xlane.f32.xlu0 %v531_v33 }
 0x483   :  { %554 = vrot.lane.b32.xlu0 %v2153_v47, %s2642_s4 }
 0x4ab   :  { %v774_v27 = vpop.f32.mrb[8].mxu1 }
 0x4ac   :  { %v775_v28 = vadd.f32 %v3018_v31, %v774_v27  ;;  %v2312_v30 = vpop.f32.mrb[9].mxu1 }
 0x4ad   :  { %v777_v34 = vpop.f32.mrb[10].mxu1 }
 0x4ae   :  { %v780_v35 = vmax.f32 %v775_v28, 0.0  ;;  %v2313_v36 = vpop.f32.mrb[11].mxu1 }
 0x4b0   :  { %v785_v37 = vpack.c.bf16 %v780_v35, %v780_v35 }
 0x4b2   :  { %2323 = vmatmul.mubr.msk.bf16.vlgmr.msra.gmra.mrb[8].mxu0 %vm147_vm3, %v785_v37 }
 0x4b3   :  { %2355 = vmatpush3.bf16.msra.mxu0 %v2987_v7  ;;  %2362 = vmatprep.mubr.msk.bf16.mxu0 %vm2637_vm0, %v2636_v1 }
 0x4b4   :  { %2356 = vmatprep.subr.bf16.mxu0 %v2636_v1 }
 0x4b7   :  { %2357 = vmatpush3.bf16.msra.mxu0 %v2993_v8 }
 0x4b8   :  { %2358 = vmatprep.subr.bf16.mxu0 %v2636_v1 }
 0x4bb   :  { %2359 = vmatpush3.bf16.msra.mxu0 %v3003_v13 }
 0x4bc   :  { %2360 = vmatprep.subr.bf16.mxu0 %v2636_v1 }
 0x4bf   :  { %2361 = vmatpush3.bf16.msra.mxu0 %v3010_v16 }
 0x4c0   :  { %2378 = vmatprep.subr.bf16.mxu0 %v2636_v1 }
 0x4fa   :  { %v533_v40 = vpop.xlane.xlu0 %532 }
 0x4fb   :  { %v535_v42 = vmul.f32 0.03125, %v533_v40 }
 0x4fd   :  { %v536_v43 = vsub.f32 %v525_v11, %v535_v42 }
 0x4fe   :  { %v3056_v11 = vpop.permute.xlu0 %554 }
 0x4ff   :  { %v537_v46 = vmul.f32 %v536_v43, %v536_v43 }
 0x501   :  { %539 = vrot.lane.b32.xlu1 %v537_v46, %s2643_s26 }
 0x573   :  { %v540_v48 = vpop.permute.xlu1 %539 }
 0x574   :  { %v542_v49 = vsel %vm530_vm11, %v540_v48, 0.0 }
 0x575   :  { %543 = vadd.xlane.f32.xlu1 %v542_v49 }
 0x585   :  { %v847_v57 = vpop.f32.mrb[8].mxu0 }
 0x586   :  { %v853_v61 = vadd.f32 %v847_v57, %v3045_v55  ;;  %v2324_v63 = vpop.f32.mrb[9].mxu0  ;;  %563 = vrot.lane.b32.xlu1 %v2154_v54, %s2642_s4 }
 0x587   :  { %v850_v2 = vpop.f32.mrb[10].mxu0 }
 0x588   :  { %v854_v3 = vmax.f32 %v853_v61, 0.0  ;;  %v2325_v4 = vpop.f32.mrb[11].mxu0 }
 0x58a   :  { %v855_v5 = vpack.c.bf16 %v854_v3, %v854_v3 }
 0x58c   :  { %2335 = vmatmul.mubr.msk.bf16.vlgmr.msra.gmra.mrb[12].mxu1 %vm147_vm3, %v855_v5 }
 0x58d   :  { %2339 = vmatpush3.bf16.msra.mxu1 %v2802_v19  ;;  %2342 = vmatprep.mubr.msk.bf16.mxu1 %vm2637_vm0, %v2636_v1 }
 0x58e   :  { %2340 = vmatprep.subr.bf16.mxu1 %v2636_v1 }
 0x591   :  { %2341 = vmatpush3.bf16.msra.mxu1 %v2815_v21 }
 0x592   :  { %2346 = vmatprep.subr.bf16.mxu1 %v2636_v1 }
 0x602   :  { %v544_v25 = vpop.xlane.xlu1 %543 }
 0x603   :  { %v545_v6 = vmul.f32 0.03125, %v544_v25 }
 0x605   :  { %v546_v9 = vadd.f32 1e-05, %v545_v6  ;;  %v2646_v6 = vmov 1  }
 0x606   :  { %v3058_v33 = vpop.permute.xlu1 %563  ;;  %2470 = vset.pattern.permute.xlu1 %v2646_v6 }
 0x607   :  { %2513 = vrsqrt.f32 %v546_v9 }
 0x611   :  { %v2514_v10 = vpop.eup %2513 }
 0x612   :  { %v548_v23 = vmul.f32 %v2514_v10, %v536_v43 }
 0x614   :  { %v557_v27 = vmul.f32 %v3056_v11, %v548_v23 }
 0x616   :  { %v3062_v28 = vadd.f32 %v3058_v33, %v557_v27 }
 0x618   :  { %2515 = vtanh.f32 %v3062_v28 }
 0x622   :  { %v2516_v30 = vpop.eup %2515 }
 0x623   :  { %569 = vrot.lane.b32.xlu0 %v2516_v30, %s2641_s13 }
 0x65f   :  { %v893_v34 = vpop.f32.mrb[12].mxu1 }
 0x660   :  { %v894_v35 = vadd.f32 %v2841_v39, %v893_v34  ;;  %v2336_v36 = vpop.f32.mrb[13].mxu1 }
 0x661   :  { %v896_v37 = vpop.f32.mrb[14].mxu1 }
 0x662   :  { %v2337_v40 = vpop.f32.mrb[15].mxu1  ;;  %v899_v42 = vsel %vm403_vm4, %v894_v35, 0.0 }
 0x663   :  { %900 = vadd.xlane.f32.xlu1 %v899_v42 }
 0x695   :  { %v570_v43 = vpop.permute.xlu0 %569 }
 0x696   :  { %v3069_v46 = vmul.f32 %v2945_v0, %v570_v43 }
 0x698   :  { %v914_v47 = vpack.c.bf16 %v3069_v46, %v3069_v46 }
 0x69a   :  { %916 = vrot.lane.b32.xlu0 %v914_v47, %s2642_s4 }
 0x69e   :  { %1092 = vrot.lane.b32.xlu0 %v2854_v53, %s2644_s10 }
 0x6f0   :  { %v901_v48 = vpop.xlane.xlu1 %900 }
 0x6f1   :  { %v902_v49 = vmul.f32 0.0078125, %v901_v48 }
 0x6f3   :  { %v903_v50 = vsub.f32 %v894_v35, %v902_v49 }
 0x6f5   :  { %v904_v54 = vmul.f32 %v903_v50, %v903_v50 }
 0x6f7   :  { %v905_v57 = vsel %vm403_vm4, %v904_v54, 0.0 }
 0x6f8   :  { %906 = vadd.xlane.f32.xlu1 %v905_v57 }
 0x70c   :  { %v917_v61 = vpop.permute.xlu0 %916 }
 0x70d   :  { %2343 = vmatmul.mubr.msk.bf16.vlgmr.msra.gmra.mrb[16].mxu1 %vm440_vm5, %v917_v61 }
 0x70e   :  { %2347 = vmatpush3.bf16.msra.mxu1 %v2934_v58  ;;  %2350 = vmatprep.mubr.msk.bf16.mxu1 %vm2637_vm0, %v2636_v1 }
 0x70f   :  { %2348 = vmatprep.subr.bf16.mxu1 %v2636_v1 }
 0x710   :  { %v1093_v5 = vpop.permute.xlu0 %1092 }
 0x711   :  { %vm1094_vm12 = vcmp.eq.s32.totalorder %v2867_v60, %v1093_v5 }
 0x712   :  { %2349 = vmatpush3.bf16.msra.mxu1 %v2941_v59  ;;  %v1095_v25 = vsel %vm1094_vm12, 1, %v2638_v22 }
 0x713   :  { %2366 = vmatprep.subr.bf16.mxu1 %v2636_v1 }
 0x785   :  { %v907_v37 = vpop.xlane.xlu1 %906 }
 0x786   :  { %v908_v40 = vmul.f32 0.0078125, %v907_v37 }
 0x788   :  { %v909_v42 = vadd.f32 1e-05, %v908_v40 }
 0x78a   :  { %2517 = vrsqrt.f32 %v909_v42 }
 0x7e0   :  { %v955_v0 = vpop.f32.mrb[16].mxu1 }
 0x7e1   :  { %v2344_v63 = vpop.f32.mrb[17].mxu1  ;;  %v961_v2 = vsel %vm403_vm4, %v955_v0, 0.0 }
 0x7e2   :  { %962 = vadd.xlane.f32.xlu0 %v961_v2  ;;  %v958_v3 = vpop.f32.mrb[18].mxu1 }
 0x7e3   :  { %v2345_v4 = vpop.f32.mrb[19].mxu1 }
 0x7f8   :  { %1096 = vrot.lane.b32.xlu0 %v1095_v25, %s2645_s22 }
 0x86f   :  { %v963_v9 = vpop.xlane.xlu0 %962 }
 0x870   :  { %v964_v10 = vmul.f32 0.0078125, %v963_v9 }
 0x872   :  { %v965_v23 = vsub.f32 %v955_v0, %v964_v10  ;;  %v2518_v0 = vpop.eup %2517 }
 0x873   :  { %v1097_v27 = vpop.permute.xlu0 %1096  ;;  %v911_v2 = vmul.f32 %v2518_v0, %v903_v50 }
 0x874   :  { %vm1098_vm14 = vcmp.ne.s32.totalorder %v1097_v27, 0  ;;  %v966_v30 = vmul.f32 %v965_v23, %v965_v23 }
 0x875   :  { %vm3089_vm15 = vmor %vm646_vm7, %vm1098_vm14  ;;  %v912_v4 = vmul.f32 %v2908_v41, %v911_v2 }
 0x876   :  { %vm1104_vm1 = vmxor %vm3089_vm15, %vm2640_vm8  ;;  %v967_v35 = vsel %vm403_vm4, %v966_v30, 0.0 }
 0x877   :  { %968 = vadd.xlane.f32.xlu1 %v967_v35  ;;  %v1105_v36 = vsel %vm1104_vm1, 1, %v2638_v22  ;;  %v913_v6 = vadd.f32 %v2919_v45, %v912_v4 }
 0x878   :  { %1107 = vperm.xlu0 %2468, %v1105_v36  }
 0x888   :  { %1101 = vperm.xlu1 %2470, %v2867_v60  }
 0x88c   :  { %2472 = vset.pattern.permute.xlu1 %v2638_v22 }
 0x8f7   :  { %v1108_v48 = vpop.permute.xlu0 %1107 }
 0x8f8   :  { %vm1109_vm7 = vcmp.eq.s32.totalorder %v1108_v48, 1 }
 0x904   :  { %v969_v43 = vpop.xlane.xlu1 %968 }
 0x905   :  { %v970_v47 = vmul.f32 0.0078125, %v969_v43 }
 0x907   :  { %v971_v49 = vadd.f32 1e-05, %v970_v47 }
 0x908   :  { %v3100_v54 = vpop.permute.xlu1 %1101 }
 0x909   :  { %2519 = vrsqrt.f32 %v971_v49  ;;  %vm1103_vm2 = vcmp.eq.s32.totalorder %v2884_v14, %v3100_v54 }
 0x90a   :  { %vm1110_vm6 = vmand %vm1103_vm2, %vm1109_vm7 }
 0x90b   :  { %v2168_v57 = vsel %vm1110_vm6, 1.0, %v2636_v1 }
 0x90c   :  { %v3106_v61 = vmax.f32 %v2894_v32, %v2168_v57 }
 0x90e   :  { %v1144_v63 = vsel %vm644_vm13, %v3106_v61, 0.0  ;;  %v1124_v27 = vrot.slane %v3106_v61, %v2891_v29  ;;  %v1117_v50 = vrot.slane %v3106_v61, %v2859_v56 }
 0x90f   :  { %1145 = vadd.xlane.f32.xlu1 %v1144_v63 }
 0x913   :  { %v2520_v3 = vpop.eup %2519 }
 0x914   :  { %v973_v5 = vmul.f32 %v2520_v3, %v965_v23 }
 0x916   :  { %v974_v25 = vmul.f32 %v2903_v38, %v973_v5 }
 0x918   :  { %v975_v9 = vadd.f32 %v2914_v44, %v974_v25 }
 0x91a   :  { %v976_v10 = vadd.f32 %v975_v9, %v913_v6 }
 0x91c   :  { %2521 = vtanh.f32 %v976_v10  ;;  %v2167_v23 = vmul.f32 -1.442695, %v976_v10 }
 0x91e   :  { %2523 = vpow2.f32 %v2167_v23 }
 0x926   :  { %v2522_v32 = vpop.eup %2521 }
 0x927   :  { %986 = vrot.lane.b32.xlu0 %v2522_v32, %s2641_s13 }
 0x928   :  { %v2524_v30 = vpop.eup %2523 }
 0x929   :  { %v980_v35 = vadd.f32 1.0, %v2524_v30 }
 0x92b   :  { %1126 = vbcast.lane.b32.xlu0 %v1124_v27, 256  ;;  %2525 = vrcp.f32 %v980_v35 }
 0x92f   :  { %1119 = vbcast.lane.b32.xlu0 %v1117_v50, 256 }
 0x935   :  { %v3119_v36 = vpop.eup %2525 }
 0x999   :  { %v987_v37 = vpop.permute.xlu0 %986 }
 0x99a   :  { %v989_v40 = vmul.f32 %v3119_v36, %v987_v37 }
 0x99c   :  { %v1146_v42 = vpop.xlane.xlu1 %1145  ;;  %991 = vrot.lane.b32.xlu0 %v989_v40, %s2642_s4 }
 0x99d   :  { %vm1147_vm12 = vcmp.gt.f32.partialorder %v1146_v42, 0.0  ;;  %v1127_v43 = vpop.permute.xlu0 %1126 }
 0x99e   :  { %v1148_v47 = vsel %vm1147_vm12, %v1146_v42, 1.0  ;;  %v1129_v48 = vmul.f32 %v1127_v43, %v2958_v12 }
 0x99f   :  { %v1150_v49 = vrot.slane %v1148_v47, 1 }
 0x9a0   :  { %v1137_v57 = vsel %vm440_vm5, %v1129_v48, 0.0 }
 0x9a1   :  { %2527 = vrcp.f32 %v1150_v49  ;;  %v1138_v0 = vrot.slane %v1137_v57, 4  ;;  %v1120_v63 = vpop.permute.xlu0 %1119 }
 0x9a2   :  { %v1128_v2 = vmul.f32 %v1120_v63, %v2961_v24  ;;  %2529 = vrcp.f32 %v1148_v47 }
 0x9a3   :  { %v1139_v3 = vadd.f32 %v1138_v0, %v1137_v57 }
 0x9a4   :  { %v1130_v4 = vsel %vm440_vm5, %v1128_v2, 0.0 }
 0x9a5   :  { %v1140_v5 = vrot.slane %v1139_v3, 2  ;;  %v1131_v25 = vrot.slane %v1130_v4, 4 }
 0x9a7   :  { %v1141_v6 = vadd.f32 %v1140_v5, %v1139_v3  ;;  %v1132_v9 = vadd.f32 %v1131_v25, %v1130_v4 }
 0x9a9   :  { %v1142_v10 = vrot.slane %v1141_v6, 1  ;;  %v1133_v32 = vrot.slane %v1132_v9, 2 }
 0x9ab   :  { %v2528_v27 = vpop.eup %2527  ;;  %v1143_v50 = vadd.f32 %v1142_v10, %v1141_v6  ;;  %v1134_v23 = vadd.f32 %v1133_v32, %v1132_v9 }
 0x9ac   :  { %v2530_v40 = vpop.eup %2529 }
 0x9ad   :  { %v1156_v30 = vmul.f32 %v2528_v27, %v1143_v50  ;;  %v1135_v35 = vrot.slane %v1134_v23, 1 }
 0x9af   :  { %v1136_v37 = vadd.f32 %v1135_v35, %v1134_v23  ;;  %v1159_v42 = vrot.slane %v1156_v30, 7 }
 0x9b1   :  { %v1154_v43 = vmul.f32 %v2530_v40, %v1136_v37  ;;  %v1164_v49 = vsel %vm640_vm9, %v1143_v50, %v1136_v37 }
 0x9b3   :  { %v1160_v48 = vsel %vm640_vm9, %v1159_v42, %v1154_v43 }
 0x9b4   :  { %v1166_v47 = vsel %vm709_vm10, %v1160_v48, %v1164_v49 }
 0x9b5   :  { %v1167_v57 = vpack.c.bf16 %v1166_v47, %v1166_v47 }
 0x9b7   :  { %2351 = vmatmul.mubr.msk.bf16.vlgmr.msra.gmra.mrb[20].mxu1 %vm440_vm5, %v1167_v57 }
 0x9b8   :  { %2367 = vmatpush3.bf16.msra.mxu1 %v2775_v15  ;;  %2374 = vmatprep.mubr.msk.bf16.mxu1 %vm2637_vm0, %v2636_v1  ;;  %v984_v15 = vmul.f32 %v3119_v36, %v3062_v28 }
 0x9b9   :  { %2368 = vmatprep.subr.bf16.mxu1 %v2636_v1 }
 0x9bc   :  { %2369 = vmatpush3.bf16.msra.mxu1 %v2785_v17 }
 0x9bd   :  { %2370 = vmatprep.subr.bf16.mxu1 %v2636_v1 }
 0x9c0   :  { %2371 = vmatpush3.bf16.msra.mxu1 %v2795_v18 }
 0x9c1   :  { %2372 = vmatprep.subr.bf16.mxu1 %v2636_v1 }
 0x9c4   :  { %2373 = vmatpush3.bf16.msra.mxu1 %v2807_v20 }
 0x9c5   :  { %2386 = vmatprep.subr.bf16.mxu1 %v2636_v1 }
 0xa0e   :  { %v992_v0 = vpop.permute.xlu0 %991 }
 0xa0f   :  { %v994_v63 = vadd.f32 %v992_v0, %v984_v15 }
 0xa11   :  { %996 = vrot.lane.b32.xlu0 %v994_v63, %s2643_s26 }
 0xa83   :  { %v997_v2 = vpop.permute.xlu0 %996 }
 0xa84   :  { %v999_v17 = vsel %vm530_vm11, %v997_v2, 0.0 }
 0xa85   :  { %1000 = vadd.xlane.f32.xlu0 %v999_v17 }
 0xa8a   :  { %v1205_v3 = vpop.f32.mrb[20].mxu1 }
 0xa8b   :  { %v1206_v18 = vadd.f32 %v3018_v31, %v1205_v3  ;;  %v2352_v4 = vpop.f32.mrb[21].mxu1 }
 0xa8c   :  { %v1208_v5 = vpop.f32.mrb[22].mxu1 }
 0xa8d   :  { %v1211_v25 = vmax.f32 %v1206_v18, 0.0  ;;  %v2353_v20 = vpop.f32.mrb[23].mxu1 }
 0xa8f   :  { %v1214_v6 = vpack.c.bf16 %v1211_v25, %v1211_v25 }
 0xa91   :  { %2363 = vmatmul.mubr.msk.bf16.vlgmr.msra.gmra.mrb[12].mxu0 %vm147_vm3, %v1214_v6 }
 0xa92   :  { %2379 = vmatpush3.bf16.msra.mxu0 %v2802_v19  ;;  %2382 = vmatprep.mubr.msk.bf16.mxu0 %vm2637_vm0, %v2636_v1 }
 0xa93   :  { %2380 = vmatprep.subr.bf16.mxu0 %v2636_v1 }
 0xa96   :  { %2381 = vmatpush3.bf16.msra.mxu0 %v2815_v21 }
 0xa97   :  { %2394 = vmatprep.subr.bf16.mxu0 %v2636_v1 }
 0xb12   :  { %v1001_v28 = vpop.xlane.xlu0 %1000 }
 0xb13   :  { %v1002_v9 = vmul.f32 0.03125, %v1001_v28 }
 0xb15   :  { %v1003_v10 = vsub.f32 %v994_v63, %v1002_v9 }
 0xb17   :  { %v1004_v32 = vmul.f32 %v1003_v10, %v1003_v10 }
 0xb19   :  { %1006 = vrot.lane.b32.xlu1 %v1004_v32, %s2643_s26 }
 0xb64   :  { %v1252_v27 = vpop.f32.mrb[12].mxu0 }
 0xb65   :  { %v1258_v50 = vadd.f32 %v1252_v27, %v3045_v55  ;;  %v2364_v23 = vpop.f32.mrb[13].mxu0 }
 0xb66   :  { %v1255_v19 = vpop.f32.mrb[14].mxu0 }
 0xb67   :  { %v1259_v30 = vmax.f32 %v1258_v50, 0.0  ;;  %v2365_v35 = vpop.f32.mrb[15].mxu0  ;;  %v2649_v50 = vmov 2  }
 0xb68   :  { %2471 = vset.pattern.permute.xlu0 %v2649_v50 }
 0xb69   :  { %v1260_v37 = vpack.c.bf16 %v1259_v30, %v1259_v30 }
 0xb6b   :  { %2375 = vmatmul.mubr.msk.bf16.vlgmr.msra.gmra.mrb[24].mxu1 %vm147_vm3, %v1260_v37 }
 0xb6c   :  { %2387 = vmatpush3.bf16.msra.mxu1 %v2934_v58  ;;  %2390 = vmatprep.mubr.msk.bf16.mxu1 %vm2637_vm0, %v2636_v1 }
 0xb6d   :  { %2388 = vmatprep.subr.bf16.mxu1 %v2636_v1 }
 0xb70   :  { %2389 = vmatpush3.bf16.msra.mxu1 %v2941_v59 }
 0xb71   :  { %2406 = vmatprep.subr.bf16.mxu1 %v2636_v1 }
 0xb8b   :  { %v1007_v21 = vpop.permute.xlu1 %1006 }
 0xb8c   :  { %v1009_v40 = vsel %vm530_vm11, %v1007_v21, 0.0 }
 0xb8d   :  { %1010 = vadd.xlane.f32.xlu0 %v1009_v40 }
 0xc1a   :  { %v1011_v42 = vpop.xlane.xlu0 %1010 }
 0xc1b   :  { %v1012_v43 = vmul.f32 0.03125, %v1011_v42 }
 0xc1d   :  { %v1013_v48 = vadd.f32 1e-05, %v1012_v43 }
 0xc1f   :  { %2531 = vrsqrt.f32 %v1013_v48 }
 0xc29   :  { %v2532_v49 = vpop.eup %2531 }
 0xc2a   :  { %v1015_v47 = vmul.f32 %v2532_v49, %v1003_v10 }
 0xc2c   :  { %v1016_v58 = vmul.f32 %v1015_v47, %v3056_v11 }
 0xc2e   :  { %v3166_v57 = vadd.f32 %v1016_v58, %v3058_v33 }
 0xc30   :  { %2533 = vtanh.f32 %v3166_v57 }
 0xc3a   :  { %v2534_v59 = vpop.eup %2533 }
 0xc3b   :  { %1020 = vrot.lane.b32.xlu0 %v2534_v59, %s2641_s13 }
 0xc3e   :  { %v1298_v15 = vpop.f32.mrb[24].mxu1 }
 0xc3f   :  { %v2376_v0 = vpop.f32.mrb[25].mxu1  ;;  %v1299_v4 = vadd.f32 %v2841_v39, %v1298_v15 }
 0xc40   :  { %v1301_v63 = vpop.f32.mrb[26].mxu1 }
 0xc41   :  { %v2377_v2 = vpop.f32.mrb[27].mxu1  ;;  %v1304_v5 = vsel %vm403_vm4, %v1299_v4, 0.0 }
 0xcad   :  { %v1021_v17 = vpop.permute.xlu0 %1020 }
 0xcae   :  { %v3171_v3 = vmul.f32 %v3119_v36, %v1021_v17 }
 0xcb0   :  { %v1319_v18 = vpack.c.bf16 %v3171_v3, %v3171_v3 }
 0xcb2   :  { %1321 = vrot.lane.b32.xlu1 %v1319_v18, %s2642_s4 }
 0xcb6   :  { %1497 = vrot.lane.b32.xlu1 %v2854_v53, %s2647_s0 }
 0xcda   :  { %1305 = vadd.xlane.f32.xlu1 %v1304_v5 }
 0xd24   :  { %v1322_v25 = vpop.permute.xlu1 %1321 }
 0xd25   :  { %2383 = vmatmul.mubr.msk.bf16.vlgmr.msra.gmra.mrb[16].mxu0 %vm440_vm5, %v1322_v25 }
 0xd26   :  { %2395 = vmatpush3.bf16.msra.mxu0 %v2987_v7  ;;  %2402 = vmatprep.mubr.msk.bf16.mxu0 %vm2637_vm0, %v2636_v1 }
 0xd27   :  { %2396 = vmatprep.subr.bf16.mxu0 %v2636_v1 }
 0xd28   :  { %v1498_v36 = vpop.permute.xlu1 %1497 }
 0xd29   :  { %vm1499_vm14 = vcmp.eq.s32.totalorder %v2867_v60, %v1498_v36 }
 0xd2a   :  { %v1500_v53 = vsel %vm1499_vm14, 1, %v2638_v22  ;;  %2397 = vmatpush3.bf16.msra.mxu0 %v2993_v8 }
 0xd2b   :  { %1501 = vrot.lane.b32.xlu1 %v1500_v53, %s2648_s23  ;;  %2398 = vmatprep.subr.bf16.mxu0 %v2636_v1 }
 0xd2e   :  { %2399 = vmatpush3.bf16.msra.mxu0 %v3003_v13 }
 0xd2f   :  { %2400 = vmatprep.subr.bf16.mxu0 %v2636_v1 }
 0xd32   :  { %2401 = vmatpush3.bf16.msra.mxu0 %v3010_v16 }
 0xd33   :  { %2418 = vmatprep.subr.bf16.mxu0 %v2636_v1 }
 0xd67   :  { %v1306_v39 = vpop.xlane.xlu1 %1305 }
 0xd68   :  { %v1307_v13 = vmul.f32 0.0078125, %v1306_v39 }
 0xd6a   :  { %v1308_v16 = vsub.f32 %v1299_v4, %v1307_v13 }
 0xd6c   :  { %v1309_v10 = vmul.f32 %v1308_v16, %v1308_v16 }
 0xd6e   :  { %v1310_v27 = vsel %vm403_vm4, %v1309_v10, 0.0 }
 0xd9d   :  { %v1502_v7 = vpop.permute.xlu1 %1501 }
 0xd9e   :  { %vm1503_vm1 = vcmp.ne.s32.totalorder %v1502_v7, 0 }
 0xd9f   :  { %vm3194_vm7 = vmor %vm3089_vm15, %vm1503_vm1 }
 0xda0   :  { %vm1509_vm2 = vmxor %vm3194_vm7, %vm2640_vm8 }
 0xda1   :  { %v1510_v8 = vsel %vm1509_vm2, 1, %v2638_v22 }
 0xda2   :  { %1512 = vperm.xlu1 %2472, %v1510_v8  }
 0xdf8   :  { %v1360_v6 = vpop.f32.mrb[16].mxu0 }
 0xdf9   :  { %v2384_v28 = vpop.f32.mrb[17].mxu0  ;;  %v1366_v9 = vsel %vm403_vm4, %v1360_v6, 0.0 }
 0xdfa   :  { %1367 = vadd.xlane.f32.xlu0 %v1366_v9  ;;  %v1363_v34 = vpop.f32.mrb[18].mxu0 }
 0xdfb   :  { %v2385_v32 = vpop.f32.mrb[19].mxu0 }
 0xdfe   :  { %1311 = vadd.xlane.f32.xlu0 %v1310_v27 }
 0xe21   :  { %v1513_v47 = vpop.permute.xlu1 %1512 }
 0xe22   :  { %vm1514_vm15 = vcmp.eq.s32.totalorder %v1513_v47, 1 }
 0xe87   :  { %v1368_v23 = vpop.xlane.xlu0 %1367 }
 0xe88   :  { %v1369_v19 = vmul.f32 0.0078125, %v1368_v23 }
 0xe8a   :  { %v1370_v30 = vsub.f32 %v1360_v6, %v1369_v19 }
 0xe8b   :  { %v1312_v21 = vpop.xlane.xlu0 %1311 }
 0xe8c   :  { %v1371_v35 = vmul.f32 %v1370_v30, %v1370_v30  ;;  %v1313_v40 = vmul.f32 0.0078125, %v1312_v21 }
 0xe8e   :  { %v1372_v37 = vsel %vm403_vm4, %v1371_v35, 0.0  ;;  %v1314_v42 = vadd.f32 1e-05, %v1313_v40 }
 0xe8f   :  { %1373 = vadd.xlane.f32.xlu0 %v1372_v37 }
 0xe90   :  { %2535 = vrsqrt.f32 %v1314_v42 }
 0xe9a   :  { %v2536_v59 = vpop.eup %2535 }
 0xea5   :  { %1506 = vperm.xlu0 %2471, %v2867_v60   ;;  %v1316_v60 = vmul.f32 %v2536_v59, %v1308_v16 }
 0xea7   :  { %v1317_v17 = vmul.f32 %v2908_v41, %v1316_v60 }
 0xea9   :  { %v1318_v5 = vadd.f32 %v2919_v45, %v1317_v17 }
 0xf1c   :  { %v1374_v43 = vpop.xlane.xlu0 %1373 }
 0xf1d   :  { %v1375_v48 = vmul.f32 0.0078125, %v1374_v43 }
 0xf1f   :  { %v1376_v49 = vadd.f32 1e-05, %v1375_v48 }
 0xf21   :  { %2537 = vrsqrt.f32 %v1376_v49 }
 0xf24   :  { %v3206_v58 = vpop.permute.xlu0 %1506 }
 0xf25   :  { %vm1508_vm6 = vcmp.eq.s32.totalorder %v2884_v14, %v3206_v58 }
 0xf26   :  { %vm1515_vm12 = vmand %vm1508_vm6, %vm1514_vm15 }
 0xf27   :  { %v2174_v15 = vsel %vm1515_vm12, 1.0, %v2636_v1 }
 0xf28   :  { %v3212_v0 = vmax.f32 %v3106_v61, %v2174_v15 }
 0xf2a   :  { %v1529_v63 = vrot.slane %v3212_v0, %v2891_v29  ;;  %v1549_v61 = vsel %vm644_vm13, %v3212_v0, 0.0  ;;  %v1522_v41 = vrot.slane %v3212_v0, %v2859_v56 }
 0xf2b   :  { %v2538_v2 = vpop.eup %2537 }
 0xf2c   :  { %v1378_v18 = vmul.f32 %v2538_v2, %v1370_v30  ;;  %1531 = vbcast.lane.b32.xlu0 %v1529_v63, 256 }
 0xf2e   :  { %v1379_v4 = vmul.f32 %v2903_v38, %v1378_v18 }
 0xf30   :  { %v1380_v25 = vadd.f32 %v2914_v44, %v1379_v4 }
 0xf32   :  { %v1381_v36 = vadd.f32 %v1380_v25, %v1318_v5  ;;  %v2571_v5 = vld [vmem:[%s3483_s5] sm:$0xff]   ;;  %v2572_v25 = vld [vmem:[%s3483_s5 + $0x8] sm:$0xff]  }
 0xf34   :  { %2539 = vtanh.f32 %v1381_v36  ;;  %v2173_v39 = vmul.f32 -1.442695, %v1381_v36  ;;  %v2573_v36 = vld [vmem:[%s3483_s5 + $0x10] sm:$0xff]  }
 0xf36   :  { %2541 = vpow2.f32 %v2173_v39 }
 0xf3e   :  { %v2540_v53 = vpop.eup %2539 }
 0xf3f   :  { %1391 = vrot.lane.b32.xlu1 %v2540_v53, %s2641_s13  ;;  %v2574_v53 = vld [vmem:[%s3483_s5 + $0x18] sm:$0xff]  }
 0xf40   :  { %v2542_v38 = vpop.eup %2541 }
 0xf41   :  { %v1385_v7 = vadd.f32 1.0, %v2542_v38 }
 0xf43   :  { %2543 = vrcp.f32 %v1385_v7 }
 0xf4d   :  { %v3225_v45 = vpop.eup %2543 }
 0xf63   :  { %1550 = vadd.xlane.f32.xlu1 %v1549_v61  ;;  %v1389_v61 = vmul.f32 %v3225_v45, %v3166_v57  ;;  %v2575_v57 = vld [vmem:[%s3483_s5 + $0x20] sm:$0xff]  }
 0xf74   :  { %1524 = vbcast.lane.b32.xlu1 %v1522_v41, 256 }
 0xf9e   :  { %v1532_v13 = vpop.permute.xlu0 %1531 }
 0xf9f   :  { %v1534_v16 = vmul.f32 %v1532_v13, %v2958_v12 }
 0xfa1   :  { %v1542_v6 = vsel %vm440_vm5, %v1534_v16, 0.0 }
 0xfa2   :  { %v1543_v28 = vrot.slane %v1542_v6, 4 }
 0xfa4   :  { %v1544_v9 = vadd.f32 %v1543_v28, %v1542_v6 }
 0xfa6   :  { %v1545_v34 = vrot.slane %v1544_v9, 2 }
 0xfa8   :  { %v1546_v19 = vadd.f32 %v1545_v34, %v1544_v9 }
 0xfaa   :  { %v1547_v37 = vrot.slane %v1546_v19, 1 }
 0xfac   :  { %v1548_v42 = vadd.f32 %v1547_v37, %v1546_v19 }
 0xfb1   :  { %v1392_v44 = vpop.permute.xlu1 %1391 }
 0xfb2   :  { %v1394_v8 = vmul.f32 %v3225_v45, %v1392_v44 }
 0xfb4   :  { %1396 = vrot.lane.b32.xlu0 %v1394_v8, %s2642_s4 }
 0xff0   :  { %v1551_v10 = vpop.xlane.xlu1 %1550 }
 0xff1   :  { %vm1552_vm14 = vcmp.gt.f32.partialorder %v1551_v10, 0.0 }
 0xff2   :  { %v1553_v32 = vsel %vm1552_vm14, %v1551_v10, 1.0 }
 0xff3   :  { %v1555_v27 = vrot.slane %v1553_v32, 1 }
 0xff4   :  { %v1525_v50 = vpop.permute.xlu1 %1524 }
 0xff5   :  { %2545 = vrcp.f32 %v1555_v27  ;;  %v1533_v23 = vmul.f32 %v1525_v50, %v2961_v24 }
 0xff6   :  { %2547 = vrcp.f32 %v1553_v32 }
 0xff7   :  { %v1535_v30 = vsel %vm440_vm5, %v1533_v23, 0.0 }
 0xff8   :  { %v1536_v35 = vrot.slane %v1535_v30, 4 }
 0xffa   :  { %v1537_v21 = vadd.f32 %v1536_v35, %v1535_v30 }
 0xffc   :  { %v1538_v40 = vrot.slane %v1537_v21, 2 }
 0xffe   :  { %v1539_v43 = vadd.f32 %v1538_v40, %v1537_v21 }
 0xfff   :  { %v2546_v48 = vpop.eup %2545 }
0x1000   :  { %v1561_v49 = vmul.f32 %v2546_v48, %v1548_v42  ;;  %v1540_v47 = vrot.slane %v1539_v43, 1  ;;  %v2548_v15 = vpop.eup %2547 }
0x1002   :  { %v1541_v59 = vadd.f32 %v1540_v47, %v1539_v43  ;;  %v1564_v60 = vrot.slane %v1561_v49, 7  ;;  %v2577_v43 = vld [vmem:[%s3484_s6 + $0x40] sm:$0xff]  }
0x1004   :  { %v1559_v63 = vmul.f32 %v2548_v15, %v1541_v59  ;;  %v1569_v17 = vsel %vm640_vm9, %v1548_v42, %v1541_v59 }
0x1006   :  { %v1565_v2 = vsel %vm640_vm9, %v1564_v60, %v1559_v63 }
0x1007   :  { %v1571_v18 = vsel %vm709_vm10, %v1565_v2, %v1569_v17 }
0x1008   :  { %v1572_v4 = vpack.c.bf16 %v1571_v18, %v1571_v18  ;;  %v2579_v18 = vld [vmem:[%s3486_s8] ss:$0 sm:$0xff] }
0x100a   :  { %2391 = vmatmul.mubr.msk.bf16.vlgmr.msra.gmra.mrb[28].mxu1 %vm440_vm5, %v1572_v4 }
0x100b   :  { %2407 = vmatpush3.bf16.msra.mxu1 %v2571_v5  ;;  %2414 = vmatprep.mubr.msk.bf16.mxu1 %vm2637_vm0, %v2636_v1 }
0x100c   :  { %2408 = vmatprep.subr.bf16.mxu1 %v2636_v1 }
0x100f   :  { %2409 = vmatpush3.bf16.msra.mxu1 %v2572_v25 }
0x1010   :  { %2410 = vmatprep.subr.bf16.mxu1 %v2636_v1 }
0x1013   :  { %2411 = vmatpush3.bf16.msra.mxu1 %v2573_v36 }
0x1014   :  { %2412 = vmatprep.subr.bf16.mxu1 %v2636_v1 }
0x1017   :  { %2413 = vmatpush3.bf16.msra.mxu1 %v2574_v53 }
0x1018   :  { %2426 = vmatprep.subr.bf16.mxu1 %v2636_v1 }
0x1026   :  { %v1397_v41 = vpop.permute.xlu0 %1396 }
0x1027   :  { %v1399_v39 = vadd.f32 %v1397_v41, %v1389_v61 }
0x1029   :  { %1401 = vrot.lane.b32.xlu0 %v1399_v39, %s2643_s26 }
0x109b   :  { %v1402_v38 = vpop.permute.xlu0 %1401 }
0x109c   :  { %v1404_v7 = vsel %vm530_vm11, %v1402_v38, 0.0 }
0x109d   :  { %1405 = vadd.xlane.f32.xlu0 %v1404_v7 }
0x10dd   :  { %v1610_v44 = vpop.f32.mrb[28].mxu1 }
0x10de   :  { %v1611_v8 = vadd.f32 %v3018_v31, %v1610_v44  ;;  %v2392_v13 = vpop.f32.mrb[29].mxu1  ;;  %v2576_v31 = vld [vmem:[%s3483_s5 + $0x28] sm:$0xff]  }
0x10df   :  { %v1613_v16 = vpop.f32.mrb[30].mxu1 }
0x10e0   :  { %v1616_v6 = vmax.f32 %v1611_v8, 0.0  ;;  %v2393_v28 = vpop.f32.mrb[31].mxu1 }
0x10e2   :  { %v1619_v9 = vpack.c.bf16 %v1616_v6, %v1616_v6 }
0x10e4   :  { %2403 = vmatmul.mubr.msk.bf16.vlgmr.msra.gmra.mrb[20].mxu0 %vm147_vm3, %v1619_v9 }
0x10e5   :  { %2419 = vmatpush3.bf16.msra.mxu0 %v2575_v57  ;;  %2422 = vmatprep.mubr.msk.bf16.mxu0 %vm2637_vm0, %v2636_v1 }
0x10e6   :  { %2420 = vmatprep.subr.bf16.mxu0 %v2636_v1 }
0x10e9   :  { %2421 = vmatpush3.bf16.msra.mxu0 %v2576_v31 }
0x10ea   :  { %2434 = vmatprep.subr.bf16.mxu0 %v2636_v1 }
0x112a   :  { %v1406_v10 = vpop.xlane.xlu0 %1405 }
0x112b   :  { %v1407_v34 = vmul.f32 0.03125, %v1406_v10 }
0x112d   :  { %v1408_v32 = vsub.f32 %v1399_v39, %v1407_v34 }
0x112f   :  { %v1409_v27 = vmul.f32 %v1408_v32, %v1408_v32 }
0x1131   :  { %1411 = vrot.lane.b32.xlu1 %v1409_v27, %s2643_s26 }
0x11a3   :  { %v1412_v50 = vpop.permute.xlu1 %1411 }
0x11a4   :  { %v1414_v23 = vsel %vm530_vm11, %v1412_v50, 0.0  ;;  %v3310_v50 = vld [vmem:[%s3480_s2] sm:$0x3]  ;;  %s2651_s2 = smov 125  }
0x11a5   :  { %1415 = vadd.xlane.f32.xlu1 %v1414_v23 }
0x11b7   :  { %v1657_v19 = vpop.f32.mrb[20].mxu0 }
0x11b8   :  { %v1663_v30 = vadd.f32 %v1657_v19, %v3045_v55  ;;  %v2404_v35 = vpop.f32.mrb[21].mxu0  ;;  %v2578_v55 = vld [vmem:[%s3484_s6 + $0x48] sm:$0xff]  }
0x11b9   :  { %v1660_v37 = vpop.f32.mrb[22].mxu0 }
0x11ba   :  { %v1664_v21 = vmax.f32 %v1663_v30, 0.0  ;;  %v2405_v40 = vpop.f32.mrb[23].mxu0 }
0x11bc   :  { %v1665_v42 = vpack.c.bf16 %v1664_v21, %v1664_v21 }
0x11be   :  { %2415 = vmatmul.mubr.msk.bf16.vlgmr.msra.gmra.mrb[32].mxu1 %vm147_vm3, %v1665_v42  ;;  %v2581_v42 = vld [vmem:[%s3481_s3] sm:$0x3] }
0x11bf   :  { %2427 = vmatpush3.bf16.msra.mxu1 %v2577_v43  ;;  %2430 = vmatprep.mubr.msk.bf16.mxu1 %vm2637_vm0, %v2636_v1 }
0x11c0   :  { %2428 = vmatprep.subr.bf16.mxu1 %v2636_v1 }
0x11c3   :  { %2429 = vmatpush3.bf16.msra.mxu1 %v2578_v55 }
0x1232   :  { %v1416_v48 = vpop.xlane.xlu1 %1415 }
0x1233   :  { %v1417_v49 = vmul.f32 0.03125, %v1416_v48 }
0x1235   :  { %v1418_v47 = vadd.f32 1e-05, %v1417_v49 }
0x1237   :  { %2549 = vrsqrt.f32 %v1418_v47  ;;  %v2582_v47 = vld [vmem:[%s3486_s8 + $0x1] ss:$0 sm:$0xff] }
0x1241   :  { %v2550_v59 = vpop.eup %2549 }
0x1242   :  { %v1420_v15 = vmul.f32 %v2550_v59, %v1408_v32 }
0x1244   :  { %v1421_v60 = vmul.f32 %v1420_v15, %v3056_v11 }
0x1246   :  { %v3287_v63 = vadd.f32 %v1421_v60, %v3058_v33  ;;  %v2583_v60 = vld [vmem:[%s3486_s8 + $0x3] ss:$0 sm:$0xff] }
0x1248   :  { %2551 = vtanh.f32 %v3287_v63 }
0x1252   :  { %v2552_v2 = vpop.eup %2551 }
0x1253   :  { %1425 = vrot.lane.b32.xlu0 %v2552_v2, %s2641_s13 }
0x1291   :  { %v1703_v17 = vpop.f32.mrb[32].mxu1 }
0x1292   :  { %v1704_v4 = vadd.f32 %v2579_v18, %v1703_v17  ;;  %v2416_v5 = vpop.f32.mrb[33].mxu1  ;;  %v2584_v17 = vld [vmem:[%s3486_s8 + $0x2] ss:$0 sm:$0xff] }
0x1293   :  { %v1706_v25 = vpop.f32.mrb[34].mxu1 }
0x1294   :  { %v2417_v36 = vpop.f32.mrb[35].mxu1  ;;  %v1709_v53 = vsel %vm403_vm4, %v1704_v4, 0.0 }
0x1295   :  { %1710 = vadd.xlane.f32.xlu0 %v1709_v53  ;;  %v2652_v36 = vmov 3  }
0x1296   :  { %2473 = vset.pattern.permute.xlu0 %v2652_v36 }
0x12c5   :  { %v1426_v61 = vpop.permute.xlu0 %1425 }
0x12c6   :  { %v3296_v41 = vmul.f32 %v3225_v45, %v1426_v61 }
0x12c8   :  { %v1724_v39 = vpack.c.bf16 %v3296_v41, %v3296_v41 }
0x12ca   :  { %1726 = vrot.lane.b32.xlu1 %v1724_v39, %s2642_s4 }
0x1322   :  { %v1711_v38 = vpop.xlane.xlu0 %1710 }
0x1323   :  { %v1712_v7 = vmul.f32 0.0078125, %v1711_v38 }
0x1325   :  { %v1713_v44 = vsub.f32 %v1704_v4, %v1712_v7  ;;  %v2585_v4 = vld [vmem:[%s3486_s8 + $0x4] ss:$0 sm:$0xff] }
0x1327   :  { %v1714_v8 = vmul.f32 %v1713_v44, %v1713_v44 }
0x1329   :  { %v1715_v13 = vsel %vm403_vm4, %v1714_v8, 0.0 }
0x132a   :  { %1716 = vadd.xlane.f32.xlu0 %v1715_v13 }
0x133c   :  { %v1727_v16 = vpop.permute.xlu1 %1726 }
0x133d   :  { %2423 = vmatmul.mubr.msk.bf16.vlgmr.msra.gmra.mrb[24].mxu0 %vm440_vm5, %v1727_v16 }
0x133e   :  { %2442 = vmatprep.mubr.msk.bf16.mxu0 %vm2637_vm0, %v2636_v1 }
0x13b7   :  { %v1717_v23 = vpop.xlane.xlu0 %1716 }
0x13b8   :  { %v1718_v19 = vmul.f32 0.0078125, %v1717_v23 }
0x13ba   :  { %v1719_v30 = vadd.f32 1e-05, %v1718_v19 }
0x13bc   :  { %2553 = vrsqrt.f32 %v1719_v30 }
0x13c6   :  { %v2554_v55 = vpop.eup %2553 }
0x13c7   :  { %v1721_v48 = vmul.f32 %v2554_v55, %v1713_v44 }
0x13c9   :  { %v1722_v59 = vmul.f32 %v2582_v47, %v1721_v48 }
0x13cb   :  { %v1723_v18 = vadd.f32 %v2584_v17, %v1722_v59 }
0x1410   :  { %v1765_v45 = vpop.f32.mrb[24].mxu0 }
0x1411   :  { %v2424_v6 = vpop.f32.mrb[25].mxu0  ;;  %v1771_v28 = vsel %vm403_vm4, %v1765_v45, 0.0 }
0x1412   :  { %1772 = vadd.xlane.f32.xlu1 %v1771_v28  ;;  %v1768_v9 = vpop.f32.mrb[26].mxu0 }
0x1413   :  { %v2425_v57 = vpop.f32.mrb[27].mxu0 }
0x149f   :  { %v1773_v31 = vpop.xlane.xlu1 %1772 }
0x14a0   :  { %v1774_v10 = vmul.f32 0.0078125, %v1773_v31 }
0x14a2   :  { %v1775_v34 = vsub.f32 %v1765_v45, %v1774_v10 }
0x14a4   :  { %v1776_v32 = vmul.f32 %v1775_v34, %v1775_v34 }
0x14a6   :  { %v1777_v27 = vsel %vm403_vm4, %v1776_v32, 0.0 }
0x14a7   :  { %1778 = vadd.xlane.f32.xlu0 %v1777_v27 }
0x14bd   :  { %1902 = vrot.lane.b32.xlu0 %v3310_v50, %s2650_s24 }
0x1534   :  { %v1779_v35 = vpop.xlane.xlu0 %1778 }
0x1535   :  { %v1780_v37 = vmul.f32 0.0078125, %v1779_v35 }
0x1537   :  { %v1781_v21 = vadd.f32 1e-05, %v1780_v37 }
0x1538   :  { %v1903_v40 = vpop.permute.xlu0 %1902 }
0x1539   :  { %2555 = vrsqrt.f32 %v1781_v21  ;;  %vm1904_vm0 = vcmp.eq.s32.totalorder %v2581_v42, %v1903_v40 }
0x153a   :  { %v1905_v43 = vsel %vm1904_vm0, 1, %v2638_v22 }
0x153b   :  { %1906 = vrot.lane.b32.xlu0 %v1905_v43, %s2651_s2 }
0x153f   :  { %1911 = vperm.xlu0 %2473, %v2581_v42  }
0x1543   :  { %v2556_v49 = vpop.eup %2555  ;;  %2474 = vset.pattern.permute.xlu0 %v2638_v22 }
0x1544   :  { %v1783_v15 = vmul.f32 %v2556_v49, %v1775_v34 }
0x1546   :  { %v1784_v2 = vmul.f32 %v2583_v60, %v1783_v15 }
0x1548   :  { %v1785_v5 = vadd.f32 %v2585_v4, %v1784_v2 }
0x154a   :  { %v1786_v25 = vadd.f32 %v1785_v5, %v1723_v18 }
0x154c   :  { %2557 = vtanh.f32 %v1786_v25  ;;  %v2179_v61 = vmul.f32 -1.442695, %v1786_v25 }
0x154e   :  { %2559 = vpow2.f32 %v2179_v61 }
0x1556   :  { %v2558_v53 = vpop.eup %2557 }
0x1557   :  { %1796 = vrot.lane.b32.xlu1 %v2558_v53, %s2641_s13 }
0x1558   :  { %v2560_v39 = vpop.eup %2559 }
0x1559   :  { %v1790_v38 = vadd.f32 1.0, %v2560_v39 }
0x155b   :  { %2561 = vrcp.f32 %v1790_v38 }
0x1565   :  { %v3331_v44 = vpop.eup %2561 }
0x1566   :  { %v1794_v45 = vmul.f32 %v3331_v44, %v3287_v63 }
0x15ad   :  { %v1907_v7 = vpop.permute.xlu0 %1906 }
0x15ae   :  { %vm1908_vm4 = vcmp.ne.s32.totalorder %v1907_v7, 0 }
0x15af   :  { %vm1909_vm1 = vmor %vm3194_vm7, %vm1908_vm4 }
0x15b0   :  { %vm1914_vm2 = vmxor %vm1909_vm1, %vm2640_vm8 }
0x15b1   :  { %v1915_v16 = vsel %vm1914_vm2, 1, %v2638_v22 }
0x15be   :  { %v1912_v9 = vpop.permute.xlu0 %1911 }
0x15bf   :  { %vm1913_vm7 = vcmp.eq.s32.totalorder %v2884_v14, %v1912_v9  ;;  %v1031_v9 = vrot.slane %v3171_v3, %v2849_v52 }
0x15c9   :  { %v1797_v8 = vpop.permute.xlu1 %1796 }
0x15ca   :  { %v1799_v13 = vmul.f32 %v3331_v44, %v1797_v8 }
0x15cc   :  { %1801 = vrot.lane.b32.xlu1 %v1799_v13, %s2642_s4  ;;  %v2495_v13 = vld [vmem:[%s3484_s6 + $0x50] sm:$0xff]  }
0x15cd   :  { %2435 = vmatpush3.bf16.msra.mxu0 %v2495_v13 }
0x15ce   :  { %2436 = vmatprep.subr.bf16.mxu0 %v2636_v1 }
0x15d0   :  { %1917 = vperm.xlu1 %2472, %v1915_v16  }
0x163e   :  { %v1802_v6 = vpop.permute.xlu1 %1801 }
0x163f   :  { %v1804_v28 = vadd.f32 %v1802_v6, %v1794_v45  ;;  %v2496_v45 = vld [vmem:[%s3484_s6 + $0x58] sm:$0xff]  }
0x1640   :  { %2437 = vmatpush3.bf16.msra.mxu0 %v2496_v45 }
0x1641   :  { %1806 = vrot.lane.b32.xlu1 %v1804_v28, %s2643_s26  ;;  %2438 = vmatprep.subr.bf16.mxu0 %v2636_v1 }
0x1644   :  { %2439 = vmatpush3.bf16.msra.mxu0 %v2497_v62 }
0x1645   :  { %2440 = vmatprep.subr.bf16.mxu0 %v2636_v1 }
0x164f   :  { %v1918_v20 = vpop.permute.xlu1 %1917 }
0x1650   :  { %vm1919_vm15 = vcmp.eq.s32.totalorder %v1918_v20, 1  ;;  %v1032_v20 = vcombine.high %v1031_v9, %v1031_v9 }
0x1651   :  { %vm1920_vm6 = vmand %vm1913_vm7, %vm1919_vm15 }
0x1652   :  { %v2180_v57 = vsel %vm1920_vm6, 1.0, %v2636_v1 }
0x1653   :  { %v1923_v31 = vmax.f32 %v3212_v0, %v2180_v57  ;;  %v1039_v57 = vrot.slane %v1031_v9, %v2849_v52 }
0x1655   :  { %v1954_v22 = vsel %vm644_vm13, %v1923_v31, 0.0  ;;  %v1934_v10 = vrot.slane %v1923_v31, %v2891_v29  ;;  %v1927_v63 = vrot.slane %v1923_v31, %v2859_v56 }
0x1656   :  { %1955 = vadd.xlane.f32.xlu0 %v1954_v22  ;;  %v1046_v22 = vrot.slane %v1032_v20, %v2849_v52 }
0x1657   :  { %1936 = vbcast.lane.b32.xlu1 %v1934_v10, 256 }
0x1658   :  { %v1054_v3 = vrot.slane %v1046_v22, %v2859_v56 }
0x165b   :  { %1929 = vbcast.lane.b32.xlu1 %v1927_v63, 256  ;;  %v1050_v63 = vrot.slane %v1039_v57, %v2859_v56 }
0x16b3   :  { %v1807_v34 = vpop.permute.xlu1 %1806 }
0x16b4   :  { %v1809_v32 = vsel %vm530_vm11, %v1807_v34, 0.0 }
0x16b5   :  { %1810 = vadd.xlane.f32.xlu1 %v1809_v32 }
0x16c9   :  { %v1937_v27 = vpop.permute.xlu1 %1936 }
0x16ca   :  { %v1939_v19 = vmul.f32 %v1937_v27, %v2958_v12 }
0x16cc   :  { %v1947_v0 = vsel %vm440_vm5, %v1939_v19, 0.0 }
0x16cd   :  { %v1930_v23 = vpop.permute.xlu1 %1929  ;;  %v1948_v29 = vrot.slane %v1947_v0, 4 }
0x16ce   :  { %v1938_v30 = vmul.f32 %v1930_v23, %v2961_v24 }
0x16cf   :  { %v1949_v21 = vadd.f32 %v1948_v29, %v1947_v0  ;;  %v2586_v0 = vld [vmem:[%s3487_s9 + $0x2] ss:$0 sm:$0xff] }
0x16d0   :  { %v1940_v35 = vsel %vm440_vm5, %v1938_v30, 0.0 }
0x16d1   :  { %v1941_v37 = vrot.slane %v1940_v35, 4  ;;  %v1950_v43 = vrot.slane %v1949_v21, 2 }
0x16d3   :  { %v1942_v40 = vadd.f32 %v1941_v37, %v1940_v35  ;;  %v1951_v47 = vadd.f32 %v1950_v43, %v1949_v21 }
0x16d5   :  { %v1943_v49 = vrot.slane %v1942_v40, 2  ;;  %v1952_v15 = vrot.slane %v1951_v47, 1 }
0x16d7   :  { %v1944_v59 = vadd.f32 %v1943_v49, %v1942_v40  ;;  %v1953_v17 = vadd.f32 %v1952_v15, %v1951_v47 }
0x16d9   :  { %v1945_v60 = vrot.slane %v1944_v59, 1 }
0x16db   :  { %v1946_v4 = vadd.f32 %v1945_v60, %v1944_v59 }
0x16dd   :  { %v1974_v53 = vsel %vm640_vm9, %v1953_v17, %v1946_v4 }
0x16e3   :  { %v1956_v42 = vpop.xlane.xlu0 %1955 }
0x16e4   :  { %vm1957_vm8 = vcmp.gt.f32.partialorder %v1956_v42, 0.0 }
0x16e5   :  { %v1958_v55 = vsel %vm1957_vm8, %v1956_v42, 1.0 }
0x16e6   :  { %v1960_v48 = vrot.slane %v1958_v55, 1  ;;  %2563 = vrcp.f32 %v1958_v55 }
0x16e8   :  { %2565 = vrcp.f32 %v1960_v48 }
0x16f0   :  { %v2564_v2 = vpop.eup %2563 }
0x16f1   :  { %v1964_v25 = vmul.f32 %v2564_v2, %v1946_v4  ;;  %v2187_v4 = vld [vmem:[%s3487_s9 + $0x3] ss:$0 sm:$0xff] }
0x16f2   :  { %v2566_v18 = vpop.eup %2565 }
0x16f3   :  { %v1966_v5 = vmul.f32 %v2566_v18, %v1953_v17 }
0x16f5   :  { %v1969_v36 = vrot.slane %v1966_v5, 7 }
0x16f7   :  { %v1970_v61 = vsel %vm640_vm9, %v1969_v36, %v1964_v25 }
0x16f8   :  { %v1976_v39 = vsel %vm709_vm10, %v1970_v61, %v1974_v53 }
0x16f9   :  { %v1977_v38 = vpack.c.bf16 %v1976_v39, %v1976_v39 }
0x16fb   :  { %2431 = vmatmul.mubr.msk.bf16.vlgmr.msra.gmra.mrb[36].mxu1 %vm440_vm5, %v1977_v38  ;;  %v580_v38 = vrot.slane %v3069_v46, %v2849_v52 }
0x16fd   :  { %v581_v13 = vcombine.high %v580_v38, %v580_v38 }
0x16ff   :  { %v595_v9 = vrot.slane %v581_v13, %v2849_v52 }
0x1742   :  { %v1811_v7 = vpop.xlane.xlu1 %1810 }
0x1743   :  { %v1812_v8 = vmul.f32 0.03125, %v1811_v7 }
0x1745   :  { %v1813_v16 = vsub.f32 %v1804_v28, %v1812_v8  ;;  %v2498_v28 = vld [vmem:[%s3484_s6 + $0x68] sm:$0xff]  }
0x1746   :  { %2441 = vmatpush3.bf16.msra.mxu0 %v2498_v28 }
0x1747   :  { %v1814_v6 = vmul.f32 %v1813_v16, %v1813_v16 }
0x1749   :  { %1816 = vrot.lane.b32.xlu0 %v1814_v6, %s2643_s26  ;;  %v588_v6 = vrot.slane %v580_v38, %v2849_v52 }
0x174d   :  { %608 = vrot.lane.b32.xlu0 %v2961_v24, %s2643_s26  ;;  %v1436_v24 = vrot.slane %v3296_v41, %v2849_v52 }
0x174f   :  { %v1437_v10 = vcombine.high %v1436_v24, %v1436_v24  ;;  %v1444_v60 = vrot.slane %v1436_v24, %v2849_v52 }
0x1751   :  { %610 = vrot.lane.b32.xlu0 %v2958_v12, %s2643_s26  ;;  %v1451_v32 = vrot.slane %v1437_v10, %v2849_v52  ;;  %v1455_v17 = vrot.slane %v1444_v60, %v2859_v56 }
0x1753   :  { %v1459_v41 = vrot.slane %v1451_v32, %v2859_v56 }
0x17bb   :  { %v1817_v31 = vpop.permute.xlu0 %1816 }
0x17bc   :  { %v1819_v1 = vsel %vm530_vm11, %v1817_v31, 0.0  ;;  %v603_v31 = vrot.slane %v595_v9, %v2859_v56 }
0x17bd   :  { %1820 = vadd.xlane.f32.xlu1 %v1819_v1 }
0x17bf   :  { %v609_v12 = vpop.permute.xlu0 %608 }
0x17c0   :  { %v1057_v34 = vmul.f32 %v1050_v63, %v609_v12  ;;  %v1462_v18 = vmul.f32 %v1455_v17, %v609_v12 }
0x17c2   :  { %1061 = vrot.lane.b32.xlu0 %v1057_v34, %s2642_s4 }
0x17c3   :  { %v611_v27 = vpop.permute.xlu0 %610 }
0x17c4   :  { %v1058_v23 = vmul.f32 %v1054_v3, %v611_v27  ;;  %v1463_v19 = vmul.f32 %v1459_v41, %v611_v27  ;;  %v615_v1 = vmul.f32 %v611_v27, %v603_v31 }
0x17c6   :  { %1063 = vrot.lane.b32.xlu0 %v1058_v23, %s2642_s4 }
0x17ca   :  { %1468 = vrot.lane.b32.xlu0 %v1463_v19, %s2642_s4 }
0x17ce   :  { %v2015_v30 = vpop.f32.mrb[36].mxu1 }
0x17cf   :  { %v2016_v35 = vadd.f32 %v2586_v0, %v2015_v30  ;;  %v2432_v29 = vpop.f32.mrb[37].mxu1 }
0x17d0   :  { %v2018_v37 = vpop.f32.mrb[38].mxu1 }
0x17d1   :  { %v2021_v21 = vmax.f32 %v2016_v35, 0.0  ;;  %v2433_v40 = vpop.f32.mrb[39].mxu1 }
0x17d3   :  { %v2022_v42 = vpack.c.bf16 %v2021_v21, %v2021_v21 }
0x17d5   :  { %2443 = vmatmul.mubr.msk.bf16.vlgmr.msra.gmra.mrb[28].mxu0 %vm147_vm3, %v2022_v42  ;;  %vm2096_vm3 = vcmask 517120  }
0x1834   :  { %v1062_v22 = vpop.permute.xlu0 %1061 }
0x1835   :  { %v1067_v34 = vsel %vm440_vm5, %v1062_v22, 0.0 }
0x184a   :  { %v1821_v43 = vpop.xlane.xlu1 %1820 }
0x184b   :  { %v1822_v55 = vmul.f32 0.03125, %v1821_v43 }
0x184d   :  { %v1823_v48 = vadd.f32 1e-05, %v1822_v55  ;;  %v634_v55 = vsub.s32 %v2884_v14, %v2846_v51 }
0x184f   :  { %2567 = vrsqrt.f32 %v1823_v48 }
0x1859   :  { %v2568_v49 = vpop.eup %2567 }
0x185a   :  { %v1825_v47 = vmul.f32 %v2568_v49, %v1813_v16 }
0x185c   :  { %v1826_v59 = vmul.f32 %v1825_v47, %v3056_v11  ;;  %v2587_v11 = vld [vmem:[%s3479_s1] sm:$0x3]  ;;  %s2653_s1 = smov [#allocation5]  }
0x185d   :  { %s2114_s9 = sshll.u32 %s2653_s1, 4  ;;  %s2115_s9 = int_to_ptr.vmem [resolvable:$true] %s2114_s9 }
0x185e   :  { %v1827_v15 = vadd.f32 %v1826_v59, %v3058_v33  ;;  %p2593_p1 = scmp.lt.s32.totalorder %s2115_s9, %s2115_s9 }
0x1860   :  { %2569 = vtanh.f32 %v1827_v15 }
0x186a   :  { %v2570_v2 = vpop.eup %2569 }
0x186b   :  { %1830 = vrot.lane.b32.xlu1 %v2570_v2, %s2641_s13  ;;  %s2588_s13 = scalar_lea.vmem %s2115_s9, 32 }
0x186c   :  { %p2589_p0 = scmp.ne.s32.totalorder %s2115_s9, %s2588_s13  ;;  %p2594_p2 = scmp.lt.s32.totalorder %s2588_s13, %s2588_s13 }
0x186e   :  { %p2595_p3 = por %p2594_p2, %p2593_p1 }
0x186f   :  { %1466 = vrot.lane.b32.xlu1 %v1462_v18, %s2642_s4 }
0x1870   :  { %p2596_p4 = pnand %p2595_p3, %p2589_p0 }
0x18a8   :  { %v2084_v5 = vpop.f32.mrb[28].mxu0 }
0x18a9   :  { %v2090_v33 = vadd.f32 %v2587_v11, %v2084_v5  ;;  %v2444_v25 = vpop.f32.mrb[29].mxu0 }
0x18aa   :  { %v2087_v36 = vpop.f32.mrb[30].mxu0 }
0x18ab   :  { %v2095_v53 = vadd.f32 %v2187_v4, %v2090_v33  ;;  %v2445_v61 = vpop.f32.mrb[31].mxu0 }
0x18ad   :  { %2097 = vst.msk [vmem:[#allocation5] sm:$0x3] %vm2096_vm3, %v2095_v53 }
0x18dd   :  { %v1831_v39 = vpop.permute.xlu1 %1830 }
0x18de   :  { %v1833_v7 = vmul.f32 %v3331_v44, %v1831_v39  ;;  %v599_v44 = vrot.slane %v588_v6, %v2859_v56 }
0x18e0   :  { %v1841_v8 = vrot.slane %v1833_v7, %v2849_v52  ;;  %v614_v24 = vmul.f32 %v609_v12, %v599_v44 }
0x18e1   :  { %v1467_v63 = vpop.permute.xlu1 %1466 }
0x18e2   :  { %v1842_v16 = vcombine.high %v1841_v8, %v1841_v8  ;;  %v1849_v45 = vrot.slane %v1841_v8, %v2849_v52  ;;  %v1472_v3 = vsel %vm440_vm5, %v1467_v63, 0.0 }
0x18e4   :  { %v1856_v62 = vrot.slane %v1842_v16, %v2849_v52  ;;  %v1860_v28 = vrot.slane %v1849_v45, %v2859_v56  ;;  %v1064_v52 = vpop.permute.xlu0 %1063 }
0x18e5   :  { %v1070_v10 = vsel %vm440_vm5, %v1064_v52, 0.0 }
0x18e6   :  { %v1867_v20 = vmul.f32 %v1860_v28, %v609_v12  ;;  %v1864_v57 = vrot.slane %v1856_v62, %v2859_v56 }
0x18e8   :  { %1871 = vrot.lane.b32.xlu1 %v1867_v20, %s2642_s4  ;;  %v1868_v46 = vmul.f32 %v1864_v57, %v611_v27  ;;  %v1469_v32 = vpop.permute.xlu0 %1468 }
0x18e9   :  { %v1475_v56 = vsel %vm440_vm5, %v1469_v32, 0.0 }
0x18ea   :  { %1873 = vrot.lane.b32.xlu0 %v1868_v46, %s2642_s4 }
0x18ec   :  { %618 = vrot.lane.b32.xlu1 %v614_v24, %s2642_s4 }
0x18ee   :  { %620 = vrot.lane.b32.xlu0 %v615_v1, %s2642_s4 }
0x190d   :  { %1071 = vadd.xlane.f32.xlu0 %v1070_v10 }
0x1910   :  { %1068 = vadd.xlane.f32.xlu1 %v1067_v34 }
0x1911   :  { %1473 = vadd.xlane.f32.xlu0 %v1472_v3 }
0x1914   :  { %1476 = vadd.xlane.f32.xlu1 %v1475_v56 }
0x195a   :  { %v1872_v12 = vpop.permute.xlu1 %1871 }
0x195b   :  { %v1877_v27 = vsel %vm440_vm5, %v1872_v12, 0.0 }
0x195c   :  { %1878 = vadd.xlane.f32.xlu0 %v1877_v27  ;;  %v1874_v23 = vpop.permute.xlu0 %1873 }
0x195d   :  { %v1880_v41 = vsel %vm440_vm5, %v1874_v23, 0.0 }
0x195e   :  { %v619_v19 = vpop.permute.xlu1 %618  ;;  %1881 = vadd.xlane.f32.xlu1 %v1880_v41 }
0x195f   :  { %v624_v30 = vsel %vm440_vm5, %v619_v19, 0.0 }
0x1960   :  { %v621_v0 = vpop.permute.xlu0 %620 }
0x1961   :  { %v627_v35 = vsel %vm440_vm5, %v621_v0, 0.0 }
0x1962   :  { %625 = vadd.xlane.f32.xlu1 %v624_v30 }
0x1966   :  { %628 = vadd.xlane.f32.xlu1 %v627_v35 }
0x1972   :  { %250 = vperm.xlu0 %2474, %v3310_v50  }
0x199a   :  { %v1072_v37 = vpop.xlane.xlu0 %1071 }
0x199b   :  { %v1082_v59 = vrot.slane %v1072_v37, %v634_v55 }
0x199d   :  { %v1069_v29 = vpop.xlane.xlu1 %1068 }
0x199e   :  { %v1474_v40 = vpop.xlane.xlu0 %1473  ;;  %v1078_v49 = vrot.slane %v1069_v29, %v634_v55 }
0x19a1   :  { %v1477_v21 = vpop.xlane.xlu1 %1476 }
0x19e9   :  { %v1879_v43 = vpop.xlane.xlu0 %1878 }
0x19eb   :  { %v1882_v42 = vpop.xlane.xlu1 %1881 }
0x19ef   :  { %v626_v48 = vpop.xlane.xlu1 %625 }
0x19f1   :  { %v251_v47 = vpop.permute.xlu0 %250 }
0x19f2   :  { %vm252_vm5 = vcmp.lt.s32.totalorder %v2884_v14, %v251_v47  ;;  %vm781_vm10 = vcmp.eq.s32.totalorder %v2884_v14, %v251_v47 }
0x19f3   :  { %2599 = shalt.err (!%p2596_p4)
}
0x19f4   :  { %s2600_s7 = scalar_lea.hbm %s3490_s12, 32 }
0x19f5   :  { %p2601_p5 = scmp.ne.s32.totalorder %s3490_s12, %s2600_s7  ;;  %p2604_p6 = scmp.lt.u32.totalorder %s2600_s7, %s3490_s12 }
0x19f7   :  { %p2606_p7 = pnand %p2604_p6, %p2601_p5 }
0x19f9   :  { %2609 = shalt.err (!%p2606_p7)
}
0x19fa   :  { %2117 = dma.vmem_to_hbm [thread:$0]  %s2115_s9, 32, %s3490_s12, [#allocation6]   ;;  %vm783_vm11 = vcmp.ne.s32.totalorder %v2884_v14, %v2886_v26  ;;  %vm782_vm12 = vmor %vm252_vm5, %vm781_vm10  ;;  %v629_v51 = vpop.xlane.xlu1 %628  ;;  %v1487_v50 = vrot.slane %v1477_v21, %v634_v55  ;;  %v635_v15 = vrot.slane %v626_v48, %v634_v55  ;;  %v1083_v2 = vsel %vm640_vm9, %v1082_v59, %v1078_v49 }
0x19fb   :  { %vm784_vm14 = vmand %vm782_vm12, %vm783_vm11  ;;  %v639_v60 = vrot.slane %v629_v51, %v634_v55  ;;  %vm1212_vm0 = vcmp.ne.s32.totalorder %v2884_v14, %v3100_v54  ;;  %v1483_v18 = vrot.slane %v1474_v40, %v634_v55  ;;  %s2654_s12 = smov 8   ;;  %v1892_v5 = vrot.slane %v1882_v42, %v634_v55  ;;  %s2655_s14 = smov 16  }
0x19fc   :  { %v1085_v17 = vsel %vm784_vm14, %v1083_v2, -1e+09  ;;  %vm1213_vm4 = vmand %vm784_vm14, %vm1212_vm0  ;;  %vm1617_vm1 = vcmp.ne.s32.totalorder %v2884_v14, %v3206_v58  ;;  %v1888_v54 = vrot.slane %v1879_v43, %v634_v55  ;;  %s2656_s15 = smov 24   ;;  %vm1090_vm7 = vcmask 123968   ;;  %s2657_s16 = smov [#allocation3]  }
0x19fd   :  { %v641_v4 = vsel %vm640_vm9, %v639_v60, %v635_v15  ;;  %1087 = vrot.lane.b32.xlu1 %v1085_v17, %s2654_s12  ;;  %v1488_v11 = vsel %vm640_vm9, %v1487_v50, %v1483_v18  ;;  %vm1618_vm2 = vmand %vm1213_vm4, %vm1617_vm1  ;;  %vm1495_vm15 = vcmask 189568   ;;  %s2104_s8 = sshll.u32 %s2657_s16, 4  ;;  %s2105_s8 = int_to_ptr.vmem [resolvable:$true] %s2104_s8 }
0x19fe   :  { %v643_v26 = vsel %vm252_vm5, %v641_v4, -1e+09  ;;  %v1490_v33 = vsel %vm1213_vm4, %v1488_v11, -1e+09  ;;  %v1893_v25 = vsel %vm640_vm9, %v1892_v5, %v1888_v54  ;;  %s2610_s17 = scalar_lea.vmem %s2105_s8, 32  ;;  %p2615_p9 = scmp.lt.s32.totalorder %s2105_s8, %s2105_s8 }
0x19ff   :  { %645 = vst.msk [vmem:[#allocation3] sm:$0x3] %vm644_vm13, %v643_v26  ;;  %v1895_v36 = vsel %vm1618_vm2, %v1893_v25, -1e+09  ;;  %vm1900_vm13 = vcmask 255168   ;;  %p2611_p8 = scmp.ne.s32.totalorder %s2105_s8, %s2610_s17  ;;  %p2616_p10 = scmp.lt.s32.totalorder %s2610_s17, %s2610_s17 }
0x1a01   :  { %1492 = vrot.lane.b32.xlu1 %v1490_v33, %s2655_s14  ;;  %p2617_p11 = por %p2616_p10, %p2615_p9 }
0x1a03   :  { %p2618_p12 = pnand %p2617_p11, %p2611_p8 }
0x1a05   :  { %1897 = vrot.lane.b32.xlu1 %v1895_v36, %s2656_s15 }
0x1a6f   :  { %v1088_v53 = vpop.permute.xlu1 %1087 }
0x1a70   :  { %1091 = vst.msk [vmem:[#allocation3] sm:$0x3] %vm1090_vm7, %v1088_v53 }
0x1a73   :  { %v1493_v61 = vpop.permute.xlu1 %1492 }
0x1a74   :  { %1496 = vst.msk [vmem:[#allocation3] sm:$0x3] %vm1495_vm15, %v1493_v61 }
0x1a77   :  { %v1898_v14 = vpop.permute.xlu1 %1897 }
0x1a78   :  { %1901 = vst.msk [vmem:[#allocation3] sm:$0x3] %vm1900_vm13, %v1898_v14 }
0x1a79   :  { %2621 = shalt.err (!%p2618_p12)
}
0x1a7a   :  { %s2622_s19 = scalar_lea.hbm %s3489_s11, 32 }
0x1a7b   :  { %p2623_p13 = scmp.ne.s32.totalorder %s3489_s11, %s2622_s19  ;;  %p2626_p0 = scmp.lt.u32.totalorder %s2622_s19, %s3489_s11 }
0x1a7d   :  { %p2628_p1 = pnand %p2626_p0, %p2623_p13 }
0x1a7f   :  { %2631 = shalt.err (!%p2628_p1)
}
0x1a80   :  { %2107 = dma.vmem_to_hbm [thread:$0]  %s2105_s8, 32, %s3489_s11, [#allocation4]  }
0x1a81   :  { %2632 = dma.done.wait [#allocation4], 32  }
0x1a82   :  { %2633 = vsyncadd [#allocation4], 4294967264 }
0x1a83   :  { %2634 = dma.done.wait [#allocation6], 32  }
0x1a84   :  { %2635 = vsyncadd [#allocation6], 4294967264 }
0x1a85   :  { %2124 = vsyncpa [#allocation4], 1 }
0x1a86   :  { %2125 = vsyncpa [#allocation6], 1 }

</bundles_post_ra>
